<compile_context>
chip_gen: v7x
topology: tpu7x:2x2x1
jax: 0.10.0
libtpu: 0.0.40
codegen_flags: <defaults>
</compile_context>

<pallas_src>
import functools
import math

import jax
import jax.numpy as jnp
from jax.experimental import pallas as pl
from jax.experimental.pallas import tpu as pltpu


def _layernorm(v, g, b, eps=1e-5):
    # matches nn.LayerNorm: biased variance, eps inside rsqrt
    mu = jnp.mean(v, axis=-1, keepdims=True)
    var = jnp.mean((v - mu) ** 2, axis=-1, keepdims=True)
    return (v - mu) * jax.lax.rsqrt(var + eps) * g + b


def _gelu_exact(x):
    # nn.GELU default (erf-based, not tanh approximation)
    return 0.5 * x * (1.0 + jax.lax.erf(x * (1.0 / math.sqrt(2.0))))


def block_kernel(x_ref,
                 ln1_g_ref, ln1_b_ref,
                 qkv_wT_ref, qkv_b_ref,
                 proj_wT_ref, proj_b_ref,
                 ln2_g_ref, ln2_b_ref,
                 fc1_wT_ref, fc1_b_ref,
                 fc2_wT_ref, fc2_b_ref,
                 o_ref,
                 qkv_ref, attn_ref,
                 *, num_heads, tokens, pad_hd):
    M, _C = x_ref.shape                   # M = batch_tile * tokens rows
    bt = M // tokens
    Cq = num_heads * pad_hd               # padded concat-head width (multiple of 128)
    bf16 = jnp.bfloat16

    # ---- norm1 + fused QKV projection (one GEMM, K = C) -> VMEM scratch -------
    xn = _layernorm(x_ref[...], ln1_g_ref[0], ln1_b_ref[0])          # f32 VPU math
    qkv_ref[...] = (jnp.dot(xn.astype(bf16), qkv_wT_ref[...],
                            preferred_element_type=jnp.float32)
                    + qkv_b_ref[0])                                   # (M, 3*Cq)

    # ---- attention: per (batch-in-tile, head) ---------------------------------
    # pad_hd % 128 == 0, so every slice / store is 128-lane aligned; nothing is
    # carried across iterations (per-head output goes straight to attn_ref).
    for b in range(bt):                   # static unrolled loops, bounded live ranges
        r0 = b * tokens
        for h in range(num_heads):
            c0 = h * pad_hd
            qh = qkv_ref[pl.ds(r0, tokens), pl.ds(c0, pad_hd)].astype(bf16)
            kh = qkv_ref[pl.ds(r0, tokens), pl.ds(Cq + c0, pad_hd)].astype(bf16)
            vh = qkv_ref[pl.ds(r0, tokens), pl.ds(2 * Cq + c0, pad_hd)].astype(bf16)
            # scores = qh @ kh^T (scale pre-folded into Q columns in the wrapper)
            s = jax.lax.dot_general(qh, kh, (((1,), (1,)), ((), ())),
                                    preferred_element_type=jnp.float32)
            s = s - jnp.max(s, axis=-1, keepdims=True)
            p = jnp.exp(s)                                            # f32 softmax
            p = p * pl.reciprocal(jnp.sum(p, axis=-1, keepdims=True), approx=True)
            attn_ref[pl.ds(r0, tokens), pl.ds(c0, pad_hd)] = jnp.dot(
                p.astype(bf16), vh, preferred_element_type=jnp.float32)

    # ---- ONE full-depth output projection GEMM (K = Cq) + first residual ------
    x1 = (x_ref[...]
          + jnp.dot(attn_ref[...].astype(bf16), proj_wT_ref[...],
                    preferred_element_type=jnp.float32)
          + proj_b_ref[0])

    # ---- norm2 + MLP -----------------------------------------------------------
    xn2 = _layernorm(x1, ln2_g_ref[0], ln2_b_ref[0])
    h1 = (jnp.dot(xn2.astype(bf16), fc1_wT_ref[...],
                  preferred_element_type=jnp.float32) + fc1_b_ref[0])
    h1 = _gelu_exact(h1)                                              # f32 erf GELU
    h2 = (jnp.dot(h1.astype(bf16), fc2_wT_ref[...],
                  preferred_element_type=jnp.float32) + fc2_b_ref[0])

    o_ref[...] = (x1 + h2).astype(o_ref.dtype)                        # second residual


_PARAM_ORDER = ["ln1_g", "ln1_b", "qkv_wT", "qkv_b", "proj_wT", "proj_b",
                "ln2_g", "ln2_b", "fc1_wT", "fc1_b", "fc2_wT", "fc2_b"]


def _pad_head_dim(hd):
    return ((hd + 127) // 128) * 128


def prepare_params(params, num_heads):
    """One-time parameter prep (hoisted out of the hot path):
       * fold the attention scale 1/sqrt(head_dim) into the Q columns,
       * zero-pad head_dim to a multiple of 128 in the QKV columns and the proj
         rows (exact: padded columns/rows are zero),
       * cast MXU GEMM weights to bf16 (biases / LayerNorm params stay f32)."""
    C = params["proj_wT"].shape[0]
    hd = C // num_heads
    pad_hd = _pad_head_dim(hd)
    scale = hd ** -0.5

    def pad_heads(a):            # (..., num_heads*hd) -> (..., num_heads*pad_hd)
        lead = a.shape[:-1]
        a = a.reshape(lead + (num_heads, hd))
        a = jnp.pad(a, [(0, 0)] * len(lead) + [(0, 0), (0, pad_hd - hd)])
        return a.reshape(lead + (num_heads * pad_hd,))

    qkv_wT, qkv_b = params["qkv_wT"], params["qkv_b"]
    q_w, k_w, v_w = qkv_wT[:, :C] * scale, qkv_wT[:, C:2 * C], qkv_wT[:, 2 * C:]
    q_b, k_b, v_b = qkv_b[:, :C] * scale, qkv_b[:, C:2 * C], qkv_b[:, 2 * C:]
    qkv_wT_p = jnp.concatenate([pad_heads(q_w), pad_heads(k_w), pad_heads(v_w)], -1)
    qkv_b_p = jnp.concatenate([pad_heads(q_b), pad_heads(k_b), pad_heads(v_b)], -1)

    proj_wT_p = params["proj_wT"].reshape(num_heads, hd, C)
    proj_wT_p = jnp.pad(proj_wT_p, ((0, 0), (0, pad_hd - hd), (0, 0)))
    proj_wT_p = proj_wT_p.reshape(num_heads * pad_hd, C)

    p = dict(params)
    p["qkv_wT"] = qkv_wT_p.astype(jnp.bfloat16)
    p["qkv_b"] = qkv_b_p
    p["proj_wT"] = proj_wT_p.astype(jnp.bfloat16)
    p["fc1_wT"] = params["fc1_wT"].astype(jnp.bfloat16)
    p["fc2_wT"] = params["fc2_wT"].astype(jnp.bfloat16)
    return p


def _vmem_limit_bytes():
    # ~75% of physical VMEM: ~48 MiB on v7x (64 MiB/TC), ~96 MiB on v5e/v6e (128 MiB)
    try:
        cap = int(pltpu.get_tpu_info().vmem_capacity_bytes)
        return max(32 * 1024 * 1024, min(112 * 1024 * 1024, (cap * 3) // 4))
    except Exception:
        return 48 * 1024 * 1024          # safe on every generation


@functools.lru_cache(maxsize=None)
def _buffered_weights_supported():
    """AOT lowering-only capability probe for pipeline_mode=pl.Buffered(1)."""
    if not hasattr(pl, "Buffered"):
        return False
    try:
        def k(x_ref, w_ref, o_ref):
            o_ref[...] = x_ref[...] + w_ref[...]

        fn = pl.pallas_call(
            k,
            out_shape=jax.ShapeDtypeStruct((8, 128), jnp.float32),
            grid_spec=pltpu.PrefetchScalarGridSpec(
                num_scalar_prefetch=0,
                grid=(1,),
                in_specs=[pl.BlockSpec((8, 128), lambda i: (0, 0)),
                          pl.BlockSpec((8, 128), lambda i: (0, 0),
                                       pipeline_mode=pl.Buffered(1))],
                out_specs=pl.BlockSpec((8, 128), lambda i: (0, 0))))
        arg = jax.ShapeDtypeStruct((8, 128), jnp.float32)
        jax.jit(fn).lower(arg, arg)      # lowering only, no execution
        return True
    except Exception:
        return False


def vit_block_pallas(x, prepared, num_heads, *, batch_tile=None):
    """x: (B, N, C) f32; prepared: output of prepare_params()."""
    B, N, C = x.shape
    Cq = prepared["proj_wT"].shape[0]    # num_heads * pad_hd
    pad_hd = Cq // num_heads
    hidden = prepared["fc1_wT"].shape[1]

    if batch_tile is None:
        # keep >= 2 grid steps where possible (v7x has 2 TensorCores) while still
        # amortizing the per-step overhead with a decent row count.
        batch_tile = 2 if (B % 2 == 0 and B > 2) else 1
    assert B % batch_tile == 0, "batch_tile must divide batch"
    rows = batch_tile * N                # rows per grid step
    assert N % 8 == 0 and C % 128 == 0 and hidden % 128 == 0, \
        "kernel needs (8,128)-aligned shapes"
    # TODO(synk): real ViT token counts (e.g. N=197) need explicit padding of N to a multiple of 8.

    args = [prepared[k] for k in _PARAM_ORDER]
    x2 = x.reshape(B * N, C)             # flatten (B, N) for lane-dense GEMMs

    kernel = functools.partial(block_kernel, num_heads=num_heads, tokens=N,
                               pad_hd=pad_hd)

    use_buffered = _buffered_weights_supported()

    def weight_spec(shape):
        idx = lambda i: (0,) * len(shape)
        if use_buffered:                 # resident weights -> single-buffered
            return pl.BlockSpec(shape, idx, pipeline_mode=pl.Buffered(1))
        return pl.BlockSpec(shape, idx)

    param_specs = [weight_spec(prepared[k].shape) for k in _PARAM_ORDER]

    # advisory cost estimate (GEMM flops + softmax/GELU transcendentals)
    flops = (2 * B * N * C * 3 * Cq                    # qkv
             + 2 * B * num_heads * N * N * pad_hd * 2  # scores + p@v
             + 2 * B * N * Cq * C                      # proj
             + 2 * B * N * C * hidden * 2)             # fc1 + fc2
    transcendentals = B * num_heads * N * N + B * N * hidden
    bytes_accessed = 8 * B * N * C + sum(int(a.size) * a.dtype.itemsize for a in args)

    call = pl.pallas_call(
        kernel,
        out_shape=jax.ShapeDtypeStruct((B * N, C), x.dtype),
        grid_spec=pltpu.PrefetchScalarGridSpec(
            num_scalar_prefetch=0,
            grid=(B // batch_tile,),
            in_specs=[pl.BlockSpec((rows, C), lambda i: (i, 0))] + param_specs,
            out_specs=pl.BlockSpec((rows, C), lambda i: (i, 0)),
            scratch_shapes=[pltpu.VMEM((rows, 3 * Cq), jnp.float32),  # qkv slab
                            pltpu.VMEM((rows, Cq), jnp.float32)],     # per-head outputs
        ),
        compiler_params=pltpu.CompilerParams(
            dimension_semantics=("parallel",),
            vmem_limit_bytes=_vmem_limit_bytes(),
        ),
        cost_estimate=pl.CostEstimate(flops=int(flops),
                                      transcendentals=int(transcendentals),
                                      bytes_accessed=int(bytes_accessed)),
    )
    return call(x2, *args).reshape(B, N, C)


# ------------------------ pure-JAX f32 reference (for checking) ----------------
def vit_block_ref(x, params, num_heads):
    B, N, C = x.shape
    hd = C // num_heads
    xn = _layernorm(x, params["ln1_g"][0], params["ln1_b"][0])
    qkv = xn @ params["qkv_wT"] + params["qkv_b"][0]
    qkv = qkv.reshape(B, N, 3, num_heads, hd).transpose(2, 0, 3, 1, 4)
    q, k, v = qkv[0], qkv[1], qkv[2]
    attn = jnp.einsum("bhnd,bhmd->bhnm", q, k) * (hd ** -0.5)
    attn = jax.nn.softmax(attn, axis=-1)
    o = jnp.einsum("bhnm,bhmd->bhnd", attn, v).transpose(0, 2, 1, 3).reshape(B, N, C)
    o = o @ params["proj_wT"] + params["proj_b"][0]
    x1 = x + o
    xn2 = _layernorm(x1, params["ln2_g"][0], params["ln2_b"][0])
    h1 = _gelu_exact(xn2 @ params["fc1_wT"] + params["fc1_b"][0])
    h2 = h1 @ params["fc2_wT"] + params["fc2_b"][0]
    return x1 + h2


def make_params(key, dim, mlp_ratio=4.0):
    hidden = int(dim * mlp_ratio)
    keys = jax.random.split(key, 8)
    std = 0.02
    return {
        "ln1_g": jnp.ones((1, dim), jnp.float32),
        "ln1_b": jnp.zeros((1, dim), jnp.float32),
        # qkv: nn.Linear(dim, 3*dim, bias=True) -> pass W^T of shape (dim, 3*dim)
        "qkv_wT": jax.random.normal(keys[0], (dim, 3 * dim), jnp.float32) * std,
        "qkv_b": jax.random.normal(keys[1], (1, 3 * dim), jnp.float32) * std,
        # proj: nn.Linear(dim, dim)
        "proj_wT": jax.random.normal(keys[2], (dim, dim), jnp.float32) * std,
        "proj_b": jax.random.normal(keys[3], (1, dim), jnp.float32) * std,
        "ln2_g": jnp.ones((1, dim), jnp.float32),
        "ln2_b": jnp.zeros((1, dim), jnp.float32),
        # fc1: nn.Linear(dim, hidden)
        "fc1_wT": jax.random.normal(keys[4], (dim, hidden), jnp.float32) * std,
        "fc1_b": jax.random.normal(keys[5], (1, hidden), jnp.float32) * std,
        # fc2: nn.Linear(hidden, dim)
        "fc2_wT": jax.random.normal(keys[6], (hidden, dim), jnp.float32) * std,
        "fc2_b": jax.random.normal(keys[7], (1, dim), jnp.float32) * std,
    }


if __name__ == "__main__":
    # (8,128)-aligned small shapes: tokens multiple of 8, channels multiple of 128
    B, N, C = 4, 64, 128
    num_heads = 2               # head_dim = 64 -> padded to 128 lanes in the weights

    key = jax.random.PRNGKey(0)
    kx, kp = jax.random.split(key)
    x = jax.random.normal(kx, (B, N, C), jnp.float32)
    params = make_params(kp, C)

    prepared = prepare_params(params, num_heads)          # one-time weight prep
    out = vit_block_pallas(x, prepared, num_heads, batch_tile=2)
    out = jax.block_until_ready(out)

    ref = vit_block_ref(x, params, num_heads)
    assert out.shape == (B, N, C)
    # bf16 MXU operands + approx reciprocal -> looser tolerance than pure-f32
    max_err = float(jnp.max(jnp.abs(out - ref)))
    assert jnp.allclose(out, ref, atol=2e-2, rtol=2e-2), (
        "mismatch vs reference (max abs err %f)" % max_err)

    print("KERNEL_OK")
</pallas_src>

<mosaic_0001>
module attributes {stable_mosaic.version = 11 : i64} {
  func.func @block_kernel(%arg0: i32, %arg1: memref<128x128xf32, #tpu.memory_space<vmem>>, %arg2: memref<1x128xf32, #tpu.memory_space<vmem>>, %arg3: memref<1x128xf32, #tpu.memory_space<vmem>>, %arg4: memref<128x768xbf16, #tpu.memory_space<vmem>>, %arg5: memref<1x768xf32, #tpu.memory_space<vmem>>, %arg6: memref<256x128xbf16, #tpu.memory_space<vmem>>, %arg7: memref<1x128xf32, #tpu.memory_space<vmem>>, %arg8: memref<1x128xf32, #tpu.memory_space<vmem>>, %arg9: memref<1x128xf32, #tpu.memory_space<vmem>>, %arg10: memref<128x512xbf16, #tpu.memory_space<vmem>>, %arg11: memref<1x512xf32, #tpu.memory_space<vmem>>, %arg12: memref<512x128xbf16, #tpu.memory_space<vmem>>, %arg13: memref<1x128xf32, #tpu.memory_space<vmem>>, %arg14: memref<128x128xf32, #tpu.memory_space<vmem>>, %arg15: memref<128x768xf32, #tpu.memory_space<vmem>>, %arg16: memref<128x256xf32, #tpu.memory_space<vmem>>) attributes {dimension_semantics = [#tpu.dimension_semantics<parallel>], iteration_bounds = array<i64: 2>, scalar_prefetch = 0 : i64, scratch_operands = 2 : i64, tpu.core_type = #tpu.core_type<tc>, window_params = [{transform_indices = @transform_0, window_bounds = array<i64: 128, 128>}, {pipeline_mode = #tpu.pipeline_mode<synchronous>, transform_indices = @transform_1, window_bounds = array<i64: 1, 128>}, {pipeline_mode = #tpu.pipeline_mode<synchronous>, transform_indices = @transform_2, window_bounds = array<i64: 1, 128>}, {pipeline_mode = #tpu.pipeline_mode<synchronous>, transform_indices = @transform_3, window_bounds = array<i64: 128, 768>}, {pipeline_mode = #tpu.pipeline_mode<synchronous>, transform_indices = @transform_4, window_bounds = array<i64: 1, 768>}, {pipeline_mode = #tpu.pipeline_mode<synchronous>, transform_indices = @transform_5, window_bounds = array<i64: 256, 128>}, {pipeline_mode = #tpu.pipeline_mode<synchronous>, transform_indices = @transform_6, window_bounds = array<i64: 1, 128>}, {pipeline_mode = #tpu.pipeline_mode<synchronous>, transform_indices = @transform_7, window_bounds = array<i64: 1, 128>}, {pipeline_mode = #tpu.pipeline_mode<synchronous>, transform_indices = @transform_8, window_bounds = array<i64: 1, 128>}, {pipeline_mode = #tpu.pipeline_mode<synchronous>, transform_indices = @transform_9, window_bounds = array<i64: 128, 512>}, {pipeline_mode = #tpu.pipeline_mode<synchronous>, transform_indices = @transform_10, window_bounds = array<i64: 1, 512>}, {pipeline_mode = #tpu.pipeline_mode<synchronous>, transform_indices = @transform_11, window_bounds = array<i64: 512, 128>}, {pipeline_mode = #tpu.pipeline_mode<synchronous>, transform_indices = @transform_12, window_bounds = array<i64: 1, 128>}, {transform_indices = @transform_13, window_bounds = array<i64: 128, 128>}]} {
    %c0 = arith.constant 0 : index
    %c0_0 = arith.constant 0 : index
    %0 = vector.load %arg1[%c0, %c0_0] : memref<128x128xf32, #tpu.memory_space<vmem>>, vector<128x128xf32>
    %c0_1 = arith.constant 0 : index
    %c0_2 = arith.constant 0 : index
    %1 = vector.load %arg2[%c0_1, %c0_2] : memref<1x128xf32, #tpu.memory_space<vmem>>, vector<1x128xf32>
    %2 = vector.shape_cast %1 : vector<1x128xf32> to vector<128xf32>
    %c0_3 = arith.constant 0 : index
    %c0_4 = arith.constant 0 : index
    %3 = vector.load %arg3[%c0_3, %c0_4] : memref<1x128xf32, #tpu.memory_space<vmem>>, vector<1x128xf32>
    %4 = vector.shape_cast %3 : vector<1x128xf32> to vector<128xf32>
    %cst = arith.constant dense<0.000000e+00> : vector<128xf32>
    %5 = vector.multi_reduction <add>, %0, %cst [1] : vector<128x128xf32> to vector<128xf32>
    %6 = vector.shape_cast %5 : vector<128xf32> to vector<128x1xf32>
    %cst_5 = arith.constant 1.280000e+02 : f32
    %7 = vector.broadcast %cst_5 : f32 to vector<128x1xf32>
    %8 = arith.divf %6, %7 : vector<128x1xf32>
    %9 = vector.broadcast %8 : vector<128x1xf32> to vector<128x128xf32>
    %10 = arith.subf %0, %9 : vector<128x128xf32>
    %11 = arith.mulf %10, %10 : vector<128x128xf32>
    %cst_6 = arith.constant dense<0.000000e+00> : vector<128xf32>
    %12 = vector.multi_reduction <add>, %11, %cst_6 [1] : vector<128x128xf32> to vector<128xf32>
    %13 = vector.shape_cast %12 : vector<128xf32> to vector<128x1xf32>
    %cst_7 = arith.constant 1.280000e+02 : f32
    %14 = vector.broadcast %cst_7 : f32 to vector<128x1xf32>
    %15 = arith.divf %13, %14 : vector<128x1xf32>
    %16 = vector.broadcast %8 : vector<128x1xf32> to vector<128x128xf32>
    %17 = arith.subf %0, %16 : vector<128x128xf32>
    %cst_8 = arith.constant 9.99999974E-6 : f32
    %18 = vector.broadcast %cst_8 : f32 to vector<128x1xf32>
    %19 = arith.addf %15, %18 : vector<128x1xf32>
    %20 = math.rsqrt %19 : vector<128x1xf32>
    %21 = vector.broadcast %20 : vector<128x1xf32> to vector<128x128xf32>
    %22 = arith.mulf %17, %21 : vector<128x128xf32>
    %23 = vector.shape_cast %2 : vector<128xf32> to vector<1x128xf32>
    %24 = vector.broadcast %23 : vector<1x128xf32> to vector<128x128xf32>
    %25 = arith.mulf %22, %24 : vector<128x128xf32>
    %26 = vector.shape_cast %4 : vector<128xf32> to vector<1x128xf32>
    %27 = vector.broadcast %26 : vector<1x128xf32> to vector<128x128xf32>
    %28 = arith.addf %25, %27 : vector<128x128xf32>
    %29 = arith.truncf %28 : vector<128x128xf32> to vector<128x128xbf16>
    %c0_9 = arith.constant 0 : index
    %c0_10 = arith.constant 0 : index
    %30 = vector.load %arg4[%c0_9, %c0_10] : memref<128x768xbf16, #tpu.memory_space<vmem>>, vector<128x768xbf16>
    %cst_11 = arith.constant dense<0.000000e+00> : vector<128x768xf32>
    %31 = tpu.matmul %29, %30, %cst_11 {dimension_numbers = #tpu.dot_dimension_numbers<[1], [0], [0], [1], [0, 0, 1, 1], [], []>} : vector<128x128xbf16>, vector<128x768xbf16>, vector<128x768xf32> -> vector<128x768xf32>
    %c0_12 = arith.constant 0 : index
    %c0_13 = arith.constant 0 : index
    %32 = vector.load %arg5[%c0_12, %c0_13] : memref<1x768xf32, #tpu.memory_space<vmem>>, vector<1x768xf32>
    %33 = vector.shape_cast %32 : vector<1x768xf32> to vector<768xf32>
    %34 = vector.shape_cast %33 : vector<768xf32> to vector<1x768xf32>
    %35 = vector.broadcast %34 : vector<1x768xf32> to vector<128x768xf32>
    %36 = arith.addf %31, %35 : vector<128x768xf32>
    %c0_14 = arith.constant 0 : index
    %c0_15 = arith.constant 0 : index
    %37 = vector.load %arg15[%c0_14, %c0_15] : memref<128x768xf32, #tpu.memory_space<vmem>>, vector<128x768xf32>
    tpu.vector_store %arg15[%c0_14, %c0_15], %36 {strides = array<i32>} : memref<128x768xf32, #tpu.memory_space<vmem>>, vector<128x768xf32>,
    %c0_16 = arith.constant 0 : index
    %c0_17 = arith.constant 0 : index
    %38 = vector.load %arg15[%c0_16, %c0_17] : memref<128x768xf32, #tpu.memory_space<vmem>>, vector<64x128xf32>
    %39 = arith.truncf %38 : vector<64x128xf32> to vector<64x128xbf16>
    %c0_18 = arith.constant 0 : index
    %c256 = arith.constant 256 : index
    %40 = vector.load %arg15[%c0_18, %c256] : memref<128x768xf32, #tpu.memory_space<vmem>>, vector<64x128xf32>
    %41 = arith.truncf %40 : vector<64x128xf32> to vector<64x128xbf16>
    %c0_19 = arith.constant 0 : index
    %c512 = arith.constant 512 : index
    %42 = vector.load %arg15[%c0_19, %c512] : memref<128x768xf32, #tpu.memory_space<vmem>>, vector<64x128xf32>
    %43 = arith.truncf %42 : vector<64x128xf32> to vector<64x128xbf16>
    %cst_20 = arith.constant dense<0.000000e+00> : vector<64x64xf32>
    %44 = tpu.matmul %39, %41, %cst_20 {dimension_numbers = #tpu.dot_dimension_numbers<[1], [1], [0], [0], [0, 0, 1, 0], [], []>} : vector<64x128xbf16>, vector<64x128xbf16>, vector<64x64xf32> -> vector<64x64xf32>
    %cst_21 = arith.constant dense<0xFF800000> : vector<64xf32>
    %45 = vector.multi_reduction <maximumf>, %44, %cst_21 [1] : vector<64x64xf32> to vector<64xf32>
    %46 = vector.shape_cast %45 : vector<64xf32> to vector<64x1xf32>
    %47 = vector.broadcast %46 : vector<64x1xf32> to vector<64x64xf32>
    %48 = arith.subf %44, %47 : vector<64x64xf32>
    %49 = math.exp %48 : vector<64x64xf32>
    %cst_22 = arith.constant dense<0.000000e+00> : vector<64xf32>
    %50 = vector.multi_reduction <add>, %49, %cst_22 [1] : vector<64x64xf32> to vector<64xf32>
    %51 = vector.shape_cast %50 : vector<64xf32> to vector<64x1xf32>
    %52 = tpu.reciprocal %51 {approx = true} : vector<64x1xf32> -> vector<64x1xf32>
    %53 = vector.broadcast %52 : vector<64x1xf32> to vector<64x64xf32>
    %54 = arith.mulf %49, %53 : vector<64x64xf32>
    %55 = arith.truncf %54 : vector<64x64xf32> to vector<64x64xbf16>
    %cst_23 = arith.constant dense<0.000000e+00> : vector<64x128xf32>
    %56 = tpu.matmul %55, %43, %cst_23 {dimension_numbers = #tpu.dot_dimension_numbers<[1], [0], [0], [1], [0, 0, 1, 1], [], []>} : vector<64x64xbf16>, vector<64x128xbf16>, vector<64x128xf32> -> vector<64x128xf32>
    %c0_24 = arith.constant 0 : index
    %c0_25 = arith.constant 0 : index
    %57 = vector.load %arg16[%c0_24, %c0_25] : memref<128x256xf32, #tpu.memory_space<vmem>>, vector<64x128xf32>
    tpu.vector_store %arg16[%c0_24, %c0_25], %56 {strides = array<i32>} : memref<128x256xf32, #tpu.memory_space<vmem>>, vector<64x128xf32>,
    %c0_26 = arith.constant 0 : index
    %c128 = arith.constant 128 : index
    %58 = vector.load %arg15[%c0_26, %c128] : memref<128x768xf32, #tpu.memory_space<vmem>>, vector<64x128xf32>
    %59 = arith.truncf %58 : vector<64x128xf32> to vector<64x128xbf16>
    %c0_27 = arith.constant 0 : index
    %c384 = arith.constant 384 : index
    %60 = vector.load %arg15[%c0_27, %c384] : memref<128x768xf32, #tpu.memory_space<vmem>>, vector<64x128xf32>
    %61 = arith.truncf %60 : vector<64x128xf32> to vector<64x128xbf16>
    %c0_28 = arith.constant 0 : index
    %c640 = arith.constant 640 : index
    %62 = vector.load %arg15[%c0_28, %c640] : memref<128x768xf32, #tpu.memory_space<vmem>>, vector<64x128xf32>
    %63 = arith.truncf %62 : vector<64x128xf32> to vector<64x128xbf16>
    %cst_29 = arith.constant dense<0.000000e+00> : vector<64x64xf32>
    %64 = tpu.matmul %59, %61, %cst_29 {dimension_numbers = #tpu.dot_dimension_numbers<[1], [1], [0], [0], [0, 0, 1, 0], [], []>} : vector<64x128xbf16>, vector<64x128xbf16>, vector<64x64xf32> -> vector<64x64xf32>
    %cst_30 = arith.constant dense<0xFF800000> : vector<64xf32>
    %65 = vector.multi_reduction <maximumf>, %64, %cst_30 [1] : vector<64x64xf32> to vector<64xf32>
    %66 = vector.shape_cast %65 : vector<64xf32> to vector<64x1xf32>
    %67 = vector.broadcast %66 : vector<64x1xf32> to vector<64x64xf32>
    %68 = arith.subf %64, %67 : vector<64x64xf32>
    %69 = math.exp %68 : vector<64x64xf32>
    %cst_31 = arith.constant dense<0.000000e+00> : vector<64xf32>
    %70 = vector.multi_reduction <add>, %69, %cst_31 [1] : vector<64x64xf32> to vector<64xf32>
    %71 = vector.shape_cast %70 : vector<64xf32> to vector<64x1xf32>
    %72 = tpu.reciprocal %71 {approx = true} : vector<64x1xf32> -> vector<64x1xf32>
    %73 = vector.broadcast %72 : vector<64x1xf32> to vector<64x64xf32>
    %74 = arith.mulf %69, %73 : vector<64x64xf32>
    %75 = arith.truncf %74 : vector<64x64xf32> to vector<64x64xbf16>
    %cst_32 = arith.constant dense<0.000000e+00> : vector<64x128xf32>
    %76 = tpu.matmul %75, %63, %cst_32 {dimension_numbers = #tpu.dot_dimension_numbers<[1], [0], [0], [1], [0, 0, 1, 1], [], []>} : vector<64x64xbf16>, vector<64x128xbf16>, vector<64x128xf32> -> vector<64x128xf32>
    %c0_33 = arith.constant 0 : index
    %c128_34 = arith.constant 128 : index
    %77 = vector.load %arg16[%c0_33, %c128_34] : memref<128x256xf32, #tpu.memory_space<vmem>>, vector<64x128xf32>
    tpu.vector_store %arg16[%c0_33, %c128_34], %76 {strides = array<i32>} : memref<128x256xf32, #tpu.memory_space<vmem>>, vector<64x128xf32>,
    %c64 = arith.constant 64 : index
    %c0_35 = arith.constant 0 : index
    %78 = vector.load %arg15[%c64, %c0_35] : memref<128x768xf32, #tpu.memory_space<vmem>>, vector<64x128xf32>
    %79 = arith.truncf %78 : vector<64x128xf32> to vector<64x128xbf16>
    %c64_36 = arith.constant 64 : index
    %c256_37 = arith.constant 256 : index
    %80 = vector.load %arg15[%c64_36, %c256_37] : memref<128x768xf32, #tpu.memory_space<vmem>>, vector<64x128xf32>
    %81 = arith.truncf %80 : vector<64x128xf32> to vector<64x128xbf16>
    %c64_38 = arith.constant 64 : index
    %c512_39 = arith.constant 512 : index
    %82 = vector.load %arg15[%c64_38, %c512_39] : memref<128x768xf32, #tpu.memory_space<vmem>>, vector<64x128xf32>
    %83 = arith.truncf %82 : vector<64x128xf32> to vector<64x128xbf16>
    %cst_40 = arith.constant dense<0.000000e+00> : vector<64x64xf32>
    %84 = tpu.matmul %79, %81, %cst_40 {dimension_numbers = #tpu.dot_dimension_numbers<[1], [1], [0], [0], [0, 0, 1, 0], [], []>} : vector<64x128xbf16>, vector<64x128xbf16>, vector<64x64xf32> -> vector<64x64xf32>
    %cst_41 = arith.constant dense<0xFF800000> : vector<64xf32>
    %85 = vector.multi_reduction <maximumf>, %84, %cst_41 [1] : vector<64x64xf32> to vector<64xf32>
    %86 = vector.shape_cast %85 : vector<64xf32> to vector<64x1xf32>
    %87 = vector.broadcast %86 : vector<64x1xf32> to vector<64x64xf32>
    %88 = arith.subf %84, %87 : vector<64x64xf32>
    %89 = math.exp %88 : vector<64x64xf32>
    %cst_42 = arith.constant dense<0.000000e+00> : vector<64xf32>
    %90 = vector.multi_reduction <add>, %89, %cst_42 [1] : vector<64x64xf32> to vector<64xf32>
    %91 = vector.shape_cast %90 : vector<64xf32> to vector<64x1xf32>
    %92 = tpu.reciprocal %91 {approx = true} : vector<64x1xf32> -> vector<64x1xf32>
    %93 = vector.broadcast %92 : vector<64x1xf32> to vector<64x64xf32>
    %94 = arith.mulf %89, %93 : vector<64x64xf32>
    %95 = arith.truncf %94 : vector<64x64xf32> to vector<64x64xbf16>
    %cst_43 = arith.constant dense<0.000000e+00> : vector<64x128xf32>
    %96 = tpu.matmul %95, %83, %cst_43 {dimension_numbers = #tpu.dot_dimension_numbers<[1], [0], [0], [1], [0, 0, 1, 1], [], []>} : vector<64x64xbf16>, vector<64x128xbf16>, vector<64x128xf32> -> vector<64x128xf32>
    %c64_44 = arith.constant 64 : index
    %c0_45 = arith.constant 0 : index
    %97 = vector.load %arg16[%c64_44, %c0_45] : memref<128x256xf32, #tpu.memory_space<vmem>>, vector<64x128xf32>
    tpu.vector_store %arg16[%c64_44, %c0_45], %96 {strides = array<i32>} : memref<128x256xf32, #tpu.memory_space<vmem>>, vector<64x128xf32>,
    %c64_46 = arith.constant 64 : index
    %c128_47 = arith.constant 128 : index
    %98 = vector.load %arg15[%c64_46, %c128_47] : memref<128x768xf32, #tpu.memory_space<vmem>>, vector<64x128xf32>
    %99 = arith.truncf %98 : vector<64x128xf32> to vector<64x128xbf16>
    %c64_48 = arith.constant 64 : index
    %c384_49 = arith.constant 384 : index
    %100 = vector.load %arg15[%c64_48, %c384_49] : memref<128x768xf32, #tpu.memory_space<vmem>>, vector<64x128xf32>
    %101 = arith.truncf %100 : vector<64x128xf32> to vector<64x128xbf16>
    %c64_50 = arith.constant 64 : index
    %c640_51 = arith.constant 640 : index
    %102 = vector.load %arg15[%c64_50, %c640_51] : memref<128x768xf32, #tpu.memory_space<vmem>>, vector<64x128xf32>
    %103 = arith.truncf %102 : vector<64x128xf32> to vector<64x128xbf16>
    %cst_52 = arith.constant dense<0.000000e+00> : vector<64x64xf32>
    %104 = tpu.matmul %99, %101, %cst_52 {dimension_numbers = #tpu.dot_dimension_numbers<[1], [1], [0], [0], [0, 0, 1, 0], [], []>} : vector<64x128xbf16>, vector<64x128xbf16>, vector<64x64xf32> -> vector<64x64xf32>
    %cst_53 = arith.constant dense<0xFF800000> : vector<64xf32>
    %105 = vector.multi_reduction <maximumf>, %104, %cst_53 [1] : vector<64x64xf32> to vector<64xf32>
    %106 = vector.shape_cast %105 : vector<64xf32> to vector<64x1xf32>
    %107 = vector.broadcast %106 : vector<64x1xf32> to vector<64x64xf32>
    %108 = arith.subf %104, %107 : vector<64x64xf32>
    %109 = math.exp %108 : vector<64x64xf32>
    %cst_54 = arith.constant dense<0.000000e+00> : vector<64xf32>
    %110 = vector.multi_reduction <add>, %109, %cst_54 [1] : vector<64x64xf32> to vector<64xf32>
    %111 = vector.shape_cast %110 : vector<64xf32> to vector<64x1xf32>
    %112 = tpu.reciprocal %111 {approx = true} : vector<64x1xf32> -> vector<64x1xf32>
    %113 = vector.broadcast %112 : vector<64x1xf32> to vector<64x64xf32>
    %114 = arith.mulf %109, %113 : vector<64x64xf32>
    %115 = arith.truncf %114 : vector<64x64xf32> to vector<64x64xbf16>
    %cst_55 = arith.constant dense<0.000000e+00> : vector<64x128xf32>
    %116 = tpu.matmul %115, %103, %cst_55 {dimension_numbers = #tpu.dot_dimension_numbers<[1], [0], [0], [1], [0, 0, 1, 1], [], []>} : vector<64x64xbf16>, vector<64x128xbf16>, vector<64x128xf32> -> vector<64x128xf32>
    %c64_56 = arith.constant 64 : index
    %c128_57 = arith.constant 128 : index
    %117 = vector.load %arg16[%c64_56, %c128_57] : memref<128x256xf32, #tpu.memory_space<vmem>>, vector<64x128xf32>
    tpu.vector_store %arg16[%c64_56, %c128_57], %116 {strides = array<i32>} : memref<128x256xf32, #tpu.memory_space<vmem>>, vector<64x128xf32>,
    %c0_58 = arith.constant 0 : index
    %c0_59 = arith.constant 0 : index
    %118 = vector.load %arg1[%c0_58, %c0_59] : memref<128x128xf32, #tpu.memory_space<vmem>>, vector<128x128xf32>
    %c0_60 = arith.constant 0 : index
    %c0_61 = arith.constant 0 : index
    %119 = vector.load %arg16[%c0_60, %c0_61] : memref<128x256xf32, #tpu.memory_space<vmem>>, vector<128x256xf32>
    %120 = arith.truncf %119 : vector<128x256xf32> to vector<128x256xbf16>
    %c0_62 = arith.constant 0 : index
    %c0_63 = arith.constant 0 : index
    %121 = vector.load %arg6[%c0_62, %c0_63] : memref<256x128xbf16, #tpu.memory_space<vmem>>, vector<256x128xbf16>
    %cst_64 = arith.constant dense<0.000000e+00> : vector<128x128xf32>
    %122 = tpu.matmul %120, %121, %cst_64 {dimension_numbers = #tpu.dot_dimension_numbers<[1], [0], [0], [1], [0, 0, 1, 1], [], []>} : vector<128x256xbf16>, vector<256x128xbf16>, vector<128x128xf32> -> vector<128x128xf32>
    %123 = arith.addf %118, %122 : vector<128x128xf32>
    %c0_65 = arith.constant 0 : index
    %c0_66 = arith.constant 0 : index
    %124 = vector.load %arg7[%c0_65, %c0_66] : memref<1x128xf32, #tpu.memory_space<vmem>>, vector<1x128xf32>
    %125 = vector.shape_cast %124 : vector<1x128xf32> to vector<128xf32>
    %126 = vector.shape_cast %125 : vector<128xf32> to vector<1x128xf32>
    %127 = vector.broadcast %126 : vector<1x128xf32> to vector<128x128xf32>
    %128 = arith.addf %123, %127 : vector<128x128xf32>
    %c0_67 = arith.constant 0 : index
    %c0_68 = arith.constant 0 : index
    %129 = vector.load %arg8[%c0_67, %c0_68] : memref<1x128xf32, #tpu.memory_space<vmem>>, vector<1x128xf32>
    %130 = vector.shape_cast %129 : vector<1x128xf32> to vector<128xf32>
    %c0_69 = arith.constant 0 : index
    %c0_70 = arith.constant 0 : index
    %131 = vector.load %arg9[%c0_69, %c0_70] : memref<1x128xf32, #tpu.memory_space<vmem>>, vector<1x128xf32>
    %132 = vector.shape_cast %131 : vector<1x128xf32> to vector<128xf32>
    %cst_71 = arith.constant dense<0.000000e+00> : vector<128xf32>
    %133 = vector.multi_reduction <add>, %128, %cst_71 [1] : vector<128x128xf32> to vector<128xf32>
    %134 = vector.shape_cast %133 : vector<128xf32> to vector<128x1xf32>
    %cst_72 = arith.constant 1.280000e+02 : f32
    %135 = vector.broadcast %cst_72 : f32 to vector<128x1xf32>
    %136 = arith.divf %134, %135 : vector<128x1xf32>
    %137 = vector.broadcast %136 : vector<128x1xf32> to vector<128x128xf32>
    %138 = arith.subf %128, %137 : vector<128x128xf32>
    %139 = arith.mulf %138, %138 : vector<128x128xf32>
    %cst_73 = arith.constant dense<0.000000e+00> : vector<128xf32>
    %140 = vector.multi_reduction <add>, %139, %cst_73 [1] : vector<128x128xf32> to vector<128xf32>
    %141 = vector.shape_cast %140 : vector<128xf32> to vector<128x1xf32>
    %cst_74 = arith.constant 1.280000e+02 : f32
    %142 = vector.broadcast %cst_74 : f32 to vector<128x1xf32>
    %143 = arith.divf %141, %142 : vector<128x1xf32>
    %144 = vector.broadcast %136 : vector<128x1xf32> to vector<128x128xf32>
    %145 = arith.subf %128, %144 : vector<128x128xf32>
    %cst_75 = arith.constant 9.99999974E-6 : f32
    %146 = vector.broadcast %cst_75 : f32 to vector<128x1xf32>
    %147 = arith.addf %143, %146 : vector<128x1xf32>
    %148 = math.rsqrt %147 : vector<128x1xf32>
    %149 = vector.broadcast %148 : vector<128x1xf32> to vector<128x128xf32>
    %150 = arith.mulf %145, %149 : vector<128x128xf32>
    %151 = vector.shape_cast %130 : vector<128xf32> to vector<1x128xf32>
    %152 = vector.broadcast %151 : vector<1x128xf32> to vector<128x128xf32>
    %153 = arith.mulf %150, %152 : vector<128x128xf32>
    %154 = vector.shape_cast %132 : vector<128xf32> to vector<1x128xf32>
    %155 = vector.broadcast %154 : vector<1x128xf32> to vector<128x128xf32>
    %156 = arith.addf %153, %155 : vector<128x128xf32>
    %157 = arith.truncf %156 : vector<128x128xf32> to vector<128x128xbf16>
    %c0_76 = arith.constant 0 : index
    %c0_77 = arith.constant 0 : index
    %158 = vector.load %arg10[%c0_76, %c0_77] : memref<128x512xbf16, #tpu.memory_space<vmem>>, vector<128x512xbf16>
    %cst_78 = arith.constant dense<0.000000e+00> : vector<128x512xf32>
    %159 = tpu.matmul %157, %158, %cst_78 {dimension_numbers = #tpu.dot_dimension_numbers<[1], [0], [0], [1], [0, 0, 1, 1], [], []>} : vector<128x128xbf16>, vector<128x512xbf16>, vector<128x512xf32> -> vector<128x512xf32>
    %c0_79 = arith.constant 0 : index
    %c0_80 = arith.constant 0 : index
    %160 = vector.load %arg11[%c0_79, %c0_80] : memref<1x512xf32, #tpu.memory_space<vmem>>, vector<1x512xf32>
    %161 = vector.shape_cast %160 : vector<1x512xf32> to vector<512xf32>
    %162 = vector.shape_cast %161 : vector<512xf32> to vector<1x512xf32>
    %163 = vector.broadcast %162 : vector<1x512xf32> to vector<128x512xf32>
    %164 = arith.addf %159, %163 : vector<128x512xf32>
    %cst_81 = arith.constant 5.000000e-01 : f32
    %165 = vector.broadcast %cst_81 : f32 to vector<128x512xf32>
    %166 = arith.mulf %165, %164 : vector<128x512xf32>
    %cst_82 = arith.constant 0.707106769 : f32
    %167 = vector.broadcast %cst_82 : f32 to vector<128x512xf32>
    %168 = arith.mulf %164, %167 : vector<128x512xf32>
    %169 = math.erf %168 : vector<128x512xf32>
    %cst_83 = arith.constant 1.000000e+00 : f32
    %170 = vector.broadcast %cst_83 : f32 to vector<128x512xf32>
    %171 = arith.addf %170, %169 : vector<128x512xf32>
    %172 = arith.mulf %166, %171 : vector<128x512xf32>
    %173 = arith.truncf %172 : vector<128x512xf32> to vector<128x512xbf16>
    %c0_84 = arith.constant 0 : index
    %c0_85 = arith.constant 0 : index
    %174 = vector.load %arg12[%c0_84, %c0_85] : memref<512x128xbf16, #tpu.memory_space<vmem>>, vector<512x128xbf16>
    %cst_86 = arith.constant dense<0.000000e+00> : vector<128x128xf32>
    %175 = tpu.matmul %173, %174, %cst_86 {dimension_numbers = #tpu.dot_dimension_numbers<[1], [0], [0], [1], [0, 0, 1, 1], [], []>} : vector<128x512xbf16>, vector<512x128xbf16>, vector<128x128xf32> -> vector<128x128xf32>
    %c0_87 = arith.constant 0 : index
    %c0_88 = arith.constant 0 : index
    %176 = vector.load %arg13[%c0_87, %c0_88] : memref<1x128xf32, #tpu.memory_space<vmem>>, vector<1x128xf32>
    %177 = vector.shape_cast %176 : vector<1x128xf32> to vector<128xf32>
    %178 = vector.shape_cast %177 : vector<128xf32> to vector<1x128xf32>
    %179 = vector.broadcast %178 : vector<1x128xf32> to vector<128x128xf32>
    %180 = arith.addf %175, %179 : vector<128x128xf32>
    %181 = arith.addf %128, %180 : vector<128x128xf32>
    %c0_89 = arith.constant 0 : index
    %c0_90 = arith.constant 0 : index
    %182 = vector.load %arg14[%c0_89, %c0_90] : memref<128x128xf32, #tpu.memory_space<vmem>>, vector<128x128xf32>
    tpu.vector_store %arg14[%c0_89, %c0_90], %181 {strides = array<i32>} : memref<128x128xf32, #tpu.memory_space<vmem>>, vector<128x128xf32>,
    return
  }
  func.func @transform_0(%arg0: i32) -> (i32, i32) {
    %c0_i32 = arith.constant 0 : i32
    %c0_i32_0 = arith.constant 0 : i32
    return %arg0, %c0_i32 : i32, i32
  }
  func.func @transform_1(%arg0: i32) -> (i32, i32) {
    %c0_i32 = arith.constant 0 : i32
    %c0_i32_0 = arith.constant 0 : i32
    %c0_i32_1 = arith.constant 0 : i32
    return %c0_i32, %c0_i32_0 : i32, i32
  }
  func.func @transform_2(%arg0: i32) -> (i32, i32) {
    %c0_i32 = arith.constant 0 : i32
    %c0_i32_0 = arith.constant 0 : i32
    %c0_i32_1 = arith.constant 0 : i32
    return %c0_i32, %c0_i32_0 : i32, i32
  }
  func.func @transform_3(%arg0: i32) -> (i32, i32) {
    %c0_i32 = arith.constant 0 : i32
    %c0_i32_0 = arith.constant 0 : i32
    %c0_i32_1 = arith.constant 0 : i32
    return %c0_i32, %c0_i32_0 : i32, i32
  }
  func.func @transform_4(%arg0: i32) -> (i32, i32) {
    %c0_i32 = arith.constant 0 : i32
    %c0_i32_0 = arith.constant 0 : i32
    %c0_i32_1 = arith.constant 0 : i32
    return %c0_i32, %c0_i32_0 : i32, i32
  }
  func.func @transform_5(%arg0: i32) -> (i32, i32) {
    %c0_i32 = arith.constant 0 : i32
    %c0_i32_0 = arith.constant 0 : i32
    %c0_i32_1 = arith.constant 0 : i32
    return %c0_i32, %c0_i32_0 : i32, i32
  }
  func.func @transform_6(%arg0: i32) -> (i32, i32) {
    %c0_i32 = arith.constant 0 : i32
    %c0_i32_0 = arith.constant 0 : i32
    %c0_i32_1 = arith.constant 0 : i32
    return %c0_i32, %c0_i32_0 : i32, i32
  }
  func.func @transform_7(%arg0: i32) -> (i32, i32) {
    %c0_i32 = arith.constant 0 : i32
    %c0_i32_0 = arith.constant 0 : i32
    %c0_i32_1 = arith.constant 0 : i32
    return %c0_i32, %c0_i32_0 : i32, i32
  }
  func.func @transform_8(%arg0: i32) -> (i32, i32) {
    %c0_i32 = arith.constant 0 : i32
    %c0_i32_0 = arith.constant 0 : i32
    %c0_i32_1 = arith.constant 0 : i32
    return %c0_i32, %c0_i32_0 : i32, i32
  }
  func.func @transform_9(%arg0: i32) -> (i32, i32) {
    %c0_i32 = arith.constant 0 : i32
    %c0_i32_0 = arith.constant 0 : i32
    %c0_i32_1 = arith.constant 0 : i32
    return %c0_i32, %c0_i32_0 : i32, i32
  }
  func.func @transform_10(%arg0: i32) -> (i32, i32) {
    %c0_i32 = arith.constant 0 : i32
    %c0_i32_0 = arith.constant 0 : i32
    %c0_i32_1 = arith.constant 0 : i32
    return %c0_i32, %c0_i32_0 : i32, i32
  }
  func.func @transform_11(%arg0: i32) -> (i32, i32) {
    %c0_i32 = arith.constant 0 : i32
    %c0_i32_0 = arith.constant 0 : i32
    %c0_i32_1 = arith.constant 0 : i32
    return %c0_i32, %c0_i32_0 : i32, i32
  }
  func.func @transform_12(%arg0: i32) -> (i32, i32) {
    %c0_i32 = arith.constant 0 : i32
    %c0_i32_0 = arith.constant 0 : i32
    %c0_i32_1 = arith.constant 0 : i32
    return %c0_i32, %c0_i32_0 : i32, i32
  }
  func.func @transform_13(%arg0: i32) -> (i32, i32) {
    %c0_i32 = arith.constant 0 : i32
    %c0_i32_0 = arith.constant 0 : i32
    return %arg0, %c0_i32 : i32, i32
  }
}

</mosaic_0001>

<bundles_post_ra>
// kernel: tpu_custom_call.1
= control target key start
LH: loop header
LB: loop body
LE: loop exit
PB: predicated region body
PF: predicated region fallthrough
CT: control target
= control target key end

     0   :  { %s7891_s0 = inlined_call_operand.hbm [shape: f32[256,128], index: 0, kind: input, shape index: {}]   ;;  %s7892_s1 = inlined_call_operand.vmem [shape: f32[1,128], index: 1, kind: input, shape index: {}]   ;;  %s7893_s2 = inlined_call_operand.hbm [shape: f32[1,128], index: 2, kind: input, shape index: {}]   ;;  %s7894_s3 = inlined_call_operand.hbm [shape: bf16[128,768], index: 3, kind: input, shape index: {}]   ;;  %s7895_s4 = inlined_call_operand.vmem [shape: f32[1,768], index: 4, kind: input, shape index: {}]   ;;  %s7896_s5 = inlined_call_operand.hbm [shape: bf16[256,128], index: 5, kind: input, shape index: {}]   ;;  %s7897_s6 = inlined_call_operand.vmem [shape: f32[1,128], index: 6, kind: input, shape index: {}]   ;;  %s7898_s7 = inlined_call_operand.vmem [shape: f32[1,128], index: 7, kind: input, shape index: {}]   ;;  %s7899_s8 = inlined_call_operand.vmem [shape: f32[1,128], index: 8, kind: input, shape index: {}]   ;;  %s7900_s9 = inlined_call_operand.hbm [shape: bf16[128,512], index: 9, kind: input, shape index: {}]   ;;  %s7901_s10 = inlined_call_operand.vmem [shape: f32[1,512], index: 10, kind: input, shape index: {}]   ;;  %s7902_s11 = inlined_call_operand.hbm [shape: bf16[512,128], index: 11, kind: input, shape index: {}]   ;;  %s7903_s12 = inlined_call_operand.vmem [shape: f32[1,128], index: 12, kind: input, shape index: {}]   ;;  %s7904_s13 = inlined_call_operand.hbm [shape: f32[256,128], index: 13, kind: output, shape index: {}]  }
   0x1   :  { %7928 = sst [smem:[#allocation30_spill]] %s7893_s2 }
   0x2   :  { %7929 = sst [smem:[#allocation31_spill]] %s7896_s5 }
   0x3   :  { %7930 = sst [smem:[#allocation32_spill]] %s7901_s10 }
   0x4   :  { %7931 = sst [smem:[#allocation33_spill]] %s7903_s12 }
   0x5   :  { %7932 = sst [smem:[#allocation34_spill]] %s7904_s13 }
   0x6   :  { %18 = vsyncpa [#allocation5], 0 }
   0x7   :  { %20 = vsyncpa [#allocation5 + $0x1], 0 }
   0x8   :  { %21 = vsyncpa [#allocation8], 0 }
   0x9   :  { %22 = vsyncpa [#allocation11], 0 }
   0xa   :  { %23 = vsyncpa [#allocation14], 0 }
   0xb   :  { %24 = vsyncpa [#allocation6], 0 }
   0xc   :  { %26 = vsyncpa [#allocation6 + $0x1], 0  ;;  %s6116_s25 = smov 0   ;;  %s6118_s26 = smov 0  }
   0xd   :  { %s6120_s27 = smov 0   ;;  %s6122_s28 = smov 0  }
   0xe LB: > { %s6028_s29 = smov [#allocation7]   ;;  %s6137_s14 = sadd.s32 4294967295, %s6026_s28   ;;  %s6026_s28 = sphi %s6122_s28, %s7996_s28   ;;  %s6022_s27 = sphi %s6120_s27, %s7995_s27   ;;  %s6018_s26 = sphi %s6118_s26, %s7994_s26   ;;  %s6014_s25 = sphi %s6116_s25, %s7993_s25  }
   0xf   : > { %s357_s30 = sshll.u32 %s6028_s29, 4  ;;  %p4623_p0 = scmp.ge.s32.totalorder %s6026_s28, 1  ;;  %s6142_s30 = int_to_ptr.vmem [resolvable:$true] %s357_s30 }
  0x10   : > { %p7908_p1 = scmp.eq.s32.totalorder %s6137_s14, 0  ;;  %p341_p2 = scmp.lt.s32.totalorder %s6026_s28, 3 }
  0x11   : > { %s6029_s16 = smov [#allocation10]   ;;  %s6030_s19 = smov [#allocation9]  }
  0x12   : > { %p6144_p3 = pnand %p4623_p0, %p341_p2  ;;  %s383_s17 = sshll.u32 %s6029_s16, 4  ;;  %s6151_s17 = int_to_ptr.vmem [resolvable:$true] %s383_s17 }
  0x13   : > { %s367_s20 = sshll.u32 %s6030_s19, 4  ;;  %s7935_s2 = sld [smem:[#allocation30_spill]]  ;;  %s6159_s20 = int_to_ptr.vmem [resolvable:$true] %s367_s20 }
  0x14   : > { %s7933_s15 = scalar_select %p6144_p3, 1, 0 }
  0x15   : > { %p5206_p5 = pneg %p6144_p3 }
  0x17   : > { %p6155_p6 = pnand %p5206_p5, %p7908_p1 }
  0x19   : > { %s5778_s23 = scalar_lea.hbm %s7935_s2, 16  ;;  %p6169_p8 = pneg %p6155_p6 }
  0x1a   : > { %p5779_p7 = scmp.ne.s32.totalorder %s7935_s2, %s5778_s23  ;;  %p5785_p11 = scmp.lt.u32.totalorder %s5778_s23, %s7935_s2 }
  0x1c   : > { %p5781_p9 = pnand %p6169_p8, %p5779_p7 }
  0x1e   : > { %p5782_p10 = pneg %p5781_p9 }
  0x20   : > { %p5787_p12 = pnand %p5785_p11, %p5782_p10 }
  0x22   : > { %5790 = shalt.err (!%p5787_p12)
}
  0x23   : > { %s5791_s21 = scalar_lea.vmem %s6142_s30, 16  ;;  %s5798_s22 = scalar_lea.vmem %s6142_s30, 32 }
  0x24   : > { %p5792_p13 = scmp.ne.s32.totalorder %s6142_s30, %s5791_s21  ;;  %p5799_p5 = scmp.lt.s32.totalorder %s6142_s30, %s6142_s30 }
  0x25   : > { %p5800_p7 = scmp.lt.s32.totalorder %s5798_s22, %s5791_s21 }
  0x26   : > { %p5794_p0 = pnand %p5792_p13, %p6169_p8 }
  0x27   : > { %p5801_p9 = por %p5800_p7, %p5799_p5 }
  0x28   : > { %p5795_p2 = pneg %p5794_p0 }
  0x2a   : > { %p5802_p4 = pnand %p5801_p9, %p5795_p2 }
  0x2c   : > { %5805 = shalt.err (!%p5802_p4)
}
  0x2d   : > { %5209 = dma.hbm_to_vmem [thread:$0]  (!%p6155_p6), %s7935_s2, 16, %s6142_s30, [#allocation8]  }
  0x2e   : > { %s7937_s5 = sld [smem:[#allocation31_spill]] }
  0x34   : > { %s5806_s19 = scalar_lea.hbm %s7937_s5, 2048 }
  0x35   : > { %p5807_p10 = scmp.ne.s32.totalorder %s7937_s5, %s5806_s19  ;;  %p5813_p4 = scmp.lt.u32.totalorder %s5806_s19, %s7937_s5 }
  0x37   : > { %p5809_p11 = pnand %p5807_p10, %p6169_p8 }
  0x39   : > { %p5810_p12 = pneg %p5809_p11 }
  0x3b   : > { %p5815_p13 = pnand %p5813_p4, %p5810_p12 }
  0x3d   : > { %5818 = shalt.err (!%p5815_p13)
}
  0x3e   : > { %s5819_s30 = scalar_lea.vmem %s6151_s17, 2048  ;;  %p5827_p7 = scmp.lt.s32.totalorder %s6151_s17, %s6151_s17 }
  0x3f   : > { %p5820_p0 = scmp.ne.s32.totalorder %s6151_s17, %s5819_s30  ;;  %p5828_p9 = scmp.lt.s32.totalorder %s5819_s30, %s5819_s30 }
  0x41   : > { %p5822_p2 = pnand %p5820_p0, %p6169_p8  ;;  %p5829_p10 = por %p5828_p9, %p5827_p7 }
  0x43   : > { %p5823_p5 = pneg %p5822_p2 }
  0x45   : > { %p5830_p11 = pnand %p5829_p10, %p5823_p5 }
  0x47   : > { %5833 = shalt.err (!%p5830_p11)
}
  0x48   : > { %s7906_s10 = smov 64   ;;  %s7907_s12 = smov 4  }
  0x49   : > { %5215 = dma.hbm_to_vmem [thread:$0]  (!%p6155_p6), %s7937_s5, 2048, %s6151_s17, [#allocation11], %s7906_s10, %s7906_s10, %s7907_s12  }
  0x4a   : > { %s5834_s19 = scalar_lea.hbm %s7894_s3, 6144 }
  0x4b   : > { %p5835_p12 = scmp.ne.s32.totalorder %s7894_s3, %s5834_s19  ;;  %p5841_p0 = scmp.lt.u32.totalorder %s5834_s19, %s7894_s3 }
  0x4d   : > { %p5837_p4 = pnand %p5835_p12, %p6169_p8 }
  0x4f   : > { %p5838_p13 = pneg %p5837_p4 }
  0x51   : > { %p5843_p2 = pnand %p5841_p0, %p5838_p13 }
  0x53   : > { %5846 = shalt.err (!%p5843_p2)
}
  0x54   : > { %s5847_s17 = scalar_lea.vmem %s6159_s20, 6144  ;;  %p5855_p10 = scmp.lt.s32.totalorder %s6159_s20, %s6159_s20 }
  0x55   : > { %p5848_p5 = scmp.ne.s32.totalorder %s6159_s20, %s5847_s17  ;;  %p5856_p11 = scmp.lt.s32.totalorder %s5847_s17, %s5847_s17 }
  0x57   : > { %p5850_p7 = pnand %p5848_p5, %p6169_p8  ;;  %p5857_p12 = por %p5856_p11, %p5855_p10 }
  0x59   : > { %p5851_p9 = pneg %p5850_p7 }
  0x5b   : > { %p5858_p4 = pnand %p5857_p12, %p5851_p9 }
  0x5d   : > { %5861 = shalt.err (!%p5858_p4)
}
  0x5e   : > { %s6033_s13 = smov 384   ;;  %s6034_s2 = smov 24  }
  0x5f   : > { %5212 = dma.hbm_to_vmem [thread:$0]  (!%p6155_p6), %s7894_s3, 6144, %s6159_s20, [#allocation8], %s6033_s13, %s6033_s13, %s6034_s2  }
  0x60   : > { %s6035_s29 = smov [#allocation12]   ;;  %s5862_s30 = scalar_lea.hbm %s7900_s9, 4096 }
  0x61   : > { %s405_s19 = sshll.u32 %s6035_s29, 4  ;;  %p5863_p13 = scmp.ne.s32.totalorder %s7900_s9, %s5862_s30  ;;  %s406_s19 = int_to_ptr.vmem [resolvable:$true] %s405_s19 }
  0x62   : > { %p5869_p5 = scmp.lt.u32.totalorder %s5862_s30, %s7900_s9 }
  0x63   : > { %p5865_p0 = pnand %p5863_p13, %p6169_p8 }
  0x65   : > { %p5866_p2 = pneg %p5865_p0 }
  0x67   : > { %p5871_p7 = pnand %p5869_p5, %p5866_p2 }
  0x69   : > { %5874 = shalt.err (!%p5871_p7)
}
  0x6a   : > { %s5875_s20 = scalar_lea.vmem %s406_s19, 4096  ;;  %p5883_p12 = scmp.lt.s32.totalorder %s406_s19, %s406_s19 }
  0x6b   : > { %p5876_p9 = scmp.ne.s32.totalorder %s406_s19, %s5875_s20  ;;  %p5884_p4 = scmp.lt.s32.totalorder %s5875_s20, %s5875_s20 }
  0x6d   : > { %p5878_p10 = pnand %p5876_p9, %p6169_p8  ;;  %p5885_p1 = por %p5884_p4, %p5883_p12 }
  0x6f   : > { %p5879_p11 = pneg %p5878_p10 }
  0x71   : > { %p5886_p3 = pnand %p5885_p1, %p5879_p11 }
  0x73   : > { %5889 = shalt.err (!%p5886_p3)
}
  0x74   : > { %s6036_s10 = smov 256   ;;  %s6037_s13 = smov 16  }
  0x75   : > { %5218 = dma.hbm_to_vmem [thread:$0]  (!%p6155_p6), %s7900_s9, 4096, %s406_s19, [#allocation11], %s6036_s10, %s6036_s10, %s6037_s13  }
  0x76   : > { %s6038_s2 = smov [#allocation13]   ;;  %s5890_s21 = scalar_lea.hbm %s7902_s11, 4096 }
  0x77   : > { %s421_s23 = sshll.u32 %s6038_s2, 4  ;;  %p5891_p1 = scmp.ne.s32.totalorder %s7902_s11, %s5890_s21  ;;  %s422_s23 = int_to_ptr.vmem [resolvable:$true] %s421_s23 }
  0x78   : > { %p5897_p0 = scmp.lt.u32.totalorder %s5890_s21, %s7902_s11 }
  0x79   : > { %p5893_p3 = pnand %p5891_p1, %p6169_p8 }
  0x7b   : > { %p5894_p13 = pneg %p5893_p3 }
  0x7d   : > { %p5899_p2 = pnand %p5897_p0, %p5894_p13 }
  0x7f   : > { %5902 = shalt.err (!%p5899_p2)
}
  0x80   : > { %s5903_s19 = scalar_lea.vmem %s422_s23, 4096  ;;  %p5911_p10 = scmp.lt.s32.totalorder %s422_s23, %s422_s23 }
  0x81   : > { %p5904_p5 = scmp.ne.s32.totalorder %s422_s23, %s5903_s19  ;;  %p5912_p11 = scmp.lt.s32.totalorder %s5903_s19, %s5903_s19 }
  0x83   : > { %p5906_p7 = pnand %p5904_p5, %p6169_p8  ;;  %p5913_p12 = por %p5912_p11, %p5911_p10 }
  0x85   : > { %p5907_p9 = pneg %p5906_p7 }
  0x87   : > { %p5914_p4 = pnand %p5913_p12, %p5907_p9 }
  0x89   : > { %5917 = shalt.err (!%p5914_p4)
}
  0x8a   : > { %s7938_s10 = smov 4   ;;  %s7939_s13 = smov 64  }
  0x8b   : > { %5221 = dma.hbm_to_vmem [thread:$0]  (!%p6155_p6), %s7902_s11, 4096, %s422_s23, [#allocation14], %s7939_s13, %s7939_s13, %s7938_s10  }
  0x8c   : > { %s4622_s18 = sadd.s32 4294967294, %s6026_s28   ;;  %s6281_s16 = sadd.s32 1, %s6026_s28  }
  0x8d   : > { %s39_s2 = sadd.s32 1, %s6022_s27  ;;  %s36_s24 = ssub.s32 %s6026_s28, %s6281_s16 }
  0x8e   : > { %p46_p8 = scmp.ne.s32.totalorder %s6022_s27, %s6018_s26  ;;  %p37_p1 = scmp.eq.s32.totalorder %s36_s24, 0 }
  0x8f   : > { %p47_p3 = scmp.eq.s32.totalorder %s6026_s28, 0  ;;  %p52_p13 = scmp.ne.s32.totalorder %s6018_s26, %s6014_s25 }
  0x90   : > { %p328_p0 = scmp.eq.s32.totalorder %s6137_s14, 1  ;;  %p7940_p5 = scmp.eq.s32.totalorder %s6137_s14, 0 }
  0x91   : > { %s6293_s29 = scalar_select %p37_p1, %s6022_s27, %s39_s2  }
  0x92   : > { %p48_p2 = por %p47_p3, %p46_p8  ;;  %p6297_p7 = por %p7940_p5, %p52_p13 }
  0x93   : > { %p6301_p6 = por %p328_p0, %p46_p8  ;;  %p334_p9 = scmp.eq.s32.totalorder %s4622_s18, 1 }
  0x94   : > { %p5235_p10 = scmp.lt.s32.totalorder %s6026_s28, 2  ;;  %s438_s22 = sand.u32 1, %s6022_s27  }
  0x95   : > { %s7942_s23 = scalar_select %p6301_p6, 1, 0 }
  0x96   : > { %p6307_p11 = por %p334_p9, %p52_p13  ;;  %s4630_s17 = sshll.u32 %s438_s22, 7 }
  0x97   : > { %s4796_s20 = sshll.u32 %s6026_s28, 11  ;;  %s442_s5 = scalar_lea.vmem [#allocation4], %s4630_s17 }
  0x98   : > { %s7943_s30 = scalar_select %p6307_p11, 1, 0 }
  0x99   : > { %s6315_s13 = scalar_lea.hbm %s7891_s0, %s4796_s20  ;;  %s449_s12 = sshll.u32 %s442_s5, 4  ;;  %s6321_s12 = int_to_ptr.vmem [resolvable:$true] %s449_s12 }
  0x9a   : > { %p6317_p12 = pnand %p5235_p10, %p48_p2  ;;  %s6323_s2 = scalar_lea.sflag [#allocation5], %s438_s22 }
  0x9b   : > { %s5918_s24 = scalar_lea.hbm %s6315_s13, 2048  ;;  %s5923_s19 = scalar_lea.hbm %s7891_s0, 4096 }
  0x9c   : > { %p5919_p4 = scmp.ne.s32.totalorder %s6315_s13, %s5918_s24  ;;  %p5920_p8 = pneg %p6317_p12 }
  0x9d   : > { %p5924_p13 = scmp.lt.u32.totalorder %s6315_s13, %s7891_s0  ;;  %p5925_p0 = scmp.lt.u32.totalorder %s5923_s19, %s5918_s24 }
  0x9e   : > { %p5921_p1 = pnand %p5920_p8, %p5919_p4  ;;  %p5927_p5 = scmp.lt.u32.totalorder %s5918_s24, %s6315_s13 }
  0x9f   : > { %p5926_p2 = por %p5925_p0, %p5924_p13 }
  0xa0   : > { %p5922_p3 = pneg %p5921_p1 }
  0xa1   : > { %p5928_p9 = por %p5927_p5, %p5926_p2 }
  0xa3   : > { %p5929_p10 = pnand %p5928_p9, %p5922_p3 }
  0xa5   : > { %5932 = shalt.err (!%p5929_p10)
}
  0xa6   : > { %s5933_s22 = scalar_lea.vmem %s6321_s12, 2048  ;;  %s6039_s17 = smov [#allocation4]  }
  0xa7   : > { %p5934_p4 = scmp.ne.s32.totalorder %s6321_s12, %s5933_s22  ;;  %s5938_s20 = sshll.u32 %s6039_s17, 4  ;;  %s5939_s20 = int_to_ptr.vmem [resolvable:$false] %s5938_s20 }
  0xa8   : > { %s5940_s10 = scalar_lea.vmem %s5939_s20, 4096  ;;  %p5941_p6 = scmp.lt.s32.totalorder %s6321_s12, %s5939_s20 }
  0xa9   : > { %p5936_p1 = pnand %p5934_p4, %p5920_p8  ;;  %p5942_p13 = scmp.lt.s32.totalorder %s5940_s10, %s5933_s22 }
  0xab   : > { %p5937_p11 = pneg %p5936_p1  ;;  %p5943_p0 = por %p5942_p13, %p5941_p6 }
  0xad   : > { %p5944_p2 = pnand %p5943_p0, %p5937_p11 }
  0xaf   : > { %5947 = shalt.err (!%p5944_p2)
}
  0xb0   : > { %s6040_s24 = smov 128   ;;  %s6041_s19 = smov 8  }
  0xb1   : > { %5225 = dma.hbm_to_vmem [thread:$0]  (!%p6317_p12), %s6315_s13, 2048, %s6321_s12, %s6323_s2, %s6040_s24, %s6040_s24, %s6041_s19  }
  0xb2   : > { %p7945_p8 = scmp.ne.s32.totalorder %s7933_s15, 0 }
  0xb4   : > { %461 = sbr.rel (%p7945_p8) target bundleno = 3703 (0xe77), region = 72 }
  0xbb   : > { %s6354_s5 = sand.u32 1, %s6018_s26  }
  0xbc   : > { %s4634_s22 = sshll.u32 %s6354_s5, 7  ;;  %s464_s17 = scalar_lea.sflag [#allocation5], %s6354_s5 }
  0xbd   : > { %s6360_s20 = scalar_lea.vmem [#allocation4], %s4634_s22 }
  0xbe   : > { %5993 = dma.done.wait (%p6297_p7), %s464_s17, 2048  }
  0xbf   : > { %5995 = vsyncadd (%p6297_p7), %s464_s17, 4294965248  ;;  %p7946_p6 = scmp.eq.s32.totalorder %s6137_s14, 0 }
  0xc1   : > { %5997 = dma.done.wait (%p7946_p6), [#allocation8], 6160   ;;  %p7947_p11 = pmov %p7946_p6 }
  0xc2   : > { %p7948_p12 = pmov %p7946_p6 }
  0xc3   : > { %5999 = vsyncadd (%p7947_p11), [#allocation8], 4294961136 }
  0xc4   : > { %6001 = dma.done.wait (%p7948_p12), [#allocation11], 6144   ;;  %p7949_p3 = pmov %p7946_p6 }
  0xc6   : > { %6003 = vsyncadd (%p7949_p3), [#allocation11], 4294961152  ;;  %p7950_p5 = pmov %p7949_p3 }
  0xc7   : > { %p7951_p9 = pmov %p7949_p3 }
  0xc8   : > { %6005 = dma.done.wait (%p7950_p5), [#allocation14], 4096  }
  0xc9   : > { %6007 = vsyncadd (%p7951_p9), [#allocation14], 4294963200  ;;  %v533_v0 = vld [vmem:[%s6360_s20] sm:$0xff]  ;;  %v535_v1 = vld [vmem:[%s6360_s20 + $0x10] sm:$0xff]  ;;  %vm1636_vm0 = vcmask 523264   ;;  %s7972_s21 = sld [smem:[#allocation32_spill]] }
  0xca   : > { %551 = vadd.xlane.f32.xlu0 %v533_v0  ;;  %555 = vadd.xlane.f32.xlu1 %v535_v1  ;;  %v534_v2 = vld [vmem:[%s6360_s20 + $0x8] sm:$0xff]  ;;  %v536_v3 = vld [vmem:[%s6360_s20 + $0x18] sm:$0xff]  ;;  %v537_v4 = vld [vmem:[%s6360_s20 + $0x20] sm:$0xff]  ;;  %s7980_s18 = sld [smem:[#allocation33_spill]]  ;;  %s7793_s2 = scalar_lea.vmem [#allocation15], %s4634_s22 }
  0xcb   : > { %v538_v5 = vld [vmem:[%s6360_s20 + $0x28] sm:$0xff]  ;;  %v539_v6 = vld [vmem:[%s6360_s20 + $0x30] sm:$0xff]  ;;  %v540_v7 = vld [vmem:[%s6360_s20 + $0x38] sm:$0xff]  ;;  %s4797_s22 = sshll.u32 %s6137_s14, 11  ;;  %s4501_s10 = sshll.u32 %s7793_s2, 4  ;;  %s7844_s10 = int_to_ptr.vmem [resolvable:$true] %s4501_s10 }
  0xcc   : > { %v5290_v8 = vld [vmem:[#allocation9 + $0x4] ss:$24 sps:$4 sm:$0xff]   ;;  %v5294_v10 = vld [vmem:[#allocation9] ss:$24 sps:$4 sm:$0xff]   ;;  %v5296_v12 = vld [vmem:[#allocation9 + $0x34] ss:$24 sps:$4 sm:$0xff]  }
  0xcd   : > { %v5292_v9 = vld [vmem:[#allocation9 + $0xc] ss:$24 sps:$4 sm:$0xff]   ;;  %v5295_v11 = vld [vmem:[#allocation9 + $0x8] ss:$24 sps:$4 sm:$0xff]   ;;  %v5298_v13 = vld [vmem:[#allocation9 + $0x3c] ss:$24 sps:$4 sm:$0xff]   ;;  %1100 = vmatprep.subr.bf16.mxu0 %v5290_v8 }
  0xce   : > { %553 = vadd.xlane.f32.xlu0 %v534_v2  ;;  %557 = vadd.xlane.f32.xlu1 %v536_v3  ;;  %v5300_v46 = vld [vmem:[#allocation9 + $0x30] ss:$24 sps:$4 sm:$0xff]   ;;  %v6419_v48 = vld [vmem:[%s6360_s20 + $0x40] sm:$0xff]  ;;  %v6431_v55 = vld [vmem:[%s6360_s20 + $0x58] sm:$0xff]  ;;  %s7988_s17 = sld [smem:[#allocation34_spill]]  ;;  %s4488_s15 = scalar_lea.sflag [#allocation6], %s6354_s5 }
  0xcf   : > { %1213 = vmatprep.subr.bf16.mxu1 %v5292_v9  ;;  %1101 = vmatpush1.bf16.msra.mxu0 %v5294_v10  ;;  %v5301_v47 = vld [vmem:[#allocation9 + $0x38] ss:$24 sps:$4 sm:$0xff]   ;;  %v5302_v49 = vld [vmem:[#allocation9 + $0x64] ss:$24 sps:$4 sm:$0xff]   ;;  %v5307_v54 = vld [vmem:[#allocation9 + $0x68] ss:$24 sps:$4 sm:$0xff]  }
  0xd0   : > { %1214 = vmatpush1.bf16.msra.mxu1 %v5295_v11  ;;  %1102 = vmatprep.subr.bf16.mxu0 %v5296_v12  ;;  %v5304_v50 = vld [vmem:[#allocation9 + $0x6c] ss:$24 sps:$4 sm:$0xff]   ;;  %v5306_v53 = vld [vmem:[#allocation9 + $0x60] ss:$24 sps:$4 sm:$0xff]   ;;  %v5310_v57 = vld [vmem:[#allocation9 + $0x9c] ss:$24 sps:$4 sm:$0xff]  }
  0xd1   : > { %1215 = vmatprep.subr.bf16.mxu1 %v5298_v13  ;;  %v6423_v51 = vld [vmem:[%s6360_s20 + $0x48] sm:$0xff]  ;;  %v6426_v52 = vld [vmem:[%s6360_s20 + $0x50] sm:$0xff]  ;;  %v6434_v58 = vld [vmem:[%s6360_s20 + $0x60] sm:$0xff]  ;;  %s5948_s14 = scalar_lea.vmem %s7844_s10, 2048  ;;  %p7990_p10 = scmp.ne.s32.totalorder %s7942_s23, 0 }
  0xd2   : > { %559 = vadd.xlane.f32.xlu0 %v537_v4  ;;  %561 = vadd.xlane.f32.xlu1 %v538_v5  ;;  %v5308_v56 = vld [vmem:[#allocation9 + $0x94] ss:$24 sps:$4 sm:$0xff]   ;;  %v5312_v59 = vld [vmem:[#allocation9 + $0x90] ss:$24 sps:$4 sm:$0xff]   ;;  %v5314_v62 = vld [vmem:[#allocation9 + $0xc4] ss:$24 sps:$4 sm:$0xff]   ;;  %p5949_p7 = scmp.ne.s32.totalorder %s7844_s10, %s5948_s14 }
  0xd3   : > { %1103 = vmatpush1.bf16.msra.mxu0 %v5300_v46  ;;  %v5313_v60 = vld [vmem:[#allocation9 + $0x98] ss:$24 sps:$4 sm:$0xff]   ;;  %v6439_v61 = vld [vmem:[%s6360_s20 + $0x68] sm:$0xff]  ;;  %v5334_v13 = vld [vmem:[#allocation9 + $0x15c] ss:$24 sps:$4 sm:$0xff]  }
  0xd4   : > { %1216 = vmatpush1.bf16.msra.mxu1 %v5301_v47  ;;  %1104 = vmatprep.subr.bf16.mxu0 %v5302_v49  ;;  %v5316_v63 = vld [vmem:[#allocation9 + $0xcc] ss:$24 sps:$4 sm:$0xff]   ;;  %v5330_v10 = vld [vmem:[#allocation9 + $0x120] ss:$24 sps:$4 sm:$0xff]   ;;  %v6455_v47 = vld [vmem:[%s7892_s1] ss:$0 sm:$0xff]  ;;  %p5950_p4 = pnand %p5949_p7, %p7990_p10 }
  0xd5   : > { %1217 = vmatprep.subr.bf16.mxu1 %v5304_v50  ;;  %v5326_v8 = vld [vmem:[#allocation9 + $0x124] ss:$24 sps:$4 sm:$0xff]   ;;  %v5331_v11 = vld [vmem:[#allocation9 + $0x128] ss:$24 sps:$4 sm:$0xff]   ;;  %v5332_v12 = vld [vmem:[#allocation9 + $0x154] ss:$24 sps:$4 sm:$0xff]  }
  0xd6   : > { %563 = vadd.xlane.f32.xlu0 %v539_v6  ;;  %565 = vadd.xlane.f32.xlu1 %v540_v7  ;;  %v5328_v9 = vld [vmem:[#allocation9 + $0x12c] ss:$24 sps:$4 sm:$0xff]   ;;  %p5951_p1 = pneg %p5950_p4 }
  0xd7   : > { %1105 = vmatpush1.bf16.msra.mxu0 %v5306_v53 }
  0xd8   : > { %1218 = vmatpush1.bf16.msra.mxu1 %v5307_v54  ;;  %1106 = vmatprep.subr.bf16.mxu0 %v5308_v56 }
  0xd9   : > { %1219 = vmatprep.subr.bf16.mxu1 %v5310_v57 }
  0xdb   : > { %1107 = vmatpush1.bf16.msra.mxu0 %v5312_v59 }
  0xdc   : > { %1220 = vmatpush1.bf16.msra.mxu1 %v5313_v60  ;;  %1108 = vmatprep.subr.bf16.mxu0 %v5314_v62 }
  0xdd   : > { %1221 = vmatprep.subr.bf16.mxu1 %v5316_v63 }
 0x157   : > { %v552_v14 = vpop.xlane.xlu0 %551  ;;  %v556_v15 = vpop.xlane.xlu1 %555 }
 0x158   : > { %v584_v16 = vmul.f32 0.0078125, %v552_v14  ;;  %v586_v17 = vmul.f32 0.0078125, %v556_v15  ;;  %v5336_v14 = vld [vmem:[#allocation9 + $0x150] ss:$24 sps:$4 sm:$0xff]  }
 0x159   : > { %v5337_v15 = vld [vmem:[#allocation9 + $0x158] ss:$24 sps:$4 sm:$0xff]  }
 0x15a   : > { %v6386_v18 = vsub.f32 %v533_v0, %v584_v16  ;;  %v6388_v19 = vsub.f32 %v535_v1, %v586_v17  ;;  %v6442_v0 = vld [vmem:[%s6360_s20 + $0x70] sm:$0xff]  ;;  %v5318_v1 = vld [vmem:[#allocation9 + $0xc0] ss:$24 sps:$4 sm:$0xff]   ;;  %v7915_v16 = vmov 0  }
 0x15b   : > { %v554_v20 = vpop.xlane.xlu0 %553  ;;  %v558_v21 = vpop.xlane.xlu1 %557  ;;  %1109 = vmatpush1.bf16.msra.mxu0 %v5318_v1  ;;  %1132 = vmatprep.mubr.bf16.mxu0 %v7915_v16  ;;  %v6462_v1 = vld [vmem:[#allocation7] ss:$0 sm:$0xff] }
 0x15c   : > { %v585_v22 = vmul.f32 0.0078125, %v554_v20  ;;  %v616_v23 = vmul.f32 %v6386_v18, %v6386_v18  ;;  %v587_v24 = vmul.f32 0.0078125, %v558_v21  ;;  %v618_v25 = vmul.f32 %v6388_v19, %v6388_v19  ;;  %1245 = vmatprep.mubr.bf16.mxu1 %v7915_v16 }
 0x15e   : > { %632 = vadd.xlane.f32.xlu0 %v616_v23  ;;  %v6394_v26 = vsub.f32 %v534_v2, %v585_v22  ;;  %v6396_v27 = vsub.f32 %v536_v3, %v587_v24  ;;  %v5319_v2 = vld [vmem:[#allocation9 + $0xc8] ss:$24 sps:$4 sm:$0xff]   ;;  %v5320_v3 = vld [vmem:[#allocation9 + $0xf4] ss:$24 sps:$4 sm:$0xff]  }
 0x15f   : > { %v560_v28 = vpop.xlane.xlu0 %559  ;;  %v562_v29 = vpop.xlane.xlu1 %561  ;;  %1222 = vmatpush1.bf16.msra.mxu1 %v5319_v2  ;;  %1110 = vmatprep.subr.bf16.mxu0 %v5320_v3 }
 0x160   : > { %v588_v30 = vmul.f32 0.0078125, %v560_v28  ;;  %v617_v31 = vmul.f32 %v6394_v26, %v6394_v26  ;;  %v589_v32 = vmul.f32 0.0078125, %v562_v29  ;;  %v619_v33 = vmul.f32 %v6396_v27, %v6396_v27 }
 0x162   : > { %636 = vadd.xlane.f32.xlu0 %v618_v25  ;;  %634 = vadd.xlane.f32.xlu1 %v617_v31  ;;  %v6402_v34 = vsub.f32 %v537_v4, %v588_v30  ;;  %v6404_v35 = vsub.f32 %v538_v5, %v589_v32  ;;  %v5322_v4 = vld [vmem:[#allocation9 + $0xfc] ss:$24 sps:$4 sm:$0xff]  }
 0x163   : > { %v564_v36 = vpop.xlane.xlu0 %563  ;;  %v566_v37 = vpop.xlane.xlu1 %565  ;;  %v6447_v5 = vld [vmem:[%s6360_s20 + $0x78] sm:$0xff]  ;;  %1223 = vmatprep.subr.bf16.mxu1 %v5322_v4 }
 0x164   : > { %v590_v38 = vmul.f32 0.0078125, %v564_v36  ;;  %v620_v39 = vmul.f32 %v6402_v34, %v6402_v34  ;;  %v591_v40 = vmul.f32 0.0078125, %v566_v37  ;;  %v621_v41 = vmul.f32 %v6404_v35, %v6404_v35 }
 0x166   : > { %638 = vadd.xlane.f32.xlu1 %v619_v33  ;;  %640 = vadd.xlane.f32.xlu0 %v620_v39  ;;  %v6410_v42 = vsub.f32 %v539_v6, %v590_v38  ;;  %v6412_v43 = vsub.f32 %v540_v7, %v591_v40  ;;  %v5324_v6 = vld [vmem:[#allocation9 + $0xf0] ss:$24 sps:$4 sm:$0xff]  }
 0x167   : > { %v5325_v7 = vld [vmem:[#allocation9 + $0xf8] ss:$24 sps:$4 sm:$0xff]   ;;  %1111 = vmatpush1.bf16.msra.mxu0 %v5324_v6 }
 0x168   : > { %v622_v44 = vmul.f32 %v6410_v42, %v6410_v42  ;;  %v623_v45 = vmul.f32 %v6412_v43, %v6412_v43  ;;  %1224 = vmatpush1.bf16.msra.mxu1 %v5325_v7  ;;  %1112 = vmatprep.subr.bf16.mxu0 %v5326_v8 }
 0x169   : > { %1225 = vmatprep.subr.bf16.mxu1 %v5328_v9 }
 0x16a   : > { %642 = vadd.xlane.f32.xlu1 %v621_v41  ;;  %644 = vadd.xlane.f32.xlu0 %v622_v44 }
 0x16b   : > { %1113 = vmatpush1.bf16.msra.mxu0 %v5330_v10 }
 0x16c   : > { %1226 = vmatpush1.bf16.msra.mxu1 %v5331_v11  ;;  %1114 = vmatprep.subr.bf16.mxu0 %v5332_v12 }
 0x16d   : > { %1227 = vmatprep.subr.bf16.mxu1 %v5334_v13 }
 0x16e   : > { %646 = vadd.xlane.f32.xlu1 %v623_v45  ;;  %567 = vadd.xlane.f32.xlu0 %v6419_v48 }
 0x16f   : > { %1115 = vmatpush1.bf16.msra.mxu0 %v5336_v14 }
 0x170   : > { %1228 = vmatpush1.bf16.msra.mxu1 %v5337_v15 }
 0x172   : > { %569 = vadd.xlane.f32.xlu1 %v6423_v51  ;;  %571 = vadd.xlane.f32.xlu0 %v6426_v52 }
 0x176   : > { %573 = vadd.xlane.f32.xlu1 %v6431_v55  ;;  %575 = vadd.xlane.f32.xlu0 %v6434_v58 }
 0x17a   : > { %577 = vadd.xlane.f32.xlu1 %v6439_v61  ;;  %579 = vadd.xlane.f32.xlu0 %v6442_v0 }
 0x17e   : > { %581 = vadd.xlane.f32.xlu1 %v6447_v5 }
 0x1eb   : > { %v633_v17 = vpop.xlane.xlu0 %632 }
 0x1ec   : > { %v664_v20 = vmul.f32 0.0078125, %v633_v17 }
 0x1ee   : > { %v680_v21 = vadd.f32 1e-05, %v664_v20 }
 0x1ef   : > { %v635_v22 = vpop.xlane.xlu1 %634  ;;  %v637_v23 = vpop.xlane.xlu0 %636 }
 0x1f0   : > { %5458 = vrsqrt.f32 %v680_v21  ;;  %v665_v24 = vmul.f32 0.0078125, %v635_v22  ;;  %v666_v25 = vmul.f32 0.0078125, %v637_v23 }
 0x1f2   : > { %v681_v28 = vadd.f32 1e-05, %v665_v24  ;;  %v682_v29 = vadd.f32 1e-05, %v666_v25 }
 0x1f3   : > { %v639_v30 = vpop.xlane.xlu1 %638  ;;  %v641_v31 = vpop.xlane.xlu0 %640 }
 0x1f4   : > { %5460 = vrsqrt.f32 %v681_v28  ;;  %v667_v32 = vmul.f32 0.0078125, %v639_v30  ;;  %v668_v36 = vmul.f32 0.0078125, %v641_v31 }
 0x1f5   : > { %5462 = vrsqrt.f32 %v682_v29 }
 0x1f6   : > { %v683_v33 = vadd.f32 1e-05, %v667_v32  ;;  %v684_v41 = vadd.f32 1e-05, %v668_v36 }
 0x1f7   : > { %v643_v37 = vpop.xlane.xlu1 %642  ;;  %v645_v38 = vpop.xlane.xlu0 %644 }
 0x1f8   : > { %5464 = vrsqrt.f32 %v683_v33  ;;  %v669_v39 = vmul.f32 0.0078125, %v643_v37  ;;  %v670_v56 = vmul.f32 0.0078125, %v645_v38 }
 0x1fa   : > { %v5459_v40 = vpop.eup %5458  ;;  %v685_v44 = vadd.f32 1e-05, %v669_v39 }
 0x1fb   : > { %v647_v45 = vpop.xlane.xlu1 %646  ;;  %v568_v46 = vpop.xlane.xlu0 %567  ;;  %v712_v49 = vmul.f32 %v5459_v40, %v6386_v18 }
 0x1fc   : > { %5466 = vrsqrt.f32 %v685_v44  ;;  %v671_v50 = vmul.f32 0.0078125, %v647_v45  ;;  %v592_v53 = vmul.f32 0.0078125, %v568_v46 }
 0x1fd   : > { %5468 = vrsqrt.f32 %v684_v41  ;;  %v734_v59 = vmul.f32 %v6455_v47, %v712_v49 }
 0x1fe   : > { %v5461_v54 = vpop.eup %5460  ;;  %v6459_v57 = vsub.f32 %v6419_v48, %v592_v53  ;;  %v687_v60 = vadd.f32 1e-05, %v671_v50  ;;  %v686_v48 = vadd.f32 1e-05, %v670_v56 }
 0x1ff   : > { %v570_v62 = vpop.xlane.xlu1 %569  ;;  %v572_v63 = vpop.xlane.xlu0 %571  ;;  %v713_v2 = vmul.f32 %v5461_v54, %v6394_v26  ;;  %v756_v11 = vadd.f32 %v6462_v1, %v734_v59 }
 0x200   : > { %v5463_v3 = vpop.eup %5462  ;;  %v593_v18 = vmul.f32 0.0078125, %v570_v62  ;;  %v594_v4 = vmul.f32 0.0078125, %v572_v63  ;;  %v624_v6 = vmul.f32 %v6459_v57, %v6459_v57  ;;  %5470 = vrsqrt.f32 %v687_v60 }
 0x201   : > { %v735_v7 = vmul.f32 %v6455_v47, %v713_v2  ;;  %v714_v14 = vmul.f32 %v5463_v3, %v6388_v19  ;;  %5472 = vrsqrt.f32 %v686_v48  ;;  %v5340_v3 = vld [vmem:[#allocation9 + $0x14] ss:$24 sps:$4 sm:$0xff]   ;;  %v5347_v48 = vld [vmem:[#allocation9 + $0xa0] ss:$24 sps:$4 sm:$0xff]  }
 0x202   : > { %v5465_v8 = vpop.eup %5464  ;;  %648 = vadd.xlane.f32.xlu0 %v624_v6  ;;  %v6469_v9 = vsub.f32 %v6423_v51, %v593_v18  ;;  %v6472_v10 = vsub.f32 %v6426_v52, %v594_v4  ;;  %v5343_v18 = vld [vmem:[#allocation9 + $0x44] ss:$24 sps:$4 sm:$0xff]   ;;  %1326 = vmatprep.subr.bf16.mxu0 %v5340_v3  ;;  %v5341_v4 = vld [vmem:[#allocation9 + $0x40] ss:$24 sps:$4 sm:$0xff]   ;;  %v5344_v6 = vld [vmem:[#allocation9 + $0x70] ss:$24 sps:$4 sm:$0xff]  }
 0x203   : > { %v574_v26 = vpop.xlane.xlu1 %573  ;;  %v576_v12 = vpop.xlane.xlu0 %575  ;;  %v757_v13 = vadd.f32 %v6462_v1, %v735_v7  ;;  %v715_v15 = vmul.f32 %v5465_v8, %v6396_v27  ;;  %v736_v28 = vmul.f32 %v6455_v47, %v714_v14  ;;  %v5346_v7 = vld [vmem:[#allocation9 + $0x74] ss:$24 sps:$4 sm:$0xff]   ;;  %v5349_v8 = vld [vmem:[#allocation9 + $0xa4] ss:$24 sps:$4 sm:$0xff]   ;;  %v5356_v14 = vld [vmem:[#allocation9 + $0x130] ss:$24 sps:$4 sm:$0xff]  }
 0x204   : > { %v595_v17 = vmul.f32 0.0078125, %v574_v26  ;;  %v596_v20 = vmul.f32 0.0078125, %v576_v12  ;;  %v625_v51 = vmul.f32 %v6469_v9, %v6469_v9  ;;  %v626_v52 = vmul.f32 %v6472_v10, %v6472_v10  ;;  %v5352_v26 = vld [vmem:[#allocation9 + $0xd4] ss:$24 sps:$4 sm:$0xff]   ;;  %v5355_v12 = vld [vmem:[#allocation9 + $0x104] ss:$24 sps:$4 sm:$0xff]  }
 0x205   : > { %v6482_v21 = vpack.c.bf16 %v757_v13, %v756_v11  ;;  %v737_v22 = vmul.f32 %v6455_v47, %v715_v15  ;;  %v758_v39 = vadd.f32 %v6462_v1, %v736_v28  ;;  %v5350_v11 = vld [vmem:[#allocation9 + $0xd0] ss:$24 sps:$4 sm:$0xff]   ;;  %v5353_v13 = vld [vmem:[#allocation9 + $0x100] ss:$24 sps:$4 sm:$0xff]   ;;  %v5358_v15 = vld [vmem:[#allocation9 + $0x134] ss:$24 sps:$4 sm:$0xff]  }
 0x206   : > { %v5467_v23 = vpop.eup %5466  ;;  %650 = vadd.xlane.f32.xlu1 %v625_v51  ;;  %652 = vadd.xlane.f32.xlu0 %v626_v52  ;;  %v6486_v19 = vsub.f32 %v6431_v55, %v595_v17  ;;  %v6489_v27 = vsub.f32 %v6434_v58, %v596_v20  ;;  %v5361_v17 = vld [vmem:[#allocation9 + $0x164] ss:$24 sps:$4 sm:$0xff]   ;;  %v5359_v20 = vld [vmem:[#allocation9 + $0x160] ss:$24 sps:$4 sm:$0xff]  }
 0x207   : > { %v578_v24 = vpop.xlane.xlu1 %577  ;;  %1133 = vmatmul.mubr.bf16.vlgmr.msra.gmra.mrb[0].mxu0 %v6482_v21  ;;  %1246 = vmatmul.mubr.bf16.vlgmr.msra.gmra.mrb[0].mxu1 %v6482_v21  ;;  %v580_v25 = vpop.xlane.xlu0 %579  ;;  %v759_v58 = vadd.f32 %v6462_v1, %v737_v22  ;;  %v717_v33 = vmul.f32 %v5467_v23, %v6404_v35 }
 0x208   : > { %v5469_v29 = vpop.eup %5468  ;;  %v597_v30 = vmul.f32 0.0078125, %v578_v24  ;;  %v598_v31 = vmul.f32 0.0078125, %v580_v25  ;;  %v627_v32 = vmul.f32 %v6486_v19, %v6486_v19  ;;  %v628_v55 = vmul.f32 %v6489_v27, %v6489_v27  ;;  %1142 = vmatprep.mubr.bf16.mxu0 %v7915_v16  ;;  %1255 = vmatprep.mubr.bf16.mxu1 %v7915_v16 }
 0x209   : > { %v716_v40 = vmul.f32 %v5469_v29, %v6402_v34  ;;  %v6514_v46 = vpack.c.bf16 %v759_v58, %v758_v39 }
 0x20a   : > { %654 = vadd.xlane.f32.xlu1 %v627_v32  ;;  %656 = vadd.xlane.f32.xlu0 %v628_v55  ;;  %v6503_v36 = vsub.f32 %v6439_v61, %v597_v30  ;;  %v6506_v37 = vsub.f32 %v6442_v0, %v598_v31  ;;  %v5471_v45 = vpop.eup %5470  ;;  %v739_v61 = vmul.f32 %v6455_v47, %v717_v33 }
 0x20b   : > { %v582_v38 = vpop.xlane.xlu1 %581  ;;  %v738_v34 = vmul.f32 %v6455_v47, %v716_v40  ;;  %v5473_v49 = vpop.eup %5472  ;;  %v719_v54 = vmul.f32 %v5471_v45, %v6412_v43 }
 0x20c   : > { %v599_v41 = vmul.f32 0.0078125, %v582_v38  ;;  %v629_v44 = vmul.f32 %v6503_v36, %v6503_v36  ;;  %v630_v35 = vmul.f32 %v6506_v37, %v6506_v37  ;;  %v761_v53 = vadd.f32 %v6462_v1, %v739_v61 }
 0x20d   : > { %v718_v56 = vmul.f32 %v5473_v49, %v6410_v42  ;;  %v741_v60 = vmul.f32 %v6455_v47, %v719_v54  ;;  %v5338_v42 = vld [vmem:[#allocation9 + $0x10] ss:$24 sps:$4 sm:$0xff]  }
 0x20e   : > { %658 = vadd.xlane.f32.xlu1 %v629_v44  ;;  %660 = vadd.xlane.f32.xlu0 %v630_v35  ;;  %v6518_v0 = vsub.f32 %v6447_v5, %v599_v41  ;;  %v760_v5 = vadd.f32 %v6462_v1, %v738_v34 }
 0x20f   : > { %1143 = vmatmul.mubr.bf16.gmra.mrb[4].mxu0 %v6514_v46  ;;  %1256 = vmatmul.mubr.bf16.gmra.mrb[4].mxu1 %v6514_v46  ;;  %v740_v62 = vmul.f32 %v6455_v47, %v718_v56  ;;  %v763_v43 = vadd.f32 %v6462_v1, %v741_v60 }
 0x210   : > { %v631_v50 = vmul.f32 %v6518_v0, %v6518_v0  ;;  %1152 = vmatprep.mubr.bf16.mxu0 %v7915_v16  ;;  %1265 = vmatprep.mubr.bf16.mxu1 %v7915_v16  ;;  %v6531_v59 = vpack.c.bf16 %v761_v53, %v760_v5 }
 0x211   : > { %v762_v63 = vadd.f32 %v6462_v1, %v740_v62  ;;  %1327 = vmatpush1.bf16.msra.mxu0 %v5338_v42 }
 0x212   : > { %662 = vadd.xlane.f32.xlu1 %v631_v50  ;;  %1328 = vmatprep.subr.bf16.mxu0 %v5343_v18 }
 0x213   : > { %v6541_v2 = vpack.c.bf16 %v763_v43, %v762_v63 }
 0x215   : > { %1329 = vmatpush1.bf16.msra.mxu0 %v5341_v4 }
 0x216   : > { %1330 = vmatprep.subr.bf16.mxu0 %v5346_v7 }
 0x217   : > { %1153 = vmatmul.mubr.bf16.gmra.mrb[8].mxu0 %v6531_v59  ;;  %1266 = vmatmul.mubr.bf16.gmra.mrb[8].mxu1 %v6531_v59 }
 0x218   : > { %1162 = vmatprep.mubr.bf16.mxu0 %v7915_v16  ;;  %1275 = vmatprep.mubr.bf16.mxu1 %v7915_v16 }
 0x219   : > { %1331 = vmatpush1.bf16.msra.mxu0 %v5344_v6 }
 0x21a   : > { %1332 = vmatprep.subr.bf16.mxu0 %v5349_v8 }
 0x21d   : > { %1333 = vmatpush1.bf16.msra.mxu0 %v5347_v48 }
 0x21e   : > { %1334 = vmatprep.subr.bf16.mxu0 %v5352_v26 }
 0x21f   : > { %1163 = vmatmul.mubr.bf16.gmra.mrb[12].mxu0 %v6541_v2  ;;  %1276 = vmatmul.mubr.bf16.gmra.mrb[12].mxu1 %v6541_v2 }
 0x220   : > { %1172 = vmatprep.mubr.bf16.mxu0 %v7915_v16  ;;  %1285 = vmatprep.mubr.bf16.mxu1 %v7915_v16 }
 0x221   : > { %1335 = vmatpush1.bf16.msra.mxu0 %v5350_v11 }
 0x222   : > { %1336 = vmatprep.subr.bf16.mxu0 %v5355_v12 }
 0x225   : > { %1337 = vmatpush1.bf16.msra.mxu0 %v5353_v13 }
 0x226   : > { %1338 = vmatprep.subr.bf16.mxu0 %v5358_v15 }
 0x229   : > { %1339 = vmatpush1.bf16.msra.mxu0 %v5356_v14 }
 0x22a   : > { %1340 = vmatprep.subr.bf16.mxu0 %v5361_v17 }
 0x22d   : > { %1341 = vmatpush1.bf16.msra.mxu0 %v5359_v20 }
 0x28f   : > { %v649_v51 = vpop.xlane.xlu0 %648 }
 0x290   : > { %v672_v52 = vmul.f32 0.0078125, %v649_v51 }
 0x292   : > { %v688_v22 = vadd.f32 1e-05, %v672_v52 }
 0x293   : > { %v651_v23 = vpop.xlane.xlu1 %650  ;;  %v653_v24 = vpop.xlane.xlu0 %652 }
 0x294   : > { %5474 = vrsqrt.f32 %v688_v22  ;;  %v673_v25 = vmul.f32 0.0078125, %v651_v23  ;;  %v674_v28 = vmul.f32 0.0078125, %v653_v24 }
 0x296   : > { %v689_v29 = vadd.f32 1e-05, %v673_v25  ;;  %v690_v30 = vadd.f32 1e-05, %v674_v28  ;;  %v6605_v25 = vld [vmem:[%s7895_s4] sm:$0x3f] }
 0x297   : > { %v655_v31 = vpop.xlane.xlu1 %654  ;;  %v657_v32 = vpop.xlane.xlu0 %656 }
 0x298   : > { %5476 = vrsqrt.f32 %v689_v29  ;;  %v675_v55 = vmul.f32 0.0078125, %v655_v31  ;;  %v676_v33 = vmul.f32 0.0078125, %v657_v32 }
 0x299   : > { %5478 = vrsqrt.f32 %v690_v30 }
 0x29a   : > { %v691_v58 = vadd.f32 1e-05, %v675_v55  ;;  %v692_v41 = vadd.f32 1e-05, %v676_v33 }
 0x29b   : > { %v659_v38 = vpop.xlane.xlu1 %658  ;;  %v661_v35 = vpop.xlane.xlu0 %660 }
 0x29c   : > { %5480 = vrsqrt.f32 %v691_v58  ;;  %v677_v39 = vmul.f32 0.0078125, %v659_v38  ;;  %v678_v50 = vmul.f32 0.0078125, %v661_v35 }
 0x29e   : > { %v5475_v40 = vpop.eup %5474  ;;  %v693_v44 = vadd.f32 1e-05, %v677_v39  ;;  %v694_v43 = vadd.f32 1e-05, %v678_v50 }
 0x29f   : > { %v663_v45 = vpop.xlane.xlu1 %662  ;;  %v720_v61 = vmul.f32 %v5475_v40, %v6459_v57 }
 0x2a0   : > { %5482 = vrsqrt.f32 %v693_v44  ;;  %v679_v34 = vmul.f32 0.0078125, %v663_v45 }
 0x2a1   : > { %5484 = vrsqrt.f32 %v692_v41  ;;  %v742_v54 = vmul.f32 %v6455_v47, %v720_v61 }
 0x2a2   : > { %v5477_v49 = vpop.eup %5476  ;;  %v695_v56 = vadd.f32 1e-05, %v679_v34 }
 0x2a3   : > { %v721_v53 = vmul.f32 %v5477_v49, %v6469_v9  ;;  %v5479_v5 = vpop.eup %5478  ;;  %v764_v63 = vadd.f32 %v6462_v1, %v742_v54 }
 0x2a4   : > { %v722_v57 = vmul.f32 %v5479_v5, %v6472_v10  ;;  %5486 = vrsqrt.f32 %v695_v56 }
 0x2a5   : > { %v743_v60 = vmul.f32 %v6455_v47, %v721_v53  ;;  %5488 = vrsqrt.f32 %v694_v43 }
 0x2a6   : > { %v5481_v62 = vpop.eup %5480  ;;  %v744_v6 = vmul.f32 %v6455_v47, %v722_v57 }
 0x2a7   : > { %v765_v42 = vadd.f32 %v6462_v1, %v743_v60  ;;  %v723_v3 = vmul.f32 %v5481_v62, %v6486_v19 }
 0x2a8   : > { %v766_v8 = vadd.f32 %v6462_v1, %v744_v6 }
 0x2a9   : > { %v6555_v18 = vpack.c.bf16 %v765_v42, %v764_v63  ;;  %v745_v9 = vmul.f32 %v6455_v47, %v723_v3 }
 0x2aa   : > { %v5483_v4 = vpop.eup %5482 }
 0x2ab   : > { %1173 = vmatmul.mubr.bf16.gmra.mrb[16].mxu0 %v6555_v18  ;;  %1286 = vmatmul.mubr.bf16.gmra.mrb[16].mxu1 %v6555_v18  ;;  %v5485_v7 = vpop.eup %5484  ;;  %v767_v10 = vadd.f32 %v6462_v1, %v745_v9  ;;  %v725_v19 = vmul.f32 %v5483_v4, %v6503_v36 }
 0x2ac   : > { %1182 = vmatprep.mubr.bf16.mxu0 %v7915_v16  ;;  %1295 = vmatprep.mubr.bf16.mxu1 %v7915_v16  ;;  %v724_v48 = vmul.f32 %v5485_v7, %v6489_v27 }
 0x2ad   : > { %v6567_v11 = vpack.c.bf16 %v767_v10, %v766_v8  ;;  %v747_v26 = vmul.f32 %v6455_v47, %v725_v19 }
 0x2ae   : > { %v5487_v12 = vpop.eup %5486  ;;  %v746_v13 = vmul.f32 %v6455_v47, %v724_v48 }
 0x2af   : > { %v5489_v14 = vpop.eup %5488  ;;  %v769_v36 = vadd.f32 %v6462_v1, %v747_v26  ;;  %v727_v27 = vmul.f32 %v5487_v12, %v6518_v0 }
 0x2b0   : > { %v768_v15 = vadd.f32 %v6462_v1, %v746_v13  ;;  %v726_v17 = vmul.f32 %v5489_v14, %v6506_v37 }
 0x2b1   : > { %v749_v51 = vmul.f32 %v6455_v47, %v727_v27 }
 0x2b2   : > { %v6579_v20 = vpack.c.bf16 %v769_v36, %v768_v15  ;;  %v748_v52 = vmul.f32 %v6455_v47, %v726_v17  ;;  %v830_v47 = vlaneseq }
 0x2b3   : > { %1183 = vmatmul.mubr.bf16.gmra.mrb[20].mxu0 %v6567_v11  ;;  %1296 = vmatmul.mubr.bf16.gmra.mrb[20].mxu1 %v6567_v11  ;;  %v771_v0 = vadd.f32 %v6462_v1, %v749_v51 }
 0x2b4   : > { %1192 = vmatprep.mubr.bf16.mxu0 %v7915_v16  ;;  %1305 = vmatprep.mubr.bf16.mxu1 %v7915_v16  ;;  %v770_v22 = vadd.f32 %v6462_v1, %v748_v52  ;;  %v6596_v37 = vshrl.u32 %v830_v47, 7 }
 0x2b6   : > { %v6589_v23 = vpack.c.bf16 %v771_v0, %v770_v22  ;;  %7952 = vst [vmem:[#allocation21_spill] sm:$0xff] %v6596_v37  ;;  %v7914_v1 = vsub.s32 0, %v6596_v37  ;;  %v7913_v24 = vsub.s32 2, %v6596_v37  ;;  %v7911_v28 = vsub.s32 3, %v6596_v37 }
 0x2b8   : > { %v6612_v29 = vrot.slane %v6605_v25, %v7914_v1  ;;  %v6627_v55 = vrot.slane %v6605_v25, %v7911_v28 }
 0x2bb   : > { %1193 = vmatmul.mubr.bf16.gmra.mrb[24].mxu0 %v6579_v20  ;;  %1306 = vmatmul.mubr.bf16.gmra.mrb[24].mxu1 %v6579_v20 }
 0x2bc   : > { %1202 = vmatprep.mubr.bf16.mxu0 %v7915_v16  ;;  %1315 = vmatprep.mubr.bf16.mxu1 %v7915_v16 }
 0x2c3   : > { %1203 = vmatmul.mubr.bf16.gmra.mrb[28].mxu0 %v6589_v23  ;;  %1316 = vmatmul.mubr.bf16.gmra.mrb[28].mxu1 %v6589_v23 }
 0x2c4   : > { %1358 = vmatprep.mubr.bf16.mxu0 %v7915_v16 }
 0x2cb   : > { %1359 = vmatmul.mubr.bf16.vlgmr.msra.gmra.mrb[32].mxu0 %v6482_v21  ;;  %v7912_v21 = vsub.s32 1, %v6596_v37 }
 0x2cc   : > { %1368 = vmatprep.mubr.bf16.mxu0 %v7915_v16 }
 0x2cd   : > { %v6622_v32 = vrot.slane %v6605_v25, %v7912_v21 }
 0x2d3   : > { %1369 = vmatmul.mubr.bf16.gmra.mrb[36].mxu0 %v6514_v46  ;;  %v6617_v46 = vrot.slane %v6605_v25, %v7913_v24 }
 0x2d4   : > { %1378 = vmatprep.mubr.bf16.mxu0 %v7915_v16 }
 0x2da   : > { %v1134_v30 = vpop.f32.mrb[0].mxu0  ;;  %v1247_v31 = vpop.f32.mrb[0].mxu1 }
 0x2db   : > { %v1136_v58 = vpop.f32.mrb[1].mxu0  ;;  %v1249_v33 = vpop.f32.mrb[1].mxu1  ;;  %1379 = vmatmul.mubr.bf16.gmra.mrb[40].mxu0 %v6531_v59  ;;  %v1135_v40 = vadd.f32 %v1134_v30, %v6612_v29  ;;  %v1248_v41 = vadd.f32 %v1247_v31, %v6617_v46 }
 0x2dc   : > { %v1138_v38 = vpop.f32.mrb[2].mxu0  ;;  %v1251_v39 = vpop.f32.mrb[2].mxu1  ;;  %1388 = vmatprep.mubr.bf16.mxu0 %v7915_v16  ;;  %v6636_v34 = vadd.f32 %v1136_v58, %v6622_v32  ;;  %v1250_v49 = vadd.f32 %v1249_v33, %v6627_v55 }
 0x2dd   : > { %v1139_v44 = vadd.f32 %v1138_v38, %v6612_v29  ;;  %v1252_v35 = vadd.f32 %v1251_v39, %v6617_v46  ;;  %v1140_v45 = vpop.f32.mrb[3].mxu0  ;;  %v1253_v61 = vpop.f32.mrb[3].mxu1 }
 0x2de   : > { %v6640_v59 = vadd.f32 %v1140_v45, %v6622_v32  ;;  %v1254_v50 = vadd.f32 %v1253_v61, %v6627_v55 }
 0x2df   : > { %v1543_v53 = vpack.c.bf16 %v1139_v44, %v1135_v40  ;;  %v1555_v54 = vpack.c.bf16 %v1252_v35, %v1248_v41 }
 0x2e0   : > { %v1822_v5 = vpack.c.bf16 %v6640_v59, %v6636_v34  ;;  %v1834_v56 = vpack.c.bf16 %v1254_v50, %v1250_v49 }
 0x2e1   : > { %5054 = vmatprep.subr.bf16.mxu1 %v1555_v54  ;;  %5062 = vmatprep.mubr.bf16.mxu1 %v1543_v53 }
 0x2e2   : > { %v1144_v60 = vpop.f32.mrb[4].mxu0  ;;  %v1257_v62 = vpop.f32.mrb[4].mxu1  ;;  %5055 = vmatpush3.bf16.xpose.msra.mxu1 %v1555_v54  ;;  %5086 = vmatprep.subr.bf16.mxu0 %v1834_v56 }
 0x2e3   : > { %v1146_v43 = vpop.f32.mrb[5].mxu0  ;;  %v1259_v63 = vpop.f32.mrb[5].mxu1  ;;  %1389 = vmatmul.mubr.bf16.gmra.mrb[44].mxu0 %v6541_v2  ;;  %v6648_v3 = vadd.f32 %v1144_v60, %v6612_v29  ;;  %v1258_v9 = vadd.f32 %v1257_v62, %v6617_v46 }
 0x2e4   : > { %5087 = vmatpush3.bf16.xpose.msra.mxu0 %v1834_v56  ;;  %v1148_v42 = vpop.f32.mrb[6].mxu0  ;;  %v1261_v57 = vpop.f32.mrb[6].mxu1  ;;  %1398 = vmatprep.mubr.bf16.mxu0 %v7915_v16  ;;  %v6656_v19 = vadd.f32 %v1146_v43, %v6622_v32  ;;  %v1260_v2 = vadd.f32 %v1259_v63, %v6627_v55 }
 0x2e5   : > { %v6652_v4 = vadd.f32 %v1148_v42, %v6612_v29  ;;  %v1262_v6 = vadd.f32 %v1261_v57, %v6617_v46  ;;  %v1150_v7 = vpop.f32.mrb[7].mxu0  ;;  %v1263_v10 = vpop.f32.mrb[7].mxu1 }
 0x2e6   : > { %v6660_v8 = vadd.f32 %v1150_v7, %v6622_v32  ;;  %v1264_v48 = vadd.f32 %v1263_v10, %v6627_v55 }
 0x2e7   : > { %v1544_v26 = vpack.c.bf16 %v6652_v4, %v6648_v3  ;;  %v1556_v12 = vpack.c.bf16 %v1262_v6, %v1258_v9 }
 0x2e8   : > { %v1823_v13 = vpack.c.bf16 %v6660_v8, %v6656_v19  ;;  %v1835_v14 = vpack.c.bf16 %v1264_v48, %v1260_v2 }
 0x2e9   : > { %5056 = vmatprep.subr.bf16.mxu1 %v1556_v12 }
 0x2ea   : > { %v1154_v36 = vpop.f32.mrb[8].mxu0  ;;  %v1267_v27 = vpop.f32.mrb[8].mxu1  ;;  %5057 = vmatpush3.bf16.xpose.msra.mxu1 %v1556_v12  ;;  %5088 = vmatprep.subr.bf16.mxu0 %v1835_v14 }
 0x2eb   : > { %v1156_v15 = vpop.f32.mrb[9].mxu0  ;;  %v1269_v17 = vpop.f32.mrb[9].mxu1  ;;  %1399 = vmatmul.mubr.bf16.gmra.mrb[48].mxu0 %v6555_v18  ;;  %v1155_v0 = vadd.f32 %v1154_v36, %v6612_v29  ;;  %v1268_v22 = vadd.f32 %v1267_v27, %v6617_v46 }
 0x2ec   : > { %5089 = vmatpush3.bf16.xpose.msra.mxu0 %v1835_v14  ;;  %v1158_v51 = vpop.f32.mrb[10].mxu0  ;;  %v1271_v52 = vpop.f32.mrb[10].mxu1  ;;  %1408 = vmatprep.mubr.bf16.mxu0 %v7915_v16  ;;  %v1157_v33 = vadd.f32 %v1156_v15, %v6622_v32  ;;  %v1270_v38 = vadd.f32 %v1269_v17, %v6627_v55 }
 0x2ed   : > { %v1159_v47 = vadd.f32 %v1158_v51, %v6612_v29  ;;  %v1272_v30 = vadd.f32 %v1271_v52, %v6617_v46  ;;  %v1160_v31 = vpop.f32.mrb[11].mxu0  ;;  %v1273_v58 = vpop.f32.mrb[11].mxu1 }
 0x2ee   : > { %v1161_v18 = vadd.f32 %v1160_v31, %v6622_v32  ;;  %v1274_v39 = vadd.f32 %v1273_v58, %v6627_v55 }
 0x2ef   : > { %v1545_v40 = vpack.c.bf16 %v1159_v47, %v1155_v0  ;;  %v1557_v41 = vpack.c.bf16 %v1272_v30, %v1268_v22 }
 0x2f0   : > { %v1824_v44 = vpack.c.bf16 %v1161_v18, %v1157_v33  ;;  %v1836_v35 = vpack.c.bf16 %v1274_v39, %v1270_v38 }
 0x2f1   : > { %5058 = vmatprep.subr.bf16.mxu1 %v1557_v41 }
 0x2f2   : > { %v1164_v45 = vpop.f32.mrb[12].mxu0  ;;  %v1277_v61 = vpop.f32.mrb[12].mxu1  ;;  %5059 = vmatpush3.bf16.xpose.msra.mxu1 %v1557_v41  ;;  %5090 = vmatprep.subr.bf16.mxu0 %v1836_v35 }
 0x2f3   : > { %v1166_v49 = vpop.f32.mrb[13].mxu0  ;;  %v1279_v50 = vpop.f32.mrb[13].mxu1  ;;  %1409 = vmatmul.mubr.bf16.gmra.mrb[52].mxu0 %v6567_v11  ;;  %v1165_v56 = vadd.f32 %v1164_v45, %v6612_v29  ;;  %v1278_v60 = vadd.f32 %v1277_v61, %v6617_v46 }
 0x2f4   : > { %5091 = vmatpush3.bf16.xpose.msra.mxu0 %v1836_v35  ;;  %v1168_v53 = vpop.f32.mrb[14].mxu0  ;;  %v1281_v54 = vpop.f32.mrb[14].mxu1  ;;  %1418 = vmatprep.mubr.bf16.mxu0 %v7915_v16  ;;  %v1167_v57 = vadd.f32 %v1166_v49, %v6622_v32  ;;  %v1280_v3 = vadd.f32 %v1279_v50, %v6627_v55 }
 0x2f5   : > { %v1169_v62 = vadd.f32 %v1168_v53, %v6612_v29  ;;  %v1282_v43 = vadd.f32 %v1281_v54, %v6617_v46  ;;  %v1170_v63 = vpop.f32.mrb[15].mxu0  ;;  %v1283_v42 = vpop.f32.mrb[15].mxu1 }
 0x2f6   : > { %v1171_v11 = vadd.f32 %v1170_v63, %v6622_v32  ;;  %v1284_v9 = vadd.f32 %v1283_v42, %v6627_v55 }
 0x2f7   : > { %v1546_v4 = vpack.c.bf16 %v1169_v62, %v1165_v56  ;;  %v1558_v6 = vpack.c.bf16 %v1282_v43, %v1278_v60 }
 0x2f8   : > { %v1825_v7 = vpack.c.bf16 %v1171_v11, %v1167_v57  ;;  %v1837_v10 = vpack.c.bf16 %v1284_v9, %v1280_v3 }
 0x2f9   : > { %5060 = vmatprep.subr.bf16.mxu1 %v1558_v6 }
 0x2fa   : > { %5061 = vmatpush3.bf16.xpose.msra.mxu1 %v1558_v6  ;;  %5092 = vmatprep.subr.bf16.mxu0 %v1837_v10 }
 0x2fb   : > { %1419 = vmatmul.mubr.bf16.gmra.mrb[56].mxu0 %v6579_v20 }
 0x2fc   : > { %5093 = vmatpush3.bf16.xpose.msra.mxu0 %v1837_v10  ;;  %1428 = vmatprep.mubr.bf16.mxu0 %v7915_v16 }
 0x301   : > { %5063 = vmatmul.mubr.bf16.vlgmr.msra.gmra.mrb[32].mxu1 %v1544_v26 }
 0x302   : > { %5066 = vmatprep.mubr.bf16.mxu1 %v1545_v40 }
 0x303   : > { %1429 = vmatmul.mubr.bf16.gmra.mrb[60].mxu0 %v6589_v23 }
 0x304   : > { %5094 = vmatprep.mubr.bf16.mxu0 %v1822_v5 }
 0x309   : > { %5067 = vmatmul.mubr.bf16.gmra.mrb[36].mxu1 %v1546_v4 }
 0x30b   : > { %5095 = vmatmul.mubr.bf16.vlgmr.msra.gmra.mrb[64].mxu0 %v1823_v13 }
 0x30c   : > { %5098 = vmatprep.mubr.bf16.mxu0 %v1824_v44 }
 0x313   : > { %5099 = vmatmul.mubr.bf16.gmra.mrb[68].mxu0 %v1825_v7 }
 0x37e   : > { %v1174_v2 = vpop.f32.mrb[16].mxu0  ;;  %v1287_v20 = vpop.f32.mrb[16].mxu1 }
 0x37f   : > { %v1176_v48 = vpop.f32.mrb[17].mxu0  ;;  %v1289_v12 = vpop.f32.mrb[17].mxu1  ;;  %v6697_v36 = vadd.f32 %v1174_v2, %v6612_v29  ;;  %v1288_v23 = vadd.f32 %v1287_v20, %v6617_v46 }
 0x380   : > { %v1178_v14 = vpop.f32.mrb[18].mxu0  ;;  %v1291_v26 = vpop.f32.mrb[18].mxu1  ;;  %v6705_v8 = vadd.f32 %v1176_v48, %v6622_v32  ;;  %v1290_v13 = vadd.f32 %v1289_v12, %v6627_v55 }
 0x381   : > { %v6701_v34 = vadd.f32 %v1178_v14, %v6612_v29  ;;  %v1292_v59 = vadd.f32 %v1291_v26, %v6617_v46  ;;  %v1180_v5 = vpop.f32.mrb[19].mxu0  ;;  %v1293_v19 = vpop.f32.mrb[19].mxu1 }
 0x382   : > { %v6709_v27 = vadd.f32 %v1180_v5, %v6622_v32  ;;  %v1294_v15 = vadd.f32 %v1293_v19, %v6627_v55 }
 0x383   : > { %v6714_v51 = vpack.c.bf16 %v1292_v59, %v1288_v23 }
 0x384   : > { %v6718_v0 = vpack.c.bf16 %v1294_v15, %v1290_v13 }
 0x386   : > { %v1184_v22 = vpop.f32.mrb[20].mxu0  ;;  %v1297_v47 = vpop.f32.mrb[20].mxu1 }
 0x387   : > { %v1186_v30 = vpop.f32.mrb[21].mxu0  ;;  %v1299_v31 = vpop.f32.mrb[21].mxu1  ;;  %v6721_v38 = vadd.f32 %v1184_v22, %v6612_v29  ;;  %v1298_v18 = vadd.f32 %v1297_v47, %v6617_v46  ;;  %v848_v47 = vsub.s32 4, %v6596_v37 }
 0x388   : > { %v1188_v58 = vpop.f32.mrb[22].mxu0  ;;  %v1301_v33 = vpop.f32.mrb[22].mxu1  ;;  %v6729_v35 = vadd.f32 %v1186_v30, %v6622_v32  ;;  %v1300_v45 = vadd.f32 %v1299_v31, %v6627_v55  ;;  %v852_v30 = vsub.s32 5, %v6596_v37 }
 0x389   : > { %v6725_v39 = vadd.f32 %v1188_v58, %v6612_v29  ;;  %v1302_v40 = vadd.f32 %v1301_v33, %v6617_v46  ;;  %v1190_v41 = vpop.f32.mrb[23].mxu0  ;;  %v1303_v44 = vpop.f32.mrb[23].mxu1 }
 0x38a   : > { %v6733_v61 = vadd.f32 %v1190_v41, %v6622_v32  ;;  %v1304_v49 = vadd.f32 %v1303_v44, %v6627_v55 }
 0x38b   : > { %v6738_v53 = vpack.c.bf16 %v1302_v40, %v1298_v18 }
 0x38c   : > { %v6742_v56 = vpack.c.bf16 %v1304_v49, %v1300_v45 }
 0x38e   : > { %v1194_v60 = vpop.f32.mrb[24].mxu0  ;;  %v1307_v62 = vpop.f32.mrb[24].mxu1 }
 0x38f   : > { %v1196_v43 = vpop.f32.mrb[25].mxu0  ;;  %v1309_v63 = vpop.f32.mrb[25].mxu1  ;;  %v6745_v3 = vadd.f32 %v1194_v60, %v6612_v29  ;;  %v1308_v11 = vadd.f32 %v1307_v62, %v6617_v46 }
 0x390   : > { %v1198_v42 = vpop.f32.mrb[26].mxu0  ;;  %v1311_v57 = vpop.f32.mrb[26].mxu1  ;;  %v6753_v10 = vadd.f32 %v1196_v43, %v6622_v32  ;;  %v1310_v2 = vadd.f32 %v1309_v63, %v6627_v55  ;;  %v6795_v63 = vrot.slane %v6605_v25, %v848_v47 }
 0x391   : > { %v6749_v9 = vadd.f32 %v1198_v42, %v6612_v29  ;;  %v1312_v4 = vadd.f32 %v1311_v57, %v6617_v46  ;;  %v1200_v6 = vpop.f32.mrb[27].mxu0  ;;  %v1313_v7 = vpop.f32.mrb[27].mxu1  ;;  %v6798_v57 = vrot.slane %v6605_v25, %v852_v30 }
 0x392   : > { %v6757_v20 = vadd.f32 %v1200_v6, %v6622_v32  ;;  %v1314_v48 = vadd.f32 %v1313_v7, %v6627_v55 }
 0x393   : > { %v6762_v14 = vpack.c.bf16 %v1312_v4, %v1308_v11 }
 0x394   : > { %v6766_v23 = vpack.c.bf16 %v1314_v48, %v1310_v2 }
 0x396   : > { %v1204_v59 = vpop.f32.mrb[28].mxu0  ;;  %v1317_v5 = vpop.f32.mrb[28].mxu1 }
 0x397   : > { %v1206_v19 = vpop.f32.mrb[29].mxu0  ;;  %v1319_v13 = vpop.f32.mrb[29].mxu1  ;;  %v6771_v31 = vadd.f32 %v1204_v59, %v6612_v29  ;;  %v1318_v58 = vadd.f32 %v1317_v5, %v6617_v46 }
 0x398   : > { %v1208_v15 = vpop.f32.mrb[30].mxu0  ;;  %v1321_v22 = vpop.f32.mrb[30].mxu1  ;;  %v6779_v44 = vadd.f32 %v1206_v19, %v6622_v32  ;;  %v1320_v45 = vadd.f32 %v1319_v13, %v6627_v55 }
 0x399   : > { %v6775_v33 = vadd.f32 %v1208_v15, %v6612_v29  ;;  %v1322_v18 = vadd.f32 %v1321_v22, %v6617_v46  ;;  %v1210_v40 = vpop.f32.mrb[31].mxu0  ;;  %v1323_v41 = vpop.f32.mrb[31].mxu1 }
 0x39a   : > { %7953 = vst [vmem:[#allocation22_spill] sm:$0xff] %v6779_v44  ;;  %v6783_v49 = vadd.f32 %v1210_v40, %v6622_v32  ;;  %v1324_v60 = vadd.f32 %v1323_v41, %v6627_v55 }
 0x39b   : > { %v6788_v43 = vpack.c.bf16 %v1322_v18, %v1318_v58 }
 0x39c   : > { %v6792_v46 = vpack.c.bf16 %v1324_v60, %v1320_v45 }
 0x39e   : > { %v1360_v42 = vpop.f32.mrb[32].mxu0 }
 0x39f   : > { %v1362_v32 = vpop.f32.mrb[33].mxu0  ;;  %v1361_v55 = vadd.f32 %v1360_v42, %v6795_v63 }
 0x3a0   : > { %v1364_v11 = vpop.f32.mrb[34].mxu0  ;;  %v1363_v7 = vadd.f32 %v1362_v32, %v6798_v57 }
 0x3a1   : > { %v1365_v4 = vadd.f32 %v1364_v11, %v6795_v63  ;;  %v1366_v6 = vpop.f32.mrb[35].mxu0 }
 0x3a2   : > { %v1367_v2 = vadd.f32 %v1366_v6, %v6798_v57 }
 0x3a3   : > { %v1567_v48 = vpack.c.bf16 %v1365_v4, %v1361_v55 }
 0x3a4   : > { %v1846_v59 = vpack.c.bf16 %v1367_v2, %v1363_v7 }
 0x3a5   : > { %5070 = vmatprep.subr.bf16.mxu1 %v1567_v48 }
 0x3a6   : > { %v1370_v5 = vpop.f32.mrb[36].mxu0  ;;  %5071 = vmatpush3.bf16.msra.mxu1 %v1567_v48  ;;  %5102 = vmatprep.subr.bf16.mxu0 %v1846_v59 }
 0x3a7   : > { %v1372_v19 = vpop.f32.mrb[37].mxu0  ;;  %5103 = vmatpush3.bf16.msra.mxu0 %v1846_v59  ;;  %v1371_v13 = vadd.f32 %v1370_v5, %v6795_v63 }
 0x3a8   : > { %v1374_v25 = vpop.f32.mrb[38].mxu0  ;;  %v1373_v47 = vadd.f32 %v1372_v19, %v6798_v57 }
 0x3a9   : > { %v1375_v15 = vadd.f32 %v1374_v25, %v6795_v63  ;;  %v1376_v22 = vpop.f32.mrb[39].mxu0 }
 0x3aa   : > { %v1377_v30 = vadd.f32 %v1376_v22, %v6798_v57 }
 0x3ab   : > { %v1568_v58 = vpack.c.bf16 %v1375_v15, %v1371_v13 }
 0x3ac   : > { %v1847_v18 = vpack.c.bf16 %v1377_v30, %v1373_v47 }
 0x3ad   : > { %5072 = vmatprep.subr.bf16.mxu1 %v1568_v58 }
 0x3ae   : > { %v1380_v40 = vpop.f32.mrb[40].mxu0  ;;  %5073 = vmatpush3.bf16.msra.mxu1 %v1568_v58  ;;  %5104 = vmatprep.subr.bf16.mxu0 %v1847_v18 }
 0x3af   : > { %v1382_v41 = vpop.f32.mrb[41].mxu0  ;;  %5105 = vmatpush3.bf16.msra.mxu0 %v1847_v18  ;;  %v1381_v60 = vadd.f32 %v1380_v40, %v6795_v63 }
 0x3b0   : > { %v1384_v45 = vpop.f32.mrb[42].mxu0  ;;  %v1383_v11 = vadd.f32 %v1382_v41, %v6798_v57 }
 0x3b1   : > { %v1385_v42 = vadd.f32 %v1384_v45, %v6795_v63  ;;  %v1386_v32 = vpop.f32.mrb[43].mxu0 }
 0x3b2   : > { %v1387_v55 = vadd.f32 %v1386_v32, %v6798_v57 }
 0x3b3   : > { %v1569_v4 = vpack.c.bf16 %v1385_v42, %v1381_v60 }
 0x3b4   : > { %v1848_v6 = vpack.c.bf16 %v1387_v55, %v1383_v11 }
 0x3b5   : > { %5074 = vmatprep.subr.bf16.mxu1 %v1569_v4 }
 0x3b6   : > { %v1390_v7 = vpop.f32.mrb[44].mxu0  ;;  %5075 = vmatpush3.bf16.msra.mxu1 %v1569_v4  ;;  %5106 = vmatprep.subr.bf16.mxu0 %v1848_v6 }
 0x3b7   : > { %v1392_v2 = vpop.f32.mrb[45].mxu0  ;;  %5107 = vmatpush3.bf16.msra.mxu0 %v1848_v6  ;;  %v1391_v59 = vadd.f32 %v1390_v7, %v6795_v63 }
 0x3b8   : > { %v1394_v48 = vpop.f32.mrb[46].mxu0  ;;  %v1393_v25 = vadd.f32 %v1392_v2, %v6798_v57 }
 0x3b9   : > { %v1395_v5 = vadd.f32 %v1394_v48, %v6795_v63  ;;  %v1396_v19 = vpop.f32.mrb[47].mxu0 }
 0x3ba   : > { %v1397_v13 = vadd.f32 %v1396_v19, %v6798_v57 }
 0x3bb   : > { %v1570_v15 = vpack.c.bf16 %v1395_v5, %v1391_v59 }
 0x3bc   : > { %v1849_v22 = vpack.c.bf16 %v1397_v13, %v1393_v25 }
 0x3bd   : > { %5076 = vmatprep.subr.bf16.mxu1 %v1570_v15 }
 0x3be   : > { %v1400_v47 = vpop.f32.mrb[48].mxu0  ;;  %5077 = vmatpush3.bf16.msra.mxu1 %v1570_v15  ;;  %5108 = vmatprep.subr.bf16.mxu0 %v1849_v22 }
 0x3bf   : > { %v1402_v30 = vpop.f32.mrb[49].mxu0  ;;  %5109 = vmatpush3.bf16.msra.mxu0 %v1849_v22  ;;  %5118 = vmatprep.subr.bf16.mxu1 %v6714_v51  ;;  %v1401_v40 = vadd.f32 %v1400_v47, %v6795_v63 }
 0x3c0   : > { %v1403_v58 = vadd.f32 %v1402_v30, %v6798_v57  ;;  %v1404_v18 = vpop.f32.mrb[50].mxu0 }
 0x3c1   : > { %v1405_v41 = vadd.f32 %v1404_v18, %v6795_v63  ;;  %v1406_v45 = vpop.f32.mrb[51].mxu0 }
 0x3c2   : > { %v1407_v60 = vadd.f32 %v1406_v45, %v6798_v57 }
 0x3c3   : > { %v6821_v42 = vpack.c.bf16 %v1405_v41, %v1401_v40 }
 0x3c4   : > { %v6823_v32 = vpack.c.bf16 %v1407_v60, %v1403_v58 }
 0x3c5   : > { %5134 = vmatprep.subr.bf16.mxu0 %v6821_v42 }
 0x3c6   : > { %v1410_v11 = vpop.f32.mrb[52].mxu0 }
 0x3c7   : > { %v1411_v55 = vadd.f32 %v1410_v11, %v6795_v63  ;;  %v1412_v4 = vpop.f32.mrb[53].mxu0 }
 0x3c8   : > { %v1413_v6 = vadd.f32 %v1412_v4, %v6798_v57  ;;  %v1414_v7 = vpop.f32.mrb[54].mxu0 }
 0x3c9   : > { %v1415_v2 = vadd.f32 %v1414_v7, %v6795_v63  ;;  %v1416_v48 = vpop.f32.mrb[55].mxu0 }
 0x3ca   : > { %v1417_v59 = vadd.f32 %v1416_v48, %v6798_v57 }
 0x3cb   : > { %v6830_v5 = vpack.c.bf16 %v1415_v2, %v1411_v55 }
 0x3cc   : > { %v6832_v19 = vpack.c.bf16 %v1417_v59, %v1413_v6 }
 0x3ce   : > { %v1420_v25 = vpop.f32.mrb[56].mxu0 }
 0x3cf   : > { %v1421_v13 = vadd.f32 %v1420_v25, %v6795_v63  ;;  %v1422_v15 = vpop.f32.mrb[57].mxu0 }
 0x3d0   : > { %v1423_v22 = vadd.f32 %v1422_v15, %v6798_v57  ;;  %v1424_v47 = vpop.f32.mrb[58].mxu0 }
 0x3d1   : > { %v1425_v30 = vadd.f32 %v1424_v47, %v6795_v63  ;;  %v1426_v58 = vpop.f32.mrb[59].mxu0 }
 0x3d2   : > { %v1427_v18 = vadd.f32 %v1426_v58, %v6798_v57 }
 0x3d3   : > { %v6838_v40 = vpack.c.bf16 %v1425_v30, %v1421_v13 }
 0x3d4   : > { %v6840_v41 = vpack.c.bf16 %v1427_v18, %v1423_v22  ;;  %v5064_v45 = vpop.f32.mrb[32].mxu1 }
 0x3d5   : > { %v1605_v60 = vpop.f32.mrb[33].mxu1  ;;  %v1643_v47 = vsel %vm1636_vm0, %v5064_v45, -inf }
 0x3d6   : > { %v1430_v11 = vpop.f32.mrb[60].mxu0  ;;  %v5065_v55 = vpop.f32.mrb[34].mxu1  ;;  %v1637_v4 = vsel %vm1636_vm0, %v1605_v60, -inf }
 0x3d7   : > { %v1431_v6 = vadd.f32 %v1430_v11, %v6795_v63  ;;  %1638 = vmax.xlane.f32.xlu0 %v1637_v4  ;;  %v1432_v7 = vpop.f32.mrb[61].mxu0  ;;  %v1608_v2 = vpop.f32.mrb[35].mxu1  ;;  %v1646_v11 = vsel %vm1636_vm0, %v5065_v55, -inf }
 0x3d8   : > { %v1433_v48 = vadd.f32 %v1432_v7, %v6798_v57  ;;  %v1434_v59 = vpop.f32.mrb[62].mxu0  ;;  %v1640_v25 = vsel %vm1636_vm0, %v1608_v2, -inf }
 0x3d9   : > { %v1435_v13 = vadd.f32 %v1434_v59, %v6795_v63  ;;  %1641 = vmax.xlane.f32.xlu1 %v1640_v25  ;;  %v1436_v15 = vpop.f32.mrb[63].mxu0 }
 0x3da   : > { %v1437_v22 = vadd.f32 %v1436_v15, %v6798_v57 }
 0x3db   : > { %v6849_v30 = vpack.c.bf16 %v1435_v13, %v1431_v6  ;;  %1644 = vmax.xlane.f32.xlu0 %v1643_v47 }
 0x3dc   : > { %v6851_v58 = vpack.c.bf16 %v1437_v22, %v1433_v48  ;;  %v5068_v18 = vpop.f32.mrb[36].mxu1 }
 0x3dd   : > { %1647 = vmax.xlane.f32.xlu1 %v1646_v11  ;;  %v1621_v4 = vpop.f32.mrb[37].mxu1  ;;  %v1655_v13 = vsel %vm1636_vm0, %v5068_v18, -inf }
 0x3de   : > { %v5069_v7 = vpop.f32.mrb[38].mxu1  ;;  %v6854_v28 = vpop.f32.mrb[64].mxu0  ;;  %v1649_v63 = vsel %vm1636_vm0, %v1621_v4, -inf }
 0x3df   : > { %1650 = vmax.xlane.f32.xlu0 %v1649_v63  ;;  %v1624_v59 = vpop.f32.mrb[39].mxu1  ;;  %v6857_v57 = vpop.f32.mrb[65].mxu0  ;;  %v1658_v15 = vsel %vm1636_vm0, %v5069_v7, -inf }
 0x3e0   : > { %v6859_v25 = vpop.f32.mrb[66].mxu0  ;;  %v1652_v6 = vsel %vm1636_vm0, %v1624_v59, -inf }
 0x3e1   : > { %1653 = vmax.xlane.f32.xlu1 %v1652_v6  ;;  %v6862_v48 = vpop.f32.mrb[67].mxu0 }
 0x3e3   : > { %1656 = vmax.xlane.f32.xlu0 %v1655_v13 }
 0x3e5   : > { %1659 = vmax.xlane.f32.xlu1 %v1658_v15 }
 0x3e6   : > { %v6866_v22 = vpop.f32.mrb[68].mxu0 }
 0x3e7   : > { %v6868_v47 = vpop.f32.mrb[69].mxu0 }
 0x3e8   : > { %v6870_v11 = vpop.f32.mrb[70].mxu0 }
 0x3e9   : > { %v6872_v63 = vpop.f32.mrb[71].mxu0 }
 0x464   : > { %v1639_v21 = vpop.xlane.xlu0 %1638 }
 0x465   : > { %v1661_v24 = vsub.f32 %v1605_v60, %v1639_v21 }
 0x466   : > { %v1642_v1 = vpop.xlane.xlu1 %1641 }
 0x467   : > { %v1669_v6 = vmul.f32 1.442695, %v1661_v24  ;;  %v1662_v16 = vsub.f32 %v1608_v2, %v1642_v1 }
 0x468   : > { %v1645_v29 = vpop.xlane.xlu0 %1644 }
 0x469   : > { %5490 = vpow2.f32 %v1669_v6  ;;  %v1671_v26 = vmul.f32 1.442695, %v1662_v16  ;;  %v1663_v13 = vsub.f32 %v5064_v45, %v1645_v29 }
 0x46a   : > { %v1648_v54 = vpop.xlane.xlu1 %1647 }
 0x46b   : > { %5492 = vpow2.f32 %v1671_v26  ;;  %v1673_v15 = vmul.f32 1.442695, %v1663_v13  ;;  %v1664_v52 = vsub.f32 %v5065_v55, %v1648_v54  ;;  %v1915_v13 = vsel %vm1636_vm0, %v6857_v57, -inf }
 0x46c   : > { %v1651_v62 = vpop.xlane.xlu0 %1650 }
 0x46d   : > { %5494 = vpow2.f32 %v1673_v15  ;;  %v1675_v12 = vmul.f32 1.442695, %v1664_v52  ;;  %v1665_v50 = vsub.f32 %v1621_v4, %v1651_v62  ;;  %v1918_v15 = vsel %vm1636_vm0, %v6862_v48, -inf }
 0x46e   : > { %v1654_v17 = vpop.xlane.xlu1 %1653 }
 0x46f   : > { %5496 = vpow2.f32 %v1675_v12  ;;  %v1677_v37 = vmul.f32 1.442695, %v1665_v50  ;;  %v1666_v44 = vsub.f32 %v1624_v59, %v1654_v17 }
 0x470   : > { %v1657_v21 = vpop.xlane.xlu0 %1656 }
 0x471   : > { %5498 = vpow2.f32 %v1677_v37  ;;  %v1679_v24 = vmul.f32 1.442695, %v1666_v44  ;;  %v1667_v1 = vsub.f32 %v5068_v18, %v1657_v21  ;;  %v1921_v21 = vsel %vm1636_vm0, %v6854_v28, -inf }
 0x472   : > { %v1660_v60 = vpop.xlane.xlu1 %1659 }
 0x473   : > { %v6874_v2 = vpop.eup %5490  ;;  %5500 = vpow2.f32 %v1679_v24  ;;  %v1681_v16 = vmul.f32 1.442695, %v1667_v1  ;;  %v1668_v26 = vsub.f32 %v5069_v7, %v1660_v60  ;;  %v1924_v24 = vsel %vm1636_vm0, %v6859_v25, -inf }
 0x474   : > { %v1685_v54 = vsel %vm1636_vm0, %v6874_v2, 0.0  ;;  %v1927_v1 = vsel %vm1636_vm0, %v6868_v47, -inf  ;;  %v1930_v60 = vsel %vm1636_vm0, %v6872_v63, -inf }
 0x475   : > { %v5493_v29 = vpop.eup %5492  ;;  %5502 = vpow2.f32 %v1681_v16  ;;  %v1683_v52 = vmul.f32 1.442695, %v1668_v26  ;;  %1686 = vadd.xlane.f32.xlu0 %v1685_v54  ;;  %v1933_v16 = vsel %vm1636_vm0, %v6866_v22, -inf  ;;  %v1936_v26 = vsel %vm1636_vm0, %v6870_v11, -inf }
 0x476   : > { %v1688_v50 = vsel %vm1636_vm0, %v5493_v29, 0.0 }
 0x477   : > { %v5495_v17 = vpop.eup %5494  ;;  %5504 = vpow2.f32 %v1683_v52  ;;  %1689 = vadd.xlane.f32.xlu1 %v1688_v50 }
 0x478   : > { %v1691_v37 = vsel %vm1636_vm0, %v5495_v17, 0.0 }
 0x479   : > { %v5497_v12 = vpop.eup %5496  ;;  %1692 = vadd.xlane.f32.xlu0 %v1691_v37 }
 0x47a   : > { %v1694_v44 = vsel %vm1636_vm0, %v5497_v12, 0.0 }
 0x47b   : > { %v5499_v62 = vpop.eup %5498  ;;  %1695 = vadd.xlane.f32.xlu1 %v1694_v44 }
 0x47c   : > { %v1697_v45 = vsel %vm1636_vm0, %v5499_v62, 0.0 }
 0x47d   : > { %v5501_v55 = vpop.eup %5500  ;;  %1698 = vadd.xlane.f32.xlu0 %v1697_v45 }
 0x47e   : > { %v1700_v18 = vsel %vm1636_vm0, %v5501_v55, 0.0 }
 0x47f   : > { %v5503_v4 = vpop.eup %5502  ;;  %1701 = vadd.xlane.f32.xlu1 %v1700_v18 }
 0x480   : > { %v1703_v7 = vsel %vm1636_vm0, %v5503_v4, 0.0 }
 0x481   : > { %v5505_v59 = vpop.eup %5504  ;;  %1704 = vadd.xlane.f32.xlu0 %v1703_v7 }
 0x482   : > { %v1706_v6 = vsel %vm1636_vm0, %v5505_v59, 0.0 }
 0x483   : > { %1707 = vadd.xlane.f32.xlu1 %v1706_v6 }
 0x485   : > { %1916 = vmax.xlane.f32.xlu0 %v1915_v13 }
 0x487   : > { %1919 = vmax.xlane.f32.xlu1 %v1918_v15 }
 0x489   : > { %1922 = vmax.xlane.f32.xlu0 %v1921_v21 }
 0x48b   : > { %1925 = vmax.xlane.f32.xlu1 %v1924_v24 }
 0x48d   : > { %1928 = vmax.xlane.f32.xlu0 %v1927_v1 }
 0x48f   : > { %1931 = vmax.xlane.f32.xlu1 %v1930_v60 }
 0x491   : > { %1934 = vmax.xlane.f32.xlu0 %v1933_v16 }
 0x493   : > { %1937 = vmax.xlane.f32.xlu1 %v1936_v26 }
 0x502   : > { %v1687_v54 = vpop.xlane.xlu0 %1686 }
 0x503   : > { %5506 = vrcp.f32 %v1687_v54 }
 0x504   : > { %v1690_v52 = vpop.xlane.xlu1 %1689 }
 0x505   : > { %5508 = vrcp.f32 %v1690_v52 }
 0x506   : > { %v1693_v50 = vpop.xlane.xlu0 %1692 }
 0x507   : > { %5510 = vrcp.f32 %v1693_v50 }
 0x508   : > { %v1696_v37 = vpop.xlane.xlu1 %1695 }
 0x509   : > { %5512 = vrcp.f32 %v1696_v37 }
 0x50a   : > { %v1699_v44 = vpop.xlane.xlu0 %1698 }
 0x50b   : > { %5514 = vrcp.f32 %v1699_v44 }
 0x50c   : > { %v1702_v45 = vpop.xlane.xlu1 %1701 }
 0x50d   : > { %v5507_v18 = vpop.eup %5506  ;;  %5516 = vrcp.f32 %v1702_v45 }
 0x50e   : > { %v1705_v7 = vpop.xlane.xlu0 %1704  ;;  %v1717_v15 = vmul.f32 %v5507_v18, %v6874_v2 }
 0x50f   : > { %v5509_v6 = vpop.eup %5508  ;;  %5518 = vrcp.f32 %v1705_v7 }
 0x510   : > { %v1708_v13 = vpop.xlane.xlu1 %1707  ;;  %v1718_v21 = vmul.f32 %v5509_v6, %v5493_v29 }
 0x511   : > { %v5511_v24 = vpop.eup %5510  ;;  %5520 = vrcp.f32 %v1708_v13 }
 0x512   : > { %v1725_v1 = vpack.c.bf16 %v1718_v21, %v1717_v15  ;;  %v1719_v16 = vmul.f32 %v5511_v24, %v5495_v17 }
 0x513   : > { %v5513_v60 = vpop.eup %5512 }
 0x514   : > { %v1720_v26 = vmul.f32 %v5513_v60, %v5497_v12  ;;  %5078 = vmatprep.mubr.msk.bf16.mxu1 %vm1636_vm0, %v1725_v1 }
 0x515   : > { %v5515_v54 = vpop.eup %5514 }
 0x516   : > { %v1726_v52 = vpack.c.bf16 %v1720_v26, %v1719_v16  ;;  %v1721_v37 = vmul.f32 %v5515_v54, %v5499_v62  ;;  %v7954_v62 = vpack.c.bf16 %v6701_v34, %v6697_v36  ;;  %v7957_v36 = vpack.c.bf16 %v6775_v33, %v6771_v31 }
 0x517   : > { %v5517_v50 = vpop.eup %5516 }
 0x518   : > { %5079 = vmatmul.mubr.msk.bf16.vlgmr.msra.gmra.mrb[40].mxu1 %vm1636_vm0, %v1726_v52  ;;  %v1722_v44 = vmul.f32 %v5517_v50, %v5501_v55  ;;  %v1920_v55 = vpop.xlane.xlu1 %1919 }
 0x519   : > { %v5519_v45 = vpop.eup %5518  ;;  %5119 = vmatpush3.bf16.xpose.msra.mxu1 %v6714_v51  ;;  %v7955_v51 = vpack.c.bf16 %v6725_v39, %v6721_v38  ;;  %v1940_v6 = vsub.f32 %v6862_v48, %v1920_v55 }
 0x51a   : > { %5120 = vmatprep.subr.bf16.mxu1 %v6738_v53  ;;  %v1727_v2 = vpack.c.bf16 %v1722_v44, %v1721_v37  ;;  %v1723_v17 = vmul.f32 %v5519_v45, %v5503_v4 }
 0x51b   : > { %v5521_v29 = vpop.eup %5520  ;;  %v1949_v54 = vmul.f32 1.442695, %v1940_v6 }
 0x51c   : > { %5082 = vmatprep.mubr.msk.bf16.mxu1 %vm1636_vm0, %v1727_v2  ;;  %v1724_v12 = vmul.f32 %v5521_v29, %v5505_v59  ;;  %v1926_v59 = vpop.xlane.xlu1 %1925 }
 0x51d   : > { %v1942_v52 = vsub.f32 %v6859_v25, %v1926_v59 }
 0x51e   : > { %v1728_v18 = vpack.c.bf16 %v1724_v12, %v1723_v17 }
 0x51f   : > { %v1953_v45 = vmul.f32 1.442695, %v1942_v52 }
 0x520   : > { %5083 = vmatmul.mubr.msk.bf16.gmra.mrb[44].mxu1 %vm1636_vm0, %v1728_v18  ;;  %v1932_v60 = vpop.xlane.xlu1 %1931 }
 0x521   : > { %5121 = vmatpush3.bf16.xpose.msra.mxu1 %v6738_v53  ;;  %5126 = vmatprep.mubr.bf16.mxu1 %v7954_v62  ;;  %v7956_v53 = vpack.c.bf16 %v6749_v9, %v6745_v3  ;;  %v1944_v2 = vsub.f32 %v6872_v63, %v1932_v60 }
 0x522   : > { %5122 = vmatprep.subr.bf16.mxu1 %v6762_v14 }
 0x523   : > { %v1957_v63 = vmul.f32 1.442695, %v1944_v2 }
 0x524   : > { %v1938_v25 = vpop.xlane.xlu1 %1937 }
 0x529   : > { %5123 = vmatpush3.bf16.xpose.msra.mxu1 %v6762_v14 }
 0x52a   : > { %5124 = vmatprep.subr.bf16.mxu1 %v6788_v43 }
 0x531   : > { %5125 = vmatpush3.bf16.xpose.msra.mxu1 %v6788_v43 }
 0x532   : > { %5166 = vmatprep.subr.bf16.mxu1 %v6823_v32 }
 0x538   : > { %5127 = vmatmul.mubr.bf16.vlgmr.msra.gmra.mrb[48].mxu1 %v7955_v51 }
 0x539   : > { %5130 = vmatprep.mubr.bf16.mxu1 %v7956_v53  ;;  %5167 = vmatpush3.bf16.msra.mxu1 %v6823_v32  ;;  %v1946_v53 = vsub.f32 %v6870_v11, %v1938_v25 }
 0x53a   : > { %5168 = vmatprep.subr.bf16.mxu1 %v6832_v19 }
 0x53b   : > { %v1961_v59 = vmul.f32 1.442695, %v1946_v53 }
 0x53d   : > { %5169 = vmatpush3.bf16.msra.mxu1 %v6832_v19 }
 0x53e   : > { %5170 = vmatprep.subr.bf16.mxu1 %v6840_v41 }
 0x540   : > { %5131 = vmatmul.mubr.bf16.gmra.mrb[52].mxu1 %v7957_v36 }
 0x541   : > { %5171 = vmatpush3.bf16.msra.mxu1 %v6840_v41 }
 0x542   : > { %5172 = vmatprep.subr.bf16.mxu1 %v6851_v58 }
 0x545   : > { %5173 = vmatpush3.bf16.msra.mxu1 %v6851_v58  ;;  %v1917_v58 = vpop.xlane.xlu0 %1916 }
 0x546   : > { %v1939_v7 = vsub.f32 %v6857_v57, %v1917_v58 }
 0x548   : > { %v1947_v21 = vmul.f32 1.442695, %v1939_v7 }
 0x549   : > { %v1923_v4 = vpop.xlane.xlu0 %1922 }
 0x54a   : > { %v1941_v24 = vsub.f32 %v6854_v28, %v1923_v4  ;;  %5522 = vpow2.f32 %v1947_v21 }
 0x54b   : > { %5524 = vpow2.f32 %v1949_v54 }
 0x54c   : > { %v1951_v50 = vmul.f32 1.442695, %v1941_v24 }
 0x54d   : > { %v1929_v13 = vpop.xlane.xlu0 %1928 }
 0x54e   : > { %v1943_v28 = vsub.f32 %v6868_v47, %v1929_v13  ;;  %5526 = vpow2.f32 %v1951_v50 }
 0x54f   : > { %5528 = vpow2.f32 %v1953_v45 }
 0x550   : > { %v1955_v12 = vmul.f32 1.442695, %v1943_v28 }
 0x551   : > { %v1935_v37 = vpop.xlane.xlu0 %1934 }
 0x552   : > { %v1945_v47 = vsub.f32 %v6866_v22, %v1935_v37  ;;  %5530 = vpow2.f32 %v1955_v12 }
 0x553   : > { %5532 = vpow2.f32 %v1957_v63 }
 0x554   : > { %v1959_v55 = vmul.f32 1.442695, %v1945_v47  ;;  %v6992_v4 = vpop.eup %5522 }
 0x555   : > { %v6996_v6 = vpop.eup %5524  ;;  %v1963_v11 = vsel %vm1636_vm0, %v6992_v4, 0.0 }
 0x556   : > { %5534 = vpow2.f32 %v1959_v55  ;;  %v1966_v21 = vsel %vm1636_vm0, %v6996_v6, 0.0 }
 0x557   : > { %5536 = vpow2.f32 %v1961_v59 }
 0x558   : > { %v7000_v13 = vpop.eup %5526 }
 0x559   : > { %v7004_v24 = vpop.eup %5528  ;;  %v1969_v60 = vsel %vm1636_vm0, %v7000_v13, 0.0 }
 0x55a   : > { %v1972_v54 = vsel %vm1636_vm0, %v7004_v24, 0.0 }
 0x5eb   : > { %v6933_v34 = vpop.f32.mrb[40].mxu1 }
 0x5ec   : > { %v6935_v38 = vpop.f32.mrb[41].mxu1 }
 0x5ed   : > { %v6937_v39 = vpop.f32.mrb[42].mxu1 }
 0x5ee   : > { %v2698_v3 = vpack.c.bf16 %v6937_v39, %v6933_v34  ;;  %v6941_v9 = vpop.f32.mrb[43].mxu1 }
 0x5ef   : > { %v2696_v14 = vpack.c.bf16 %v6941_v9, %v6935_v38 }
 0x5f3   : > { %v6945_v31 = vpop.f32.mrb[44].mxu1 }
 0x5f4   : > { %v6947_v33 = vpop.f32.mrb[45].mxu1 }
 0x5f5   : > { %v6949_v43 = vpop.f32.mrb[46].mxu1 }
 0x5f6   : > { %v2702_v32 = vpack.c.bf16 %v6949_v43, %v6945_v31  ;;  %v6953_v19 = vpop.f32.mrb[47].mxu1 }
 0x5f7   : > { %v2700_v41 = vpack.c.bf16 %v6953_v19, %v6947_v33 }
 0x60b   : > { %v6959_v15 = vpop.f32.mrb[48].mxu1 }
 0x60c   : > { %v6962_v1 = vpop.f32.mrb[49].mxu1  ;;  %v2199_v44 = vsel %vm1636_vm0, %v6959_v15, -inf }
 0x60d   : > { %v6964_v16 = vpop.f32.mrb[50].mxu1  ;;  %v2193_v26 = vsel %vm1636_vm0, %v6962_v1, -inf }
 0x60e   : > { %2194 = vmax.xlane.f32.xlu0 %v2193_v26  ;;  %v6969_v57 = vpop.f32.mrb[51].mxu1  ;;  %v2202_v17 = vsel %vm1636_vm0, %v6964_v16, -inf  ;;  %v7008_v26 = vpop.eup %5530 }
 0x60f   : > { %v2196_v48 = vsel %vm1636_vm0, %v6969_v57, -inf  ;;  %v7012_v52 = vpop.eup %5532 }
 0x610   : > { %2197 = vmax.xlane.f32.xlu1 %v2196_v48  ;;  %v1975_v48 = vsel %vm1636_vm0, %v7008_v26, 0.0  ;;  %v7016_v50 = vpop.eup %5534  ;;  %v1978_v28 = vsel %vm1636_vm0, %v7012_v52, 0.0 }
 0x611   : > { %v7020_v37 = vpop.eup %5536 }
 0x612   : > { %2200 = vmax.xlane.f32.xlu0 %v2199_v44  ;;  %v1981_v44 = vsel %vm1636_vm0, %v7016_v50, 0.0  ;;  %v1984_v45 = vsel %vm1636_vm0, %v7020_v37, 0.0 }
 0x613   : > { %v6977_v29 = vpop.f32.mrb[52].mxu1 }
 0x614   : > { %2203 = vmax.xlane.f32.xlu1 %v2202_v17  ;;  %v6982_v18 = vpop.f32.mrb[53].mxu1  ;;  %v2211_v22 = vsel %vm1636_vm0, %v6977_v29, -inf }
 0x615   : > { %v6984_v62 = vpop.f32.mrb[54].mxu1  ;;  %v2205_v51 = vsel %vm1636_vm0, %v6982_v18, -inf }
 0x616   : > { %2206 = vmax.xlane.f32.xlu0 %v2205_v51  ;;  %v2181_v36 = vpop.f32.mrb[55].mxu1  ;;  %v2214_v7 = vsel %vm1636_vm0, %v6984_v62, -inf }
 0x617   : > { %v2208_v58 = vsel %vm1636_vm0, %v2181_v36, -inf }
 0x618   : > { %2209 = vmax.xlane.f32.xlu1 %v2208_v58 }
 0x61a   : > { %2212 = vmax.xlane.f32.xlu0 %v2211_v22 }
 0x61c   : > { %2215 = vmax.xlane.f32.xlu1 %v2214_v7 }
 0x61e   : > { %1964 = vadd.xlane.f32.xlu0 %v1963_v11 }
 0x620   : > { %1967 = vadd.xlane.f32.xlu1 %v1966_v21 }
 0x622   : > { %1970 = vadd.xlane.f32.xlu0 %v1969_v60 }
 0x624   : > { %1973 = vadd.xlane.f32.xlu1 %v1972_v54 }
 0x626   : > { %1976 = vadd.xlane.f32.xlu0 %v1975_v48 }
 0x628   : > { %1979 = vadd.xlane.f32.xlu1 %v1978_v28 }
 0x62a   : > { %1982 = vadd.xlane.f32.xlu0 %v1981_v44 }
 0x62c   : > { %1985 = vadd.xlane.f32.xlu1 %v1984_v45 }
 0x69b   : > { %v2195_v2 = vpop.xlane.xlu0 %2194 }
 0x69c   : > { %v2217_v25 = vsub.f32 %v6962_v1, %v2195_v2 }
 0x69d   : > { %v2198_v17 = vpop.xlane.xlu1 %2197 }
 0x69e   : > { %v2225_v12 = vmul.f32 1.442695, %v2217_v25  ;;  %v2218_v47 = vsub.f32 %v6969_v57, %v2198_v17 }
 0x69f   : > { %v2201_v51 = vpop.xlane.xlu0 %2200 }
 0x6a0   : > { %5538 = vpow2.f32 %v2225_v12  ;;  %v2227_v63 = vmul.f32 1.442695, %v2218_v47  ;;  %v2219_v53 = vsub.f32 %v6959_v15, %v2201_v51 }
 0x6a1   : > { %v2204_v58 = vpop.xlane.xlu1 %2203 }
 0x6a2   : > { %5540 = vpow2.f32 %v2227_v63  ;;  %v2229_v55 = vmul.f32 1.442695, %v2219_v53  ;;  %v2220_v22 = vsub.f32 %v6964_v16, %v2204_v58 }
 0x6a3   : > { %v2207_v59 = vpop.xlane.xlu0 %2206 }
 0x6a4   : > { %5542 = vpow2.f32 %v2229_v55  ;;  %v2231_v7 = vmul.f32 1.442695, %v2220_v22  ;;  %v2221_v11 = vsub.f32 %v6982_v18, %v2207_v59 }
 0x6a5   : > { %v2210_v1 = vpop.xlane.xlu1 %2209 }
 0x6a6   : > { %5544 = vpow2.f32 %v2231_v7  ;;  %v2233_v21 = vmul.f32 1.442695, %v2221_v11  ;;  %v2222_v60 = vsub.f32 %v2181_v36, %v2210_v1 }
 0x6a7   : > { %v2213_v57 = vpop.xlane.xlu0 %2212 }
 0x6a8   : > { %5546 = vpow2.f32 %v2233_v21  ;;  %v2235_v54 = vmul.f32 1.442695, %v2222_v60  ;;  %v2223_v48 = vsub.f32 %v6977_v29, %v2213_v57 }
 0x6a9   : > { %v2216_v15 = vpop.xlane.xlu1 %2215 }
 0x6aa   : > { %v7032_v28 = vpop.eup %5538  ;;  %5548 = vpow2.f32 %v2235_v54  ;;  %v2237_v44 = vmul.f32 1.442695, %v2223_v48  ;;  %v2224_v16 = vsub.f32 %v6984_v62, %v2216_v15 }
 0x6ab   : > { %v1965_v45 = vpop.xlane.xlu0 %1964  ;;  %v2241_v18 = vsel %vm1636_vm0, %v7032_v28, 0.0 }
 0x6ac   : > { %v7037_v2 = vpop.eup %5540  ;;  %5550 = vpow2.f32 %v2237_v44  ;;  %v2239_v36 = vmul.f32 1.442695, %v2224_v16  ;;  %2242 = vadd.xlane.f32.xlu0 %v2241_v18 }
 0x6ad   : > { %5552 = vrcp.f32 %v1965_v45  ;;  %v1968_v25 = vpop.xlane.xlu1 %1967  ;;  %v2244_v29 = vsel %vm1636_vm0, %v7037_v2, 0.0 }
 0x6ae   : > { %v7041_v17 = vpop.eup %5542  ;;  %5554 = vpow2.f32 %v2239_v36  ;;  %2245 = vadd.xlane.f32.xlu1 %v2244_v29 }
 0x6af   : > { %5556 = vrcp.f32 %v1968_v25  ;;  %v1971_v62 = vpop.xlane.xlu0 %1970  ;;  %v2247_v12 = vsel %vm1636_vm0, %v7041_v17, 0.0 }
 0x6b0   : > { %v7045_v47 = vpop.eup %5544  ;;  %5558 = vrcp.f32 %v1971_v62  ;;  %2248 = vadd.xlane.f32.xlu0 %v2247_v12 }
 0x6b1   : > { %v1974_v51 = vpop.xlane.xlu1 %1973  ;;  %v2250_v63 = vsel %vm1636_vm0, %v7045_v47, 0.0 }
 0x6b2   : > { %v7049_v53 = vpop.eup %5546  ;;  %5560 = vrcp.f32 %v1974_v51  ;;  %2251 = vadd.xlane.f32.xlu1 %v2250_v63 }
 0x6b3   : > { %v1977_v58 = vpop.xlane.xlu0 %1976  ;;  %v2253_v55 = vsel %vm1636_vm0, %v7049_v53, 0.0 }
 0x6b4   : > { %v7053_v22 = vpop.eup %5548  ;;  %5562 = vrcp.f32 %v1977_v58  ;;  %2254 = vadd.xlane.f32.xlu0 %v2253_v55 }
 0x6b5   : > { %v1980_v59 = vpop.xlane.xlu1 %1979  ;;  %v2256_v7 = vsel %vm1636_vm0, %v7053_v22, 0.0 }
 0x6b6   : > { %v7057_v11 = vpop.eup %5550  ;;  %5564 = vrcp.f32 %v1980_v59  ;;  %2257 = vadd.xlane.f32.xlu1 %v2256_v7 }
 0x6b7   : > { %v5553_v1 = vpop.eup %5552  ;;  %v1983_v21 = vpop.xlane.xlu0 %1982  ;;  %v2259_v60 = vsel %vm1636_vm0, %v7057_v11, 0.0 }
 0x6b8   : > { %v7061_v57 = vpop.eup %5554  ;;  %5566 = vrcp.f32 %v1983_v21  ;;  %2260 = vadd.xlane.f32.xlu0 %v2259_v60  ;;  %v1995_v16 = vmul.f32 %v5553_v1, %v6992_v4 }
 0x6b9   : > { %v5557_v54 = vpop.eup %5556  ;;  %v1986_v48 = vpop.xlane.xlu1 %1985  ;;  %v2262_v15 = vsel %vm1636_vm0, %v7061_v57, 0.0 }
 0x6ba   : > { %v5559_v44 = vpop.eup %5558  ;;  %5568 = vrcp.f32 %v1986_v48  ;;  %2263 = vadd.xlane.f32.xlu1 %v2262_v15  ;;  %v1996_v45 = vmul.f32 %v5557_v54, %v6996_v6 }
 0x6bb   : > { %v1997_v25 = vmul.f32 %v5559_v44, %v7000_v13 }
 0x6bc   : > { %v5561_v18 = vpop.eup %5560  ;;  %v2003_v36 = vpack.c.bf16 %v1996_v45, %v1995_v16 }
 0x6bd   : > { %v1998_v29 = vmul.f32 %v5561_v18, %v7004_v24 }
 0x6be   : > { %v5563_v62 = vpop.eup %5562  ;;  %5110 = vmatprep.mubr.msk.bf16.mxu0 %vm1636_vm0, %v2003_v36 }
 0x6bf   : > { %v2004_v12 = vpack.c.bf16 %v1998_v29, %v1997_v25  ;;  %v1999_v63 = vmul.f32 %v5563_v62, %v7008_v26 }
 0x6c0   : > { %v5565_v51 = vpop.eup %5564 }
 0x6c1   : > { %5111 = vmatmul.mubr.msk.bf16.vlgmr.msra.gmra.mrb[72].mxu0 %vm1636_vm0, %v2004_v12  ;;  %v2000_v58 = vmul.f32 %v5565_v51, %v7012_v52 }
 0x6c2   : > { %v5567_v4 = vpop.eup %5566  ;;  %5135 = vmatpush3.bf16.msra.mxu0 %v6821_v42 }
 0x6c3   : > { %5136 = vmatprep.subr.bf16.mxu0 %v6830_v5  ;;  %v2005_v6 = vpack.c.bf16 %v2000_v58, %v1999_v63  ;;  %v2001_v24 = vmul.f32 %v5567_v4, %v7016_v50 }
 0x6c4   : > { %v5569_v13 = vpop.eup %5568 }
 0x6c5   : > { %5114 = vmatprep.mubr.msk.bf16.mxu0 %vm1636_vm0, %v2005_v6  ;;  %v2002_v55 = vmul.f32 %v5569_v13, %v7020_v37 }
 0x6c6   : > { %5137 = vmatpush3.bf16.msra.mxu0 %v6830_v5 }
 0x6c7   : > { %5138 = vmatprep.subr.bf16.mxu0 %v6838_v40  ;;  %v2006_v26 = vpack.c.bf16 %v2002_v55, %v2001_v24 }
 0x6c9   : > { %5115 = vmatmul.mubr.msk.bf16.gmra.mrb[76].mxu0 %vm1636_vm0, %v2006_v26 }
 0x6ca   : > { %5139 = vmatpush3.bf16.msra.mxu0 %v6838_v40 }
 0x6cb   : > { %5140 = vmatprep.subr.bf16.mxu0 %v6849_v30 }
 0x6ce   : > { %5141 = vmatpush3.bf16.msra.mxu0 %v6849_v30 }
 0x6cf   : > { %5150 = vmatprep.subr.bf16.mxu0 %v6718_v0 }
 0x739   : > { %v2243_v42 = vpop.xlane.xlu0 %2242 }
 0x73a   : > { %5570 = vrcp.f32 %v2243_v42 }
 0x73b   : > { %v2246_v52 = vpop.xlane.xlu1 %2245 }
 0x73c   : > { %5572 = vrcp.f32 %v2246_v52 }
 0x73d   : > { %v2249_v50 = vpop.xlane.xlu0 %2248 }
 0x73e   : > { %5574 = vrcp.f32 %v2249_v50 }
 0x73f   : > { %v2252_v5 = vpop.xlane.xlu1 %2251 }
 0x740   : > { %5576 = vrcp.f32 %v2252_v5 }
 0x741   : > { %v2255_v37 = vpop.xlane.xlu0 %2254 }
 0x742   : > { %5578 = vrcp.f32 %v2255_v37 }
 0x743   : > { %v2258_v59 = vpop.xlane.xlu1 %2257 }
 0x744   : > { %v5571_v7 = vpop.eup %5570  ;;  %5580 = vrcp.f32 %v2258_v59 }
 0x745   : > { %v2261_v40 = vpop.xlane.xlu0 %2260  ;;  %v2273_v30 = vmul.f32 %v5571_v7, %v7032_v28 }
 0x746   : > { %v5573_v1 = vpop.eup %5572  ;;  %5582 = vrcp.f32 %v2261_v40 }
 0x747   : > { %v2264_v21 = vpop.xlane.xlu1 %2263  ;;  %v2274_v60 = vmul.f32 %v5573_v1, %v7037_v2 }
 0x748   : > { %v5575_v54 = vpop.eup %5574  ;;  %5584 = vrcp.f32 %v2264_v21 }
 0x749   : > { %v2281_v48 = vpack.c.bf16 %v2274_v60, %v2273_v30  ;;  %v2275_v44 = vmul.f32 %v5575_v54, %v7041_v17 }
 0x74a   : > { %v5577_v15 = vpop.eup %5576 }
 0x74b   : > { %v2276_v16 = vmul.f32 %v5577_v15, %v7045_v47  ;;  %5142 = vmatprep.mubr.msk.bf16.mxu0 %vm1636_vm0, %v2281_v48 }
 0x74c   : > { %v5579_v45 = vpop.eup %5578 }
 0x74d   : > { %v2282_v18 = vpack.c.bf16 %v2276_v16, %v2275_v44  ;;  %v2277_v25 = vmul.f32 %v5579_v45, %v7049_v53  ;;  %v7958_v53 = vpack.c.bf16 %v6709_v27, %v6705_v8  ;;  %v7963_v27 = vmov 0  }
 0x74e   : > { %v5581_v36 = vpop.eup %5580 }
 0x74f   : > { %5143 = vmatmul.mubr.msk.bf16.vlgmr.msra.gmra.mrb[80].mxu0 %vm1636_vm0, %v2282_v18  ;;  %v2278_v28 = vmul.f32 %v5581_v36, %v7053_v22  ;;  %v7960_v22 = vpack.c.bf16 %v6757_v20, %v6753_v10 }
 0x750   : > { %v5583_v2 = vpop.eup %5582  ;;  %5151 = vmatpush3.bf16.xpose.msra.mxu0 %v6718_v0  ;;  %v7959_v0 = vpack.c.bf16 %v6733_v61, %v6729_v35 }
 0x751   : > { %5152 = vmatprep.subr.bf16.mxu0 %v6742_v56  ;;  %v2283_v29 = vpack.c.bf16 %v2278_v28, %v2277_v25  ;;  %v2279_v47 = vmul.f32 %v5583_v2, %v7057_v11 }
 0x752   : > { %v5585_v17 = vpop.eup %5584 }
 0x753   : > { %5146 = vmatprep.mubr.msk.bf16.mxu0 %vm1636_vm0, %v2283_v29  ;;  %v2280_v62 = vmul.f32 %v5585_v17, %v7061_v57 }
 0x755   : > { %v2284_v12 = vpack.c.bf16 %v2280_v62, %v2279_v47 }
 0x757   : > { %5147 = vmatmul.mubr.msk.bf16.gmra.mrb[84].mxu0 %vm1636_vm0, %v2284_v12 }
 0x758   : > { %5153 = vmatpush3.bf16.xpose.msra.mxu0 %v6742_v56  ;;  %5158 = vmatprep.mubr.bf16.mxu0 %v7958_v53  ;;  %v7961_v56 = vld [vmem:[#allocation22_spill] sm:$0xff] }
 0x759   : > { %5154 = vmatprep.subr.bf16.mxu0 %v6766_v23  ;;  %v7962_v8 = vpack.c.bf16 %v6783_v49, %v7961_v56 }
 0x760   : > { %5155 = vmatpush3.bf16.xpose.msra.mxu0 %v6766_v23 }
 0x761   : > { %5156 = vmatprep.subr.bf16.mxu0 %v6792_v46 }
 0x768   : > { %5157 = vmatpush3.bf16.xpose.msra.mxu0 %v6792_v46 }
 0x76f   : > { %5159 = vmatmul.mubr.bf16.vlgmr.msra.gmra.mrb[88].mxu0 %v7959_v0 }
 0x770   : > { %5162 = vmatprep.mubr.bf16.mxu0 %v7960_v22 }
 0x777   : > { %5163 = vmatmul.mubr.bf16.gmra.mrb[92].mxu0 %v7962_v8 }
 0x778   : > { %3452 = vmatprep.mubr.bf16.mxu0 %v7963_v27 }
 0x794   : > { %v7117_v11 = vpop.f32.mrb[72].mxu0 }
 0x795   : > { %v7119_v23 = vpop.f32.mrb[73].mxu0 }
 0x796   : > { %v7121_v57 = vpop.f32.mrb[74].mxu0 }
 0x797   : > { %v2699_v35 = vpack.c.bf16 %v7121_v57, %v7117_v11  ;;  %v7125_v61 = vpop.f32.mrb[75].mxu0 }
 0x798   : > { %v2697_v10 = vpack.c.bf16 %v7125_v61, %v7119_v23  ;;  %v2648_v23 = vld [vmem:[%s6360_s20] sm:$0xff] }
 0x79c   : > { %v7129_v20 = vpop.f32.mrb[76].mxu0 }
 0x79d   : > { %v7131_v49 = vpop.f32.mrb[77].mxu0 }
 0x79e   : > { %v7133_v46 = vpop.f32.mrb[78].mxu0 }
 0x79f   : > { %v2703_v51 = vpack.c.bf16 %v7133_v46, %v7129_v20  ;;  %v7137_v63 = vpop.f32.mrb[79].mxu0 }
 0x7a0   : > { %v2701_v58 = vpack.c.bf16 %v7137_v63, %v7131_v49  ;;  %v7227_v49 = vld [vmem:[%s7897_s6] ss:$0 sm:$0xff] }
 0x822   : > { %v7141_v4 = vpop.f32.mrb[80].mxu0 }
 0x823   : > { %v7143_v6 = vpop.f32.mrb[81].mxu0 }
 0x824   : > { %v7145_v13 = vpop.f32.mrb[82].mxu0 }
 0x825   : > { %v2706_v24 = vpack.c.bf16 %v7145_v13, %v7141_v4  ;;  %v7149_v55 = vpop.f32.mrb[83].mxu0  ;;  %v2650_v13 = vld [vmem:[%s6360_s20 + $0x10] sm:$0xff] }
 0x826   : > { %v2704_v26 = vpack.c.bf16 %v7149_v55, %v7143_v6 }
 0x82a   : > { %v7153_v42 = vpop.f32.mrb[84].mxu0 }
 0x82b   : > { %v7155_v52 = vpop.f32.mrb[85].mxu0 }
 0x82c   : > { %v7157_v50 = vpop.f32.mrb[86].mxu0 }
 0x82d   : > { %v2710_v5 = vpack.c.bf16 %v7157_v50, %v7153_v42  ;;  %v7161_v37 = vpop.f32.mrb[87].mxu0  ;;  %v2651_v42 = vld [vmem:[%s6360_s20 + $0x18] sm:$0xff] }
 0x82e   : > { %v2708_v59 = vpack.c.bf16 %v7161_v37, %v7155_v52 }
 0x842   : > { %v5160_v7 = vpop.f32.mrb[88].mxu0 }
 0x843   : > { %v2440_v40 = vpop.f32.mrb[89].mxu0  ;;  %v2477_v54 = vsel %vm1636_vm0, %v5160_v7, -inf }
 0x844   : > { %v5161_v1 = vpop.f32.mrb[90].mxu0  ;;  %v2471_v21 = vsel %vm1636_vm0, %v2440_v40, -inf }
 0x845   : > { %2472 = vmax.xlane.f32.xlu0 %v2471_v21  ;;  %v2443_v30 = vpop.f32.mrb[91].mxu0  ;;  %v2480_v15 = vsel %vm1636_vm0, %v5161_v1, -inf }
 0x846   : > { %v2474_v60 = vsel %vm1636_vm0, %v2443_v30, -inf }
 0x847   : > { %2475 = vmax.xlane.f32.xlu1 %v2474_v60 }
 0x849   : > { %2478 = vmax.xlane.f32.xlu0 %v2477_v54 }
 0x84a   : > { %v5164_v48 = vpop.f32.mrb[92].mxu0 }
 0x84b   : > { %2481 = vmax.xlane.f32.xlu1 %v2480_v15  ;;  %v2456_v44 = vpop.f32.mrb[93].mxu0  ;;  %v2489_v25 = vsel %vm1636_vm0, %v5164_v48, -inf }
 0x84c   : > { %v5165_v16 = vpop.f32.mrb[94].mxu0  ;;  %v2483_v45 = vsel %vm1636_vm0, %v2456_v44, -inf }
 0x84d   : > { %2484 = vmax.xlane.f32.xlu0 %v2483_v45  ;;  %v2459_v18 = vpop.f32.mrb[95].mxu0  ;;  %v2492_v28 = vsel %vm1636_vm0, %v5165_v16, -inf }
 0x84e   : > { %v2486_v36 = vsel %vm1636_vm0, %v2459_v18, -inf }
 0x84f   : > { %2487 = vmax.xlane.f32.xlu1 %v2486_v36 }
 0x851   : > { %2490 = vmax.xlane.f32.xlu0 %v2489_v25 }
 0x853   : > { %2493 = vmax.xlane.f32.xlu1 %v2492_v28 }
 0x8d2   : > { %v2473_v2 = vpop.xlane.xlu0 %2472 }
 0x8d3   : > { %v2495_v29 = vsub.f32 %v2440_v40, %v2473_v2 }
 0x8d4   : > { %v2476_v17 = vpop.xlane.xlu1 %2475 }
 0x8d5   : > { %v2503_v47 = vmul.f32 1.442695, %v2495_v29  ;;  %v2496_v62 = vsub.f32 %v2443_v30, %v2476_v17 }
 0x8d6   : > { %v2479_v12 = vpop.xlane.xlu0 %2478 }
 0x8d7   : > { %5586 = vpow2.f32 %v2503_v47  ;;  %v2505_v53 = vmul.f32 1.442695, %v2496_v62  ;;  %v2497_v0 = vsub.f32 %v5160_v7, %v2479_v12 }
 0x8d8   : > { %v2482_v22 = vpop.xlane.xlu1 %2481 }
 0x8d9   : > { %5588 = vpow2.f32 %v2505_v53  ;;  %v2507_v56 = vmul.f32 1.442695, %v2497_v0  ;;  %v2498_v8 = vsub.f32 %v5161_v1, %v2482_v22 }
 0x8da   : > { %v2485_v21 = vpop.xlane.xlu0 %2484 }
 0x8db   : > { %5590 = vpow2.f32 %v2507_v56  ;;  %v2509_v60 = vmul.f32 1.442695, %v2498_v8  ;;  %v2499_v54 = vsub.f32 %v2456_v44, %v2485_v21 }
 0x8dc   : > { %v2488_v15 = vpop.xlane.xlu1 %2487 }
 0x8dd   : > { %5592 = vpow2.f32 %v2509_v60  ;;  %v2511_v45 = vmul.f32 1.442695, %v2499_v54  ;;  %v2500_v36 = vsub.f32 %v2459_v18, %v2488_v15  ;;  %v5362_v54 = vld [vmem:[#allocation10 + $0x40] sm:$0xff]  }
 0x8de   : > { %v2491_v40 = vpop.xlane.xlu0 %2490  ;;  %4862 = vmatprep.subr.bf16.mxu1 %v5362_v54  ;;  %v5363_v54 = vld [vmem:[#allocation10] sm:$0xff]  }
 0x8df   : > { %5594 = vpow2.f32 %v2511_v45  ;;  %v2513_v25 = vmul.f32 1.442695, %v2500_v36  ;;  %v2501_v30 = vsub.f32 %v5164_v48, %v2491_v40 }
 0x8e0   : > { %v2494_v28 = vpop.xlane.xlu1 %2493 }
 0x8e1   : > { %v5587_v2 = vpop.eup %5586  ;;  %5596 = vpow2.f32 %v2513_v25  ;;  %v2515_v7 = vmul.f32 1.442695, %v2501_v30  ;;  %v2502_v29 = vsub.f32 %v5165_v16, %v2494_v28 }
 0x8e2   : > { %v2519_v17 = vsel %vm1636_vm0, %v5587_v2, 0.0 }
 0x8e3   : > { %v5589_v1 = vpop.eup %5588  ;;  %5598 = vpow2.f32 %v2515_v7  ;;  %v2517_v47 = vmul.f32 1.442695, %v2502_v29  ;;  %2520 = vadd.xlane.f32.xlu0 %v2519_v17 }
 0x8e4   : > { %v2522_v44 = vsel %vm1636_vm0, %v5589_v1, 0.0 }
 0x8e5   : > { %v5591_v62 = vpop.eup %5590  ;;  %5600 = vpow2.f32 %v2517_v47  ;;  %2523 = vadd.xlane.f32.xlu1 %v2522_v44 }
 0x8e6   : > { %v2525_v18 = vsel %vm1636_vm0, %v5591_v62, 0.0 }
 0x8e7   : > { %v5593_v12 = vpop.eup %5592  ;;  %2526 = vadd.xlane.f32.xlu0 %v2525_v18 }
 0x8e8   : > { %v2528_v48 = vsel %vm1636_vm0, %v5593_v12, 0.0 }
 0x8e9   : > { %v5595_v53 = vpop.eup %5594  ;;  %2529 = vadd.xlane.f32.xlu1 %v2528_v48 }
 0x8ea   : > { %v2531_v16 = vsel %vm1636_vm0, %v5595_v53, 0.0 }
 0x8eb   : > { %v5597_v0 = vpop.eup %5596  ;;  %2532 = vadd.xlane.f32.xlu0 %v2531_v16 }
 0x8ec   : > { %v2534_v22 = vsel %vm1636_vm0, %v5597_v0, 0.0 }
 0x8ed   : > { %v5599_v56 = vpop.eup %5598  ;;  %2535 = vadd.xlane.f32.xlu1 %v2534_v22 }
 0x8ee   : > { %v2537_v8 = vsel %vm1636_vm0, %v5599_v56, 0.0 }
 0x8ef   : > { %v5601_v21 = vpop.eup %5600  ;;  %2538 = vadd.xlane.f32.xlu0 %v2537_v8 }
 0x8f0   : > { %v2540_v60 = vsel %vm1636_vm0, %v5601_v21, 0.0 }
 0x8f1   : > { %2541 = vadd.xlane.f32.xlu1 %v2540_v60 }
 0x970   : > { %v2521_v15 = vpop.xlane.xlu0 %2520 }
 0x971   : > { %5602 = vrcp.f32 %v2521_v15 }
 0x972   : > { %v2524_v45 = vpop.xlane.xlu1 %2523 }
 0x973   : > { %5604 = vrcp.f32 %v2524_v45  ;;  %v5364_v45 = vld [vmem:[#allocation10 + $0x48] sm:$0xff]  }
 0x974   : > { %v2527_v36 = vpop.xlane.xlu0 %2526 }
 0x975   : > { %5606 = vrcp.f32 %v2527_v36 }
 0x976   : > { %v2530_v40 = vpop.xlane.xlu1 %2529 }
 0x977   : > { %5608 = vrcp.f32 %v2530_v40 }
 0x978   : > { %v2533_v25 = vpop.xlane.xlu0 %2532 }
 0x979   : > { %5610 = vrcp.f32 %v2533_v25 }
 0x97a   : > { %v2536_v30 = vpop.xlane.xlu1 %2535 }
 0x97b   : > { %v5603_v28 = vpop.eup %5602  ;;  %5612 = vrcp.f32 %v2536_v30 }
 0x97c   : > { %v2539_v7 = vpop.xlane.xlu0 %2538  ;;  %v2551_v47 = vmul.f32 %v5603_v28, %v5587_v2  ;;  %v5365_v2 = vld [vmem:[#allocation10 + $0x8] sm:$0xff]   ;;  %v5366_v28 = vld [vmem:[#allocation10 + $0x50] sm:$0xff]  }
 0x97d   : > { %v5605_v29 = vpop.eup %5604  ;;  %5614 = vrcp.f32 %v2539_v7 }
 0x97e   : > { %v2542_v17 = vpop.xlane.xlu1 %2541  ;;  %v2552_v44 = vmul.f32 %v5605_v29, %v5589_v1  ;;  %v5367_v29 = vld [vmem:[#allocation10 + $0x10] sm:$0xff]  }
 0x97f   : > { %v5607_v18 = vpop.eup %5606  ;;  %5616 = vrcp.f32 %v2542_v17 }
 0x980   : > { %v2559_v48 = vpack.c.bf16 %v2552_v44, %v2551_v47  ;;  %v2553_v22 = vmul.f32 %v5607_v18, %v5591_v62  ;;  %v5368_v47 = vld [vmem:[#allocation10 + $0x58] sm:$0xff]   ;;  %v5371_v44 = vld [vmem:[#allocation10 + $0x20] sm:$0xff]   ;;  %v5374_v18 = vld [vmem:[#allocation10 + $0x70] sm:$0xff]  }
 0x981   : > { %v5609_v16 = vpop.eup %5608 }
 0x982   : > { %v2554_v8 = vmul.f32 %v5609_v16, %v5593_v12  ;;  %5174 = vmatprep.mubr.msk.bf16.mxu1 %vm1636_vm0, %v2559_v48  ;;  %v5375_v48 = vld [vmem:[#allocation10 + $0x30] sm:$0xff]   ;;  %v5376_v16 = vld [vmem:[#allocation10 + $0x78] sm:$0xff]  }
 0x983   : > { %v5611_v60 = vpop.eup %5610 }
 0x984   : > { %v2560_v15 = vpack.c.bf16 %v2554_v8, %v2553_v22  ;;  %v2555_v40 = vmul.f32 %v5611_v60, %v5595_v53  ;;  %v5369_v53 = vld [vmem:[#allocation10 + $0x18] sm:$0xff]  }
 0x985   : > { %v5613_v36 = vpop.eup %5612  ;;  %v5377_v22 = vld [vmem:[#allocation10 + $0x38] sm:$0xff]  }
 0x986   : > { %5175 = vmatmul.mubr.msk.bf16.vlgmr.msra.gmra.mrb[56].mxu1 %vm1636_vm0, %v2560_v15  ;;  %v2556_v25 = vmul.f32 %v5613_v36, %v5597_v0  ;;  %v5370_v0 = vld [vmem:[#allocation10 + $0x60] sm:$0xff]  }
 0x987   : > { %v5615_v30 = vpop.eup %5614  ;;  %4863 = vmatpush3.bf16.msra.mxu1 %v5363_v54  ;;  %v2652_v54 = vld [vmem:[%s6360_s20 + $0x20] sm:$0xff] }
 0x988   : > { %4864 = vmatprep.subr.bf16.mxu1 %v5364_v45  ;;  %v2561_v1 = vpack.c.bf16 %v2556_v25, %v2555_v40  ;;  %v2557_v62 = vmul.f32 %v5615_v30, %v5599_v56  ;;  %v5372_v56 = vld [vmem:[#allocation10 + $0x68] sm:$0xff]  }
 0x989   : > { %v5617_v7 = vpop.eup %5616  ;;  %v2653_v40 = vld [vmem:[%s6360_s20 + $0x28] sm:$0xff] }
 0x98a   : > { %5178 = vmatprep.mubr.msk.bf16.mxu1 %vm1636_vm0, %v2561_v1  ;;  %v2558_v12 = vmul.f32 %v5617_v7, %v5601_v21  ;;  %v5373_v21 = vld [vmem:[#allocation10 + $0x28] sm:$0xff]  }
 0x98b   : > { %4865 = vmatpush3.bf16.msra.mxu1 %v5365_v2 }
 0x98c   : > { %4866 = vmatprep.subr.bf16.mxu1 %v5366_v28  ;;  %v2562_v17 = vpack.c.bf16 %v2558_v12, %v2557_v62  ;;  %v2654_v12 = vld [vmem:[%s6360_s20 + $0x30] sm:$0xff] }
 0x98e   : > { %5179 = vmatmul.mubr.msk.bf16.gmra.mrb[60].mxu1 %vm1636_vm0, %v2562_v17 }
 0x98f   : > { %4867 = vmatpush3.bf16.msra.mxu1 %v5367_v29  ;;  %2872 = vmatprep.mubr.bf16.mxu1 %v2697_v10  ;;  %v2649_v10 = vld [vmem:[%s6360_s20 + $0x8] sm:$0xff] }
 0x990   : > { %4868 = vmatprep.subr.bf16.mxu1 %v5368_v47 }
 0x993   : > { %4869 = vmatpush3.bf16.msra.mxu1 %v5369_v53  ;;  %v2655_v53 = vld [vmem:[%s6360_s20 + $0x38] sm:$0xff] }
 0x994   : > { %4870 = vmatprep.subr.bf16.mxu1 %v5370_v0 }
 0x997   : > { %4871 = vmatpush3.bf16.msra.mxu1 %v5371_v44 }
 0x998   : > { %4872 = vmatprep.subr.bf16.mxu1 %v5372_v56 }
 0x99b   : > { %4873 = vmatpush3.bf16.msra.mxu1 %v5373_v21 }
 0x99c   : > { %4874 = vmatprep.subr.bf16.mxu1 %v5374_v18 }
 0x99f   : > { %4875 = vmatpush3.bf16.msra.mxu1 %v5375_v48 }
 0x9a0   : > { %4876 = vmatprep.subr.bf16.mxu1 %v5376_v16 }
 0x9a3   : > { %4877 = vmatpush3.bf16.msra.mxu1 %v5377_v22  ;;  %v2656_v22 = vld [vmem:[%s6360_s20 + $0x40] sm:$0xff] }
 0x9a6   : > { %2873 = vmatmul.mubr.bf16.vlgmr.msra.gmra.mrb[64].mxu1 %v2696_v14 }
 0x9a7   : > { %2880 = vmatprep.mubr.bf16.mxu1 %v2699_v35 }
 0x9ae   : > { %2881 = vmatmul.mubr.bf16.gmra.mrb[68].mxu1 %v2698_v3 }
 0x9af   : > { %2888 = vmatprep.mubr.bf16.mxu1 %v2701_v58 }
 0x9b6   : > { %2889 = vmatmul.mubr.bf16.gmra.mrb[72].mxu1 %v2700_v41 }
 0x9b7   : > { %2896 = vmatprep.mubr.bf16.mxu1 %v2703_v51 }
 0x9be   : > { %2897 = vmatmul.mubr.bf16.gmra.mrb[76].mxu1 %v2702_v32 }
 0xa59   : > { %v5176_v38 = vpop.f32.mrb[56].mxu1 }
 0xa5a   : > { %v2609_v9 = vpop.f32.mrb[57].mxu1 }
 0xa5b   : > { %v5177_v34 = vpop.f32.mrb[58].mxu1 }
 0xa5c   : > { %v2707_v39 = vpack.c.bf16 %v5177_v34, %v5176_v38  ;;  %v2612_v3 = vpop.f32.mrb[59].mxu1 }
 0xa5d   : > { %v2705_v14 = vpack.c.bf16 %v2612_v3, %v2609_v9 }
 0xa5f   : > { %2904 = vmatprep.mubr.bf16.mxu1 %v2705_v14 }
 0xa60   : > { %2905 = vmatmul.mubr.bf16.gmra.mrb[80].mxu1 %v2704_v26 }
 0xa61   : > { %v5180_v33 = vpop.f32.mrb[60].mxu1  ;;  %2912 = vmatprep.mubr.bf16.mxu1 %v2707_v39  ;;  %v2657_v39 = vld [vmem:[%s6360_s20 + $0x48] sm:$0xff] }
 0xa62   : > { %v2625_v19 = vpop.f32.mrb[61].mxu1 }
 0xa63   : > { %v5181_v41 = vpop.f32.mrb[62].mxu1 }
 0xa64   : > { %v2711_v11 = vpack.c.bf16 %v5181_v41, %v5180_v33  ;;  %v2628_v31 = vpop.f32.mrb[63].mxu1 }
 0xa65   : > { %v2709_v43 = vpack.c.bf16 %v2628_v31, %v2625_v19 }
 0xa68   : > { %2913 = vmatmul.mubr.bf16.gmra.mrb[84].mxu1 %v2706_v24 }
 0xa69   : > { %2920 = vmatprep.mubr.bf16.mxu1 %v2709_v43  ;;  %v2658_v43 = vld [vmem:[%s6360_s20 + $0x50] sm:$0xff] }
 0xa70   : > { %2921 = vmatmul.mubr.bf16.gmra.mrb[88].mxu1 %v2708_v59 }
 0xa71   : > { %2928 = vmatprep.mubr.bf16.mxu1 %v2711_v11 }
 0xa78   : > { %2929 = vmatmul.mubr.bf16.gmra.mrb[92].mxu1 %v2710_v5 }
 0xa79   : > { %v4878_v32 = vpop.f32.mrb[64].mxu1  ;;  %3565 = vmatprep.mubr.bf16.mxu1 %v7963_v27 }
 0xa7a   : > { %v4879_v57 = vpop.f32.mrb[65].mxu1 }
 0xa7b   : > { %v4880_v35 = vadd.f32 %v4879_v57, %v4878_v32  ;;  %v4881_v61 = vpop.f32.mrb[66].mxu1 }
 0xa7c   : > { %v4882_v20 = vpop.f32.mrb[67].mxu1 }
 0xa7d   : > { %v2937_v46 = vadd.f32 %v4880_v35, %v2648_v23  ;;  %v4883_v51 = vadd.f32 %v4882_v20, %v4881_v61  ;;  %v2659_v35 = vld [vmem:[%s6360_s20 + $0x58] sm:$0xff] }
 0xa7f   : > { %v2938_v63 = vadd.f32 %v4883_v51, %v2649_v10  ;;  %v7230_v58 = vadd.f32 %v7227_v49, %v2937_v46 }
 0xa81   : > { %v4884_v4 = vpop.f32.mrb[68].mxu1  ;;  %2978 = vadd.xlane.f32.xlu0 %v7230_v58  ;;  %v7234_v6 = vadd.f32 %v7227_v49, %v2938_v63 }
 0xa82   : > { %v4885_v24 = vpop.f32.mrb[69].mxu1 }
 0xa83   : > { %v4886_v55 = vadd.f32 %v4885_v24, %v4884_v4  ;;  %v4887_v26 = vpop.f32.mrb[70].mxu1  ;;  %2980 = vadd.xlane.f32.xlu1 %v7234_v6 }
 0xa84   : > { %v4888_v52 = vpop.f32.mrb[71].mxu1 }
 0xa85   : > { %v2939_v50 = vadd.f32 %v4886_v55, %v2650_v13  ;;  %v4889_v5 = vadd.f32 %v4888_v52, %v4887_v26  ;;  %v2660_v13 = vld [vmem:[%s6360_s20 + $0x60] sm:$0xff] }
 0xa87   : > { %v2940_v37 = vadd.f32 %v4889_v5, %v2651_v42  ;;  %v7240_v59 = vadd.f32 %v7227_v49, %v2939_v50  ;;  %v2661_v42 = vld [vmem:[%s6360_s20 + $0x68] sm:$0xff] }
 0xa89   : > { %v4890_v8 = vpop.f32.mrb[72].mxu1  ;;  %2982 = vadd.xlane.f32.xlu0 %v7240_v59  ;;  %v7244_v60 = vadd.f32 %v7227_v49, %v2940_v37 }
 0xa8a   : > { %v4891_v15 = vpop.f32.mrb[73].mxu1 }
 0xa8b   : > { %v4892_v45 = vadd.f32 %v4891_v15, %v4890_v8  ;;  %v4893_v36 = vpop.f32.mrb[74].mxu1  ;;  %2984 = vadd.xlane.f32.xlu1 %v7244_v60 }
 0xa8c   : > { %v4894_v25 = vpop.f32.mrb[75].mxu1 }
 0xa8d   : > { %v2941_v30 = vadd.f32 %v4892_v45, %v2652_v54  ;;  %v4895_v2 = vadd.f32 %v4894_v25, %v4893_v36 }
 0xa8f   : > { %v2942_v1 = vadd.f32 %v4895_v2, %v2653_v40  ;;  %v7250_v28 = vadd.f32 %v7227_v49, %v2941_v30  ;;  %v2662_v40 = vld [vmem:[%s6360_s20 + $0x70] sm:$0xff] }
 0xa91   : > { %v4896_v7 = vpop.f32.mrb[76].mxu1  ;;  %2986 = vadd.xlane.f32.xlu0 %v7250_v28  ;;  %v7254_v62 = vadd.f32 %v7227_v49, %v2942_v1 }
 0xa92   : > { %v4897_v29 = vpop.f32.mrb[77].mxu1 }
 0xa93   : > { %v4898_v17 = vadd.f32 %v4897_v29, %v4896_v7  ;;  %v4899_v47 = vpop.f32.mrb[78].mxu1  ;;  %2988 = vadd.xlane.f32.xlu1 %v7254_v62 }
 0xa94   : > { %v4900_v0 = vpop.f32.mrb[79].mxu1 }
 0xa95   : > { %v2943_v44 = vadd.f32 %v4898_v17, %v2654_v12  ;;  %v4901_v56 = vadd.f32 %v4900_v0, %v4899_v47  ;;  %v2663_v12 = vld [vmem:[%s6360_s20 + $0x78] sm:$0xff]  ;;  %s7842_s20 = scalar_lea.hbm %s7988_s17, %s4797_s22 }
 0xa97   : > { %v2944_v21 = vadd.f32 %v4901_v56, %v2655_v53  ;;  %v7260_v18 = vadd.f32 %v7227_v49, %v2943_v44 }
 0xa99   : > { %2990 = vadd.xlane.f32.xlu0 %v7260_v18  ;;  %v7264_v48 = vadd.f32 %v7227_v49, %v2944_v21 }
 0xa9b   : > { %2992 = vadd.xlane.f32.xlu1 %v7264_v48 }
 0xb0e   : > { %v2979_v54 = vpop.xlane.xlu0 %2978 }
 0xb0f   : > { %v3010_v30 = vmul.f32 0.0078125, %v2979_v54  ;;  %v5384_v54 = vld [vmem:[#allocation12 + $0x20] ss:$16 sps:$4 sm:$0xff]  }
 0xb10   : > { %v2981_v36 = vpop.xlane.xlu1 %2980 }
 0xb11   : > { %v3011_v17 = vmul.f32 0.0078125, %v2981_v36  ;;  %v7300_v44 = vsub.f32 %v7230_v58, %v3010_v30  ;;  %v5390_v30 = vld [vmem:[#allocation12 + $0x40] ss:$16 sps:$4 sm:$0xff]  }
 0xb16   : > { %v2983_v7 = vpop.xlane.xlu0 %2982 }
 0xb17   : > { %v3012_v56 = vmul.f32 0.0078125, %v2983_v7  ;;  %v5401_v7 = vld [vmem:[#allocation12 + $0x6c] ss:$16 sps:$4 sm:$0xff]  }
 0xb18   : > { %v2985_v0 = vpop.xlane.xlu1 %2984 }
 0xb33   : > { %v4902_v16 = vpop.f32.mrb[80].mxu1 }
 0xb34   : > { %v4903_v38 = vpop.f32.mrb[81].mxu1 }
 0xb35   : > { %v4904_v9 = vadd.f32 %v4903_v38, %v4902_v16  ;;  %v4905_v34 = vpop.f32.mrb[82].mxu1  ;;  %v7306_v38 = vsub.f32 %v7234_v6, %v3011_v17  ;;  %v5404_v17 = vld [vmem:[#allocation12 + $0x84] ss:$16 sps:$4 sm:$0xff]  }
 0xb36   : > { %v4906_v3 = vpop.f32.mrb[83].mxu1 }
 0xb37   : > { %v2945_v14 = vadd.f32 %v4904_v9, %v2656_v22  ;;  %v4907_v33 = vadd.f32 %v4906_v3, %v4905_v34  ;;  %v2987_v22 = vpop.xlane.xlu0 %2986  ;;  %v3013_v9 = vmul.f32 0.0078125, %v2985_v0  ;;  %v7313_v3 = vsub.f32 %v7240_v59, %v3012_v56  ;;  %v5405_v0 = vld [vmem:[#allocation12 + $0x88] ss:$16 sps:$4 sm:$0xff]   ;;  %v5410_v56 = vld [vmem:[#allocation12 + $0xa4] ss:$16 sps:$4 sm:$0xff]  }
 0xb39   : > { %v2946_v19 = vadd.f32 %v4907_v33, %v2657_v39  ;;  %v7270_v41 = vadd.f32 %v7227_v49, %v2945_v14  ;;  %v2989_v39 = vpop.xlane.xlu1 %2988  ;;  %v3014_v14 = vmul.f32 0.0078125, %v2987_v22  ;;  %v3042_v33 = vmul.f32 %v7300_v44, %v7300_v44  ;;  %v5408_v22 = vld [vmem:[#allocation12 + $0xa0] ss:$16 sps:$4 sm:$0xff]  }
 0xb3b   : > { %7964 = vst [vmem:[#allocation22_spill] sm:$0xff] %v7270_v41  ;;  %v4908_v11 = vpop.f32.mrb[84].mxu1  ;;  %2994 = vadd.xlane.f32.xlu0 %v7270_v41  ;;  %v7274_v31 = vadd.f32 %v7227_v49, %v2946_v19  ;;  %v2991_v19 = vpop.xlane.xlu0 %2990 }
 0xb3c   : > { %v4909_v32 = vpop.f32.mrb[85].mxu1 }
 0xb3d   : > { %7965 = vst [vmem:[#allocation23_spill] sm:$0xff] %v7274_v31  ;;  %v4910_v23 = vadd.f32 %v4909_v32, %v4908_v11  ;;  %v4911_v57 = vpop.f32.mrb[86].mxu1  ;;  %2996 = vadd.xlane.f32.xlu1 %v7274_v31  ;;  %v7319_v11 = vsub.f32 %v7244_v60, %v3013_v9  ;;  %v2993_v32 = vpop.xlane.xlu1 %2992  ;;  %v5411_v9 = vld [vmem:[#allocation12 + $0xa8] ss:$16 sps:$4 sm:$0xff]  }
 0xb3e   : > { %v4912_v61 = vpop.f32.mrb[87].mxu1 }
 0xb3f   : > { %v2947_v10 = vadd.f32 %v4910_v23, %v2658_v43  ;;  %v4913_v20 = vadd.f32 %v4912_v61, %v4911_v57  ;;  %v3015_v43 = vmul.f32 0.0078125, %v2989_v39  ;;  %v7324_v23 = vsub.f32 %v7250_v28, %v3014_v14  ;;  %v5416_v39 = vld [vmem:[#allocation12 + $0xc4] ss:$16 sps:$4 sm:$0xff]   ;;  %v5419_v14 = vld [vmem:[#allocation12 + $0xcc] ss:$16 sps:$4 sm:$0xff]  }
 0xb40   : > { %v3016_v57 = vmul.f32 0.0078125, %v2991_v19  ;;  %v5417_v19 = vld [vmem:[#allocation12 + $0xc8] ss:$16 sps:$4 sm:$0xff]  }
 0xb41   : > { %v2948_v46 = vadd.f32 %v4913_v20, %v2659_v35  ;;  %v7280_v51 = vadd.f32 %v7227_v49, %v2947_v10  ;;  %v3044_v35 = vmul.f32 %v7313_v3, %v7313_v3  ;;  %v7329_v61 = vsub.f32 %v7254_v62, %v3015_v43  ;;  %v5420_v43 = vld [vmem:[#allocation12 + $0xe0] ss:$16 sps:$4 sm:$0xff]  }
 0xb42   : > { %v3017_v10 = vmul.f32 0.0078125, %v2993_v32  ;;  %v3045_v20 = vmul.f32 %v7319_v11, %v7319_v11  ;;  %v5423_v32 = vld [vmem:[#allocation12 + $0xe8] ss:$16 sps:$4 sm:$0xff]  }
 0xb43   : > { %7966 = vst [vmem:[#allocation24_spill] sm:$0xff] %v7280_v51  ;;  %2998 = vadd.xlane.f32.xlu0 %v7280_v51  ;;  %v4914_v63 = vpop.f32.mrb[88].mxu1  ;;  %v7284_v4 = vadd.f32 %v7227_v49, %v2948_v46  ;;  %v7334_v46 = vsub.f32 %v7260_v18, %v3016_v57  ;;  %v5425_v57 = vld [vmem:[#allocation12 + $0xec] ss:$16 sps:$4 sm:$0xff]  }
 0xb44   : > { %v4915_v24 = vpop.f32.mrb[89].mxu1 }
 0xb45   : > { %7967 = vst [vmem:[#allocation25_spill] sm:$0xff] %v7284_v4  ;;  %v4916_v55 = vadd.f32 %v4915_v24, %v4914_v63  ;;  %3000 = vadd.xlane.f32.xlu1 %v7284_v4  ;;  %v4917_v26 = vpop.f32.mrb[90].mxu1  ;;  %v3046_v63 = vmul.f32 %v7324_v23, %v7324_v23  ;;  %v5380_v24 = vld [vmem:[#allocation12 + $0x4] ss:$16 sps:$4 sm:$0xff]  }
 0xb46   : > { %v4918_v52 = vpop.f32.mrb[91].mxu1  ;;  %3420 = vmatprep.subr.bf16.mxu0 %v5380_v24 }
 0xb47   : > { %v2949_v50 = vadd.f32 %v4916_v55, %v2660_v13  ;;  %v4919_v5 = vadd.f32 %v4918_v52, %v4917_v26  ;;  %v5378_v13 = vld [vmem:[#allocation12] ss:$16 sps:$4 sm:$0xff]   ;;  %v5381_v55 = vld [vmem:[#allocation12 + $0x8] ss:$16 sps:$4 sm:$0xff]   ;;  %v5383_v26 = vld [vmem:[#allocation12 + $0xc] ss:$16 sps:$4 sm:$0xff]   ;;  %v3047_v52 = vmul.f32 %v7329_v61, %v7329_v61 }
 0xb48   : > { %3533 = vmatprep.subr.bf16.mxu1 %v5383_v26  ;;  %3421 = vmatpush1.bf16.msra.mxu0 %v5378_v13 }
 0xb49   : > { %v2950_v37 = vadd.f32 %v4919_v5, %v2661_v42  ;;  %v7290_v8 = vadd.f32 %v7227_v49, %v2949_v50  ;;  %v7339_v42 = vsub.f32 %v7264_v48, %v3017_v10  ;;  %v3048_v50 = vmul.f32 %v7334_v46, %v7334_v46  ;;  %3534 = vmatpush1.bf16.msra.mxu1 %v5381_v55  ;;  %v5386_v5 = vld [vmem:[#allocation12 + $0x24] ss:$16 sps:$4 sm:$0xff]  }
 0xb4a   : > { %3422 = vmatprep.subr.bf16.mxu0 %v5386_v5 }
 0xb4b   : > { %7968 = vst [vmem:[#allocation26_spill] sm:$0xff] %v7290_v8  ;;  %v4920_v15 = vpop.f32.mrb[92].mxu1  ;;  %3002 = vadd.xlane.f32.xlu0 %v7290_v8  ;;  %v7294_v45 = vadd.f32 %v7227_v49, %v2950_v37  ;;  %v5389_v37 = vld [vmem:[#allocation12 + $0x2c] ss:$16 sps:$4 sm:$0xff]   ;;  %v3049_v36 = vmul.f32 %v7339_v42, %v7339_v42 }
 0xb4c   : > { %v4921_v25 = vpop.f32.mrb[93].mxu1  ;;  %3535 = vmatprep.subr.bf16.mxu1 %v5389_v37  ;;  %3423 = vmatpush1.bf16.msra.mxu0 %v5384_v54 }
 0xb4d   : > { %7969 = vst [vmem:[#allocation27_spill] sm:$0xff] %v7294_v45  ;;  %v4922_v2 = vadd.f32 %v4921_v25, %v4920_v15  ;;  %v4923_v1 = vpop.f32.mrb[94].mxu1  ;;  %3004 = vadd.xlane.f32.xlu1 %v7294_v45  ;;  %v5387_v15 = vld [vmem:[#allocation12 + $0x28] ss:$16 sps:$4 sm:$0xff]   ;;  %v5395_v25 = vld [vmem:[#allocation12 + $0x4c] ss:$16 sps:$4 sm:$0xff]  }
 0xb4e   : > { %v4924_v29 = vpop.f32.mrb[95].mxu1  ;;  %3536 = vmatpush1.bf16.msra.mxu1 %v5387_v15 }
 0xb4f   : > { %v2951_v47 = vadd.f32 %v4922_v2, %v2662_v40  ;;  %v4925_v53 = vadd.f32 %v4924_v29, %v4923_v1  ;;  %v5392_v40 = vld [vmem:[#allocation12 + $0x44] ss:$16 sps:$4 sm:$0xff]   ;;  %v5393_v2 = vld [vmem:[#allocation12 + $0x48] ss:$16 sps:$4 sm:$0xff]   ;;  %3537 = vmatprep.subr.bf16.mxu1 %v5395_v25 }
 0xb50   : > { %3424 = vmatprep.subr.bf16.mxu0 %v5392_v40  ;;  %v5398_v1 = vld [vmem:[#allocation12 + $0x64] ss:$16 sps:$4 sm:$0xff]   ;;  %v5399_v29 = vld [vmem:[#allocation12 + $0x68] ss:$16 sps:$4 sm:$0xff]  }
 0xb51   : > { %v2952_v21 = vadd.f32 %v4925_v53, %v2663_v12  ;;  %v7303_v16 = vadd.f32 %v7227_v49, %v2951_v47  ;;  %3425 = vmatpush1.bf16.msra.mxu0 %v5390_v30  ;;  %v5396_v12 = vld [vmem:[#allocation12 + $0x60] ss:$16 sps:$4 sm:$0xff]   ;;  %v5407_v47 = vld [vmem:[#allocation12 + $0x8c] ss:$16 sps:$4 sm:$0xff]  }
 0xb52   : > { %3538 = vmatpush1.bf16.msra.mxu1 %v5393_v2  ;;  %3426 = vmatprep.subr.bf16.mxu0 %v5398_v1  ;;  %v5402_v53 = vld [vmem:[#allocation12 + $0x80] ss:$16 sps:$4 sm:$0xff]  }
 0xb53   : > { %7970 = vst [vmem:[#allocation28_spill] sm:$0xff] %v7303_v16  ;;  %3006 = vadd.xlane.f32.xlu0 %v7303_v16  ;;  %v7310_v34 = vadd.f32 %v7227_v49, %v2952_v21  ;;  %v3043_v49 = vmul.f32 %v7306_v38, %v7306_v38  ;;  %3539 = vmatprep.subr.bf16.mxu1 %v5401_v7  ;;  %v5413_v21 = vld [vmem:[#allocation12 + $0xac] ss:$16 sps:$4 sm:$0xff]  }
 0xb55   : > { %7971 = vst [vmem:[#allocation29_spill] sm:$0xff] %v7310_v34  ;;  %3008 = vadd.xlane.f32.xlu1 %v7310_v34  ;;  %3427 = vmatpush1.bf16.msra.mxu0 %v5396_v12 }
 0xb56   : > { %3540 = vmatpush1.bf16.msra.mxu1 %v5399_v29  ;;  %3428 = vmatprep.subr.bf16.mxu0 %v5404_v17 }
 0xb57   : > { %3058 = vadd.xlane.f32.xlu0 %v3042_v33  ;;  %3541 = vmatprep.subr.bf16.mxu1 %v5407_v47  ;;  %v5414_v33 = vld [vmem:[#allocation12 + $0xc0] ss:$16 sps:$4 sm:$0xff]  }
 0xb59   : > { %3060 = vadd.xlane.f32.xlu1 %v3043_v49  ;;  %3429 = vmatpush1.bf16.msra.mxu0 %v5402_v53  ;;  %v5422_v49 = vld [vmem:[#allocation12 + $0xe4] ss:$16 sps:$4 sm:$0xff]  }
 0xb5a   : > { %3542 = vmatpush1.bf16.msra.mxu1 %v5405_v0  ;;  %3430 = vmatprep.subr.bf16.mxu0 %v5410_v56 }
 0xb5b   : > { %3062 = vadd.xlane.f32.xlu0 %v3044_v35  ;;  %3543 = vmatprep.subr.bf16.mxu1 %v5413_v21 }
 0xb5d   : > { %3064 = vadd.xlane.f32.xlu1 %v3045_v20  ;;  %3431 = vmatpush1.bf16.msra.mxu0 %v5408_v22 }
 0xb5e   : > { %3544 = vmatpush1.bf16.msra.mxu1 %v5411_v9  ;;  %3432 = vmatprep.subr.bf16.mxu0 %v5416_v39 }
 0xb5f   : > { %3066 = vadd.xlane.f32.xlu0 %v3046_v63  ;;  %3545 = vmatprep.subr.bf16.mxu1 %v5419_v14 }
 0xb61   : > { %3068 = vadd.xlane.f32.xlu1 %v3047_v52  ;;  %3433 = vmatpush1.bf16.msra.mxu0 %v5414_v33 }
 0xb62   : > { %3546 = vmatpush1.bf16.msra.mxu1 %v5417_v19  ;;  %3434 = vmatprep.subr.bf16.mxu0 %v5422_v49 }
 0xb63   : > { %3070 = vadd.xlane.f32.xlu0 %v3048_v50  ;;  %3547 = vmatprep.subr.bf16.mxu1 %v5425_v57 }
 0xb65   : > { %3072 = vadd.xlane.f32.xlu1 %v3049_v36  ;;  %3435 = vmatpush1.bf16.msra.mxu0 %v5420_v43 }
 0xb66   : > { %3548 = vmatpush1.bf16.msra.mxu1 %v5423_v32 }
 0xbc8   : > { %v2995_v35 = vpop.xlane.xlu0 %2994 }
 0xbc9   : > { %v3018_v10 = vmul.f32 0.0078125, %v2995_v35 }
 0xbca   : > { %v2997_v20 = vpop.xlane.xlu1 %2996 }
 0xbcb   : > { %v7348_v63 = vsub.f32 %v7270_v41, %v3018_v10  ;;  %v3019_v13 = vmul.f32 0.0078125, %v2997_v20 }
 0xbcd   : > { %v7351_v24 = vsub.f32 %v7274_v31, %v3019_v13  ;;  %v3050_v55 = vmul.f32 %v7348_v63, %v7348_v63 }
 0xbcf   : > { %3074 = vadd.xlane.f32.xlu0 %v3050_v55  ;;  %v3051_v26 = vmul.f32 %v7351_v24, %v7351_v24 }
 0xbd0   : > { %v2999_v52 = vpop.xlane.xlu0 %2998 }
 0xbd1   : > { %v3020_v50 = vmul.f32 0.0078125, %v2999_v52  ;;  %3076 = vadd.xlane.f32.xlu1 %v3051_v26 }
 0xbd2   : > { %v3001_v5 = vpop.xlane.xlu1 %3000 }
 0xbd3   : > { %v7358_v37 = vsub.f32 %v7280_v51, %v3020_v50  ;;  %v3021_v54 = vmul.f32 0.0078125, %v3001_v5 }
 0xbd5   : > { %v7361_v15 = vsub.f32 %v7284_v4, %v3021_v54  ;;  %v3052_v36 = vmul.f32 %v7358_v37, %v7358_v37 }
 0xbd7   : > { %3078 = vadd.xlane.f32.xlu0 %v3052_v36  ;;  %v3053_v40 = vmul.f32 %v7361_v15, %v7361_v15 }
 0xbd8   : > { %v3003_v25 = vpop.xlane.xlu0 %3002 }
 0xbd9   : > { %v3022_v30 = vmul.f32 0.0078125, %v3003_v25  ;;  %3080 = vadd.xlane.f32.xlu1 %v3053_v40 }
 0xbda   : > { %v3005_v2 = vpop.xlane.xlu1 %3004 }
 0xbdb   : > { %v7368_v1 = vsub.f32 %v7290_v8, %v3022_v30  ;;  %v3023_v7 = vmul.f32 0.0078125, %v3005_v2  ;;  %v7390_v2 = vld [vmem:[%s7898_s7] ss:$0 sm:$0xff] }
 0xbdd   : > { %v7371_v12 = vsub.f32 %v7294_v45, %v3023_v7  ;;  %v3054_v29 = vmul.f32 %v7368_v1, %v7368_v1 }
 0xbdf   : > { %3082 = vadd.xlane.f32.xlu0 %v3054_v29  ;;  %v3055_v17 = vmul.f32 %v7371_v12, %v7371_v12 }
 0xbe0   : > { %v3007_v47 = vpop.xlane.xlu0 %3006 }
 0xbe1   : > { %v3024_v53 = vmul.f32 0.0078125, %v3007_v47  ;;  %3084 = vadd.xlane.f32.xlu1 %v3055_v17 }
 0xbe2   : > { %v3009_v0 = vpop.xlane.xlu1 %3008 }
 0xbe3   : > { %v7378_v56 = vsub.f32 %v7303_v16, %v3024_v53  ;;  %v3025_v21 = vmul.f32 0.0078125, %v3009_v0 }
 0xbe4   : > { %v3059_v22 = vpop.xlane.xlu0 %3058 }
 0xbe5   : > { %v7381_v9 = vsub.f32 %v7310_v34, %v3025_v21  ;;  %v3090_v39 = vmul.f32 0.0078125, %v3059_v22  ;;  %v3056_v14 = vmul.f32 %v7378_v56, %v7378_v56 }
 0xbe6   : > { %v3061_v33 = vpop.xlane.xlu1 %3060 }
 0xbe7   : > { %v3106_v19 = vadd.f32 1e-05, %v3090_v39  ;;  %v3091_v43 = vmul.f32 0.0078125, %v3061_v33  ;;  %3086 = vadd.xlane.f32.xlu0 %v3056_v14  ;;  %v3057_v49 = vmul.f32 %v7381_v9, %v7381_v9  ;;  %v7398_v39 = vld [vmem:[%s7899_s8] ss:$0 sm:$0xff] }
 0xbe8   : > { %v3063_v32 = vpop.xlane.xlu0 %3062 }
 0xbe9   : > { %5618 = vrsqrt.f32 %v3106_v19  ;;  %v3107_v57 = vadd.f32 1e-05, %v3091_v43  ;;  %v3092_v35 = vmul.f32 0.0078125, %v3063_v32  ;;  %3088 = vadd.xlane.f32.xlu1 %v3057_v49 }
 0xbea   : > { %v3065_v10 = vpop.xlane.xlu1 %3064 }
 0xbeb   : > { %5620 = vrsqrt.f32 %v3107_v57  ;;  %v3108_v20 = vadd.f32 1e-05, %v3092_v35  ;;  %v3093_v13 = vmul.f32 0.0078125, %v3065_v10 }
 0xbec   : > { %v3067_v55 = vpop.xlane.xlu0 %3066 }
 0xbed   : > { %5622 = vrsqrt.f32 %v3108_v20  ;;  %v3109_v26 = vadd.f32 1e-05, %v3093_v13  ;;  %v3094_v52 = vmul.f32 0.0078125, %v3067_v55 }
 0xbee   : > { %v3069_v50 = vpop.xlane.xlu1 %3068 }
 0xbef   : > { %5624 = vrsqrt.f32 %v3109_v26  ;;  %v3095_v5 = vmul.f32 0.0078125, %v3069_v50  ;;  %v3110_v54 = vadd.f32 1e-05, %v3094_v52 }
 0xbf0   : > { %v3071_v40 = vpop.xlane.xlu0 %3070 }
 0xbf1   : > { %v3111_v36 = vadd.f32 1e-05, %v3095_v5  ;;  %v3096_v47 = vmul.f32 0.0078125, %v3071_v40 }
 0xbf2   : > { %v3073_v25 = vpop.xlane.xlu1 %3072 }
 0xbf3   : > { %v5619_v30 = vpop.eup %5618  ;;  %5626 = vrsqrt.f32 %v3111_v36  ;;  %v3097_v7 = vmul.f32 0.0078125, %v3073_v25  ;;  %v3112_v19 = vadd.f32 1e-05, %v3096_v47  ;;  %v5428_v47 = vld [vmem:[#allocation13] sm:$0xff]  }
 0xbf4   : > { %v3138_v29 = vmul.f32 %v5619_v30, %v7300_v44  ;;  %5628 = vrsqrt.f32 %v3110_v54 }
 0xbf5   : > { %v5621_v17 = vpop.eup %5620  ;;  %v3113_v22 = vadd.f32 1e-05, %v3097_v7 }
 0xbf6   : > { %v3160_v53 = vmul.f32 %v7390_v2, %v3138_v29  ;;  %v3139_v0 = vmul.f32 %v5621_v17, %v7306_v38  ;;  %v5426_v29 = vld [vmem:[#allocation13 + $0x40] sm:$0xff]  }
 0xbf7   : > { %v5623_v21 = vpop.eup %5622  ;;  %5630 = vrsqrt.f32 %v3113_v22  ;;  %v5427_v17 = vld [vmem:[#allocation13 + $0xc0] sm:$0xff]   ;;  %4926 = vmatprep.subr.bf16.mxu0 %v5426_v29  ;;  %v5433_v22 = vld [vmem:[#allocation13 + $0x88] sm:$0xff]  }
 0xbf8   : > { %v3161_v14 = vmul.f32 %v7390_v2, %v3139_v0  ;;  %v3182_v44 = vadd.f32 %v7398_v39, %v3160_v53  ;;  %v3140_v49 = vmul.f32 %v5623_v21, %v7313_v3  ;;  %5632 = vrsqrt.f32 %v3112_v19  ;;  %v5429_v53 = vld [vmem:[#allocation13 + $0x80] sm:$0xff]   ;;  %v5431_v0 = vld [vmem:[#allocation13 + $0xc8] sm:$0xff]   ;;  %4990 = vmatprep.subr.bf16.mxu1 %v5427_v17  ;;  %v5434_v19 = vld [vmem:[#allocation13 + $0x50] sm:$0xff]  }
 0xbf9   : > { %v5625_v33 = vpop.eup %5624 }
 0xbfa   : > { %v3183_v43 = vadd.f32 %v7398_v39, %v3161_v14  ;;  %v3141_v32 = vmul.f32 %v5625_v33, %v7319_v11  ;;  %v3162_v10 = vmul.f32 %v7390_v2, %v3140_v49  ;;  %v5437_v49 = vld [vmem:[#allocation13 + $0x90] sm:$0xff]  }
 0xbfc   : > { %v3198_v38 = vpack.c.bf16 %v3183_v43, %v3182_v44  ;;  %v3163_v57 = vmul.f32 %v7390_v2, %v3141_v32  ;;  %v3184_v11 = vadd.f32 %v7398_v39, %v3162_v10  ;;  %v5435_v44 = vld [vmem:[#allocation13 + $0xd0] sm:$0xff]   ;;  %v5438_v32 = vld [vmem:[#allocation13 + $0x58] sm:$0xff]  }
 0xbfd   : > { %v5627_v35 = vpop.eup %5626  ;;  %v5436_v43 = vld [vmem:[#allocation13 + $0x10] sm:$0xff]  }
 0xbfe   : > { %3453 = vmatmul.mubr.bf16.vlgmr.msra.gmra.mrb[96].mxu0 %v3198_v38  ;;  %3566 = vmatmul.mubr.bf16.vlgmr.msra.gmra.mrb[96].mxu1 %v3198_v38  ;;  %v5629_v20 = vpop.eup %5628  ;;  %v3185_v13 = vadd.f32 %v7398_v39, %v3163_v57  ;;  %v3143_v3 = vmul.f32 %v5627_v35, %v7329_v61  ;;  %v5439_v38 = vld [vmem:[#allocation13 + $0xd8] sm:$0xff]  }
 0xbff   : > { %3462 = vmatprep.mubr.bf16.mxu0 %v7963_v27  ;;  %3575 = vmatprep.mubr.bf16.mxu1 %v7963_v27  ;;  %v3142_v55 = vmul.f32 %v5629_v20, %v7324_v23  ;;  %v5440_v57 = vld [vmem:[#allocation13 + $0x18] sm:$0xff]  }
 0xc00   : > { %v3199_v26 = vpack.c.bf16 %v3185_v13, %v3184_v11  ;;  %v3165_v52 = vmul.f32 %v7390_v2, %v3143_v3  ;;  %4927 = vmatpush3.bf16.msra.mxu0 %v5428_v47  ;;  %4991 = vmatpush3.bf16.msra.mxu1 %v5429_v53  ;;  %v5441_v35 = vld [vmem:[#allocation13 + $0x98] sm:$0xff]   ;;  %v5442_v13 = vld [vmem:[#allocation13 + $0x60] sm:$0xff]  }
 0xc01   : > { %v5631_v50 = vpop.eup %5630  ;;  %v3164_v5 = vmul.f32 %v7390_v2, %v3142_v55  ;;  %4992 = vmatprep.subr.bf16.mxu1 %v5431_v0  ;;  %v5443_v3 = vld [vmem:[#allocation13 + $0xe0] sm:$0xff]   ;;  %v5450_v0 = vld [vmem:[#allocation13 + $0x70] sm:$0xff]  }
 0xc02   : > { %v5633_v54 = vpop.eup %5632  ;;  %v3187_v36 = vadd.f32 %v7398_v39, %v3165_v52  ;;  %v3145_v61 = vmul.f32 %v5631_v50, %v7339_v42  ;;  %v5430_v42 = vld [vmem:[#allocation13 + $0x48] sm:$0xff]   ;;  %v5444_v52 = vld [vmem:[#allocation13 + $0x20] sm:$0xff]  }
 0xc03   : > { %v3186_v40 = vadd.f32 %v7398_v39, %v3164_v5  ;;  %v3144_v23 = vmul.f32 %v5633_v54, %v7334_v46  ;;  %v5432_v46 = vld [vmem:[#allocation13 + $0x8] sm:$0xff]   ;;  %4928 = vmatprep.subr.bf16.mxu0 %v5430_v42  ;;  %v5445_v50 = vld [vmem:[#allocation13 + $0xa0] sm:$0xff]  }
 0xc04   : > { %v3167_v30 = vmul.f32 %v7390_v2, %v3145_v61  ;;  %4929 = vmatpush3.bf16.msra.mxu0 %v5432_v46  ;;  %4993 = vmatpush3.bf16.msra.mxu1 %v5433_v22  ;;  %v5446_v54 = vld [vmem:[#allocation13 + $0x68] sm:$0xff]  }
 0xc05   : > { %v3200_v25 = vpack.c.bf16 %v3187_v36, %v3186_v40  ;;  %v3166_v7 = vmul.f32 %v7390_v2, %v3144_v23  ;;  %4930 = vmatprep.subr.bf16.mxu0 %v5434_v19  ;;  %4994 = vmatprep.subr.bf16.mxu1 %v5435_v44  ;;  %v5447_v36 = vld [vmem:[#allocation13 + $0xe8] sm:$0xff]  }
 0xc06   : > { %3463 = vmatmul.mubr.bf16.gmra.mrb[100].mxu0 %v3199_v26  ;;  %3576 = vmatmul.mubr.bf16.gmra.mrb[100].mxu1 %v3199_v26  ;;  %v3189_v21 = vadd.f32 %v7398_v39, %v3167_v30  ;;  %v5448_v40 = vld [vmem:[#allocation13 + $0x28] sm:$0xff]  }
 0xc07   : > { %3472 = vmatprep.mubr.bf16.mxu0 %v7963_v27  ;;  %3585 = vmatprep.mubr.bf16.mxu1 %v7963_v27  ;;  %v3188_v14 = vadd.f32 %v7398_v39, %v3166_v7  ;;  %v5449_v23 = vld [vmem:[#allocation13 + $0xa8] sm:$0xff]  }
 0xc08   : > { %4931 = vmatpush3.bf16.msra.mxu0 %v5436_v43  ;;  %4995 = vmatpush3.bf16.msra.mxu1 %v5437_v49  ;;  %v5452_v49 = vld [vmem:[#allocation13 + $0x30] sm:$0xff]  }
 0xc09   : > { %v3201_v33 = vpack.c.bf16 %v3189_v21, %v3188_v14  ;;  %4932 = vmatprep.subr.bf16.mxu0 %v5438_v32  ;;  %4996 = vmatprep.subr.bf16.mxu1 %v5439_v38  ;;  %v5451_v21 = vld [vmem:[#allocation13 + $0xf0] sm:$0xff]  }
 0xc0a   : > { %v5453_v32 = vld [vmem:[#allocation13 + $0xb0] sm:$0xff]  }
 0xc0c   : > { %4933 = vmatpush3.bf16.msra.mxu0 %v5440_v57  ;;  %4997 = vmatpush3.bf16.msra.mxu1 %v5441_v35 }
 0xc0d   : > { %4934 = vmatprep.subr.bf16.mxu0 %v5442_v13  ;;  %4998 = vmatprep.subr.bf16.mxu1 %v5443_v3  ;;  %v5456_v13 = vld [vmem:[#allocation13 + $0x38] sm:$0xff]  }
 0xc0e   : > { %3473 = vmatmul.mubr.bf16.gmra.mrb[104].mxu0 %v3200_v25  ;;  %3586 = vmatmul.mubr.bf16.gmra.mrb[104].mxu1 %v3200_v25  ;;  %v5457_v3 = vld [vmem:[#allocation13 + $0xb8] sm:$0xff]  }
 0xc0f   : > { %3482 = vmatprep.mubr.bf16.mxu0 %v7963_v27  ;;  %3595 = vmatprep.mubr.bf16.mxu1 %v7963_v27 }
 0xc10   : > { %4935 = vmatpush3.bf16.msra.mxu0 %v5444_v52  ;;  %4999 = vmatpush3.bf16.msra.mxu1 %v5445_v50 }
 0xc11   : > { %4936 = vmatprep.subr.bf16.mxu0 %v5446_v54  ;;  %5000 = vmatprep.subr.bf16.mxu1 %v5447_v36 }
 0xc14   : > { %4937 = vmatpush3.bf16.msra.mxu0 %v5448_v40  ;;  %5001 = vmatpush3.bf16.msra.mxu1 %v5449_v23 }
 0xc15   : > { %4938 = vmatprep.subr.bf16.mxu0 %v5450_v0  ;;  %5002 = vmatprep.subr.bf16.mxu1 %v5451_v21 }
 0xc16   : > { %3483 = vmatmul.mubr.bf16.gmra.mrb[108].mxu0 %v3201_v33  ;;  %3596 = vmatmul.mubr.bf16.gmra.mrb[108].mxu1 %v3201_v33 }
 0xc17   : > { %3492 = vmatprep.mubr.bf16.mxu0 %v7963_v27  ;;  %3605 = vmatprep.mubr.bf16.mxu1 %v7963_v27 }
 0xc18   : > { %4939 = vmatpush3.bf16.msra.mxu0 %v5452_v49  ;;  %5003 = vmatpush3.bf16.msra.mxu1 %v5453_v32 }
 0xc5c   : > { %v3075_v10 = vpop.xlane.xlu0 %3074 }
 0xc5d   : > { %v3098_v20 = vmul.f32 0.0078125, %v3075_v10  ;;  %v5454_v10 = vld [vmem:[#allocation13 + $0x78] sm:$0xff]  }
 0xc5e   : > { %v3077_v11 = vpop.xlane.xlu1 %3076  ;;  %4940 = vmatprep.subr.bf16.mxu0 %v5454_v10 }
 0xc5f   : > { %v3114_v55 = vadd.f32 1e-05, %v3098_v20  ;;  %v3099_v26 = vmul.f32 0.0078125, %v3077_v11  ;;  %4941 = vmatpush3.bf16.msra.mxu0 %v5456_v13 }
 0xc61   : > { %5634 = vrsqrt.f32 %v3114_v55  ;;  %v3115_v5 = vadd.f32 1e-05, %v3099_v26 }
 0xc63   : > { %5636 = vrsqrt.f32 %v3115_v5 }
 0xc64   : > { %v3079_v61 = vpop.xlane.xlu0 %3078 }
 0xc65   : > { %v3100_v25 = vmul.f32 0.0078125, %v3079_v61 }
 0xc66   : > { %v3081_v30 = vpop.xlane.xlu1 %3080 }
 0xc67   : > { %v3116_v7 = vadd.f32 1e-05, %v3100_v25  ;;  %v3101_v29 = vmul.f32 0.0078125, %v3081_v30 }
 0xc69   : > { %5638 = vrsqrt.f32 %v3116_v7  ;;  %v3117_v17 = vadd.f32 1e-05, %v3101_v29 }
 0xc6b   : > { %v5635_v47 = vpop.eup %5634  ;;  %5640 = vrsqrt.f32 %v3117_v17 }
 0xc6c   : > { %v3083_v53 = vpop.xlane.xlu0 %3082  ;;  %v3146_v42 = vmul.f32 %v5635_v47, %v7348_v63 }
 0xc6d   : > { %v5637_v46 = vpop.eup %5636  ;;  %v3102_v22 = vmul.f32 0.0078125, %v3083_v53 }
 0xc6e   : > { %v3085_v14 = vpop.xlane.xlu1 %3084  ;;  %v3147_v33 = vmul.f32 %v5637_v46, %v7351_v24  ;;  %v3168_v19 = vmul.f32 %v7390_v2, %v3146_v42  ;;  %v5455_v24 = vld [vmem:[#allocation13 + $0xf8] sm:$0xff]  }
 0xc6f   : > { %v3118_v44 = vadd.f32 1e-05, %v3102_v22  ;;  %v3103_v43 = vmul.f32 0.0078125, %v3085_v14  ;;  %5004 = vmatprep.subr.bf16.mxu1 %v5455_v24 }
 0xc70   : > { %v3169_v38 = vmul.f32 %v7390_v2, %v3147_v33  ;;  %v3190_v63 = vadd.f32 %v7398_v39, %v3168_v19  ;;  %5005 = vmatpush3.bf16.msra.mxu1 %v5457_v3 }
 0xc71   : > { %5642 = vrsqrt.f32 %v3118_v44  ;;  %v3119_v57 = vadd.f32 1e-05, %v3103_v43 }
 0xc72   : > { %v3191_v35 = vadd.f32 %v7398_v39, %v3169_v38 }
 0xc73   : > { %v5639_v20 = vpop.eup %5638  ;;  %5644 = vrsqrt.f32 %v3119_v57 }
 0xc74   : > { %v3087_v11 = vpop.xlane.xlu0 %3086  ;;  %v3202_v55 = vpack.c.bf16 %v3191_v35, %v3190_v63  ;;  %v3148_v26 = vmul.f32 %v5639_v20, %v7358_v37 }
 0xc75   : > { %v5641_v52 = vpop.eup %5640  ;;  %v3104_v50 = vmul.f32 0.0078125, %v3087_v11 }
 0xc76   : > { %v3089_v5 = vpop.xlane.xlu1 %3088  ;;  %3493 = vmatmul.mubr.bf16.gmra.mrb[112].mxu0 %v3202_v55  ;;  %3606 = vmatmul.mubr.bf16.gmra.mrb[112].mxu1 %v3202_v55  ;;  %v3149_v54 = vmul.f32 %v5641_v52, %v7361_v15  ;;  %v3170_v36 = vmul.f32 %v7390_v2, %v3148_v26 }
 0xc77   : > { %v3120_v61 = vadd.f32 1e-05, %v3104_v50  ;;  %v3105_v40 = vmul.f32 0.0078125, %v3089_v5  ;;  %3502 = vmatprep.mubr.bf16.mxu0 %v7963_v27  ;;  %3615 = vmatprep.mubr.bf16.mxu1 %v7963_v27 }
 0xc78   : > { %v3171_v37 = vmul.f32 %v7390_v2, %v3149_v54  ;;  %v3192_v25 = vadd.f32 %v7398_v39, %v3170_v36 }
 0xc79   : > { %5646 = vrsqrt.f32 %v3120_v61  ;;  %v3121_v23 = vadd.f32 1e-05, %v3105_v40 }
 0xc7a   : > { %v3193_v30 = vadd.f32 %v7398_v39, %v3171_v37 }
 0xc7b   : > { %v5643_v7 = vpop.eup %5642  ;;  %5648 = vrsqrt.f32 %v3121_v23 }
 0xc7c   : > { %v3203_v29 = vpack.c.bf16 %v3193_v30, %v3192_v25  ;;  %v3150_v15 = vmul.f32 %v5643_v7, %v7368_v1 }
 0xc7d   : > { %v5645_v17 = vpop.eup %5644 }
 0xc7e   : > { %3503 = vmatmul.mubr.bf16.gmra.mrb[116].mxu0 %v3203_v29  ;;  %3616 = vmatmul.mubr.bf16.gmra.mrb[116].mxu1 %v3203_v29  ;;  %v3151_v47 = vmul.f32 %v5645_v17, %v7371_v12  ;;  %v3172_v53 = vmul.f32 %v7390_v2, %v3150_v15 }
 0xc7f   : > { %3512 = vmatprep.mubr.bf16.mxu0 %v7963_v27  ;;  %3625 = vmatprep.mubr.bf16.mxu1 %v7963_v27 }
 0xc80   : > { %v3173_v42 = vmul.f32 %v7390_v2, %v3151_v47  ;;  %v3194_v0 = vadd.f32 %v7398_v39, %v3172_v53 }
 0xc82   : > { %v3195_v21 = vadd.f32 %v7398_v39, %v3173_v42 }
 0xc83   : > { %v5647_v46 = vpop.eup %5646 }
 0xc84   : > { %v3204_v22 = vpack.c.bf16 %v3195_v21, %v3194_v0  ;;  %v3152_v1 = vmul.f32 %v5647_v46, %v7378_v56  ;;  %v3238_v56 = vld [vmem:[%s7972_s21] sm:$0xf]  ;;  %s6043_s21 = smov [#allocation15]  }
 0xc85   : > { %v5649_v14 = vpop.eup %5648  ;;  %s5952_s13 = sshll.u32 %s6043_s21, 4  ;;  %s5953_s13 = int_to_ptr.vmem [resolvable:$false] %s5952_s13 }
 0xc86   : > { %3513 = vmatmul.mubr.bf16.gmra.mrb[120].mxu0 %v3204_v22  ;;  %3626 = vmatmul.mubr.bf16.gmra.mrb[120].mxu1 %v3204_v22  ;;  %v3153_v12 = vmul.f32 %v5649_v14, %v7381_v9  ;;  %v3174_v33 = vmul.f32 %v7390_v2, %v3152_v1  ;;  %v7973_v9 = vld [vmem:[#allocation21_spill] sm:$0xff]  ;;  %s5954_s12 = scalar_lea.vmem %s5953_s13, 4096  ;;  %p5955_p13 = scmp.lt.s32.totalorder %s7844_s10, %s5953_s13 }
 0xc87   : > { %3522 = vmatprep.mubr.bf16.mxu0 %v7963_v27  ;;  %3635 = vmatprep.mubr.bf16.mxu1 %v7963_v27  ;;  %v7974_v32 = vsub.s32 0, %v7973_v9  ;;  %v7975_v57 = vsub.s32 2, %v7973_v9  ;;  %p5956_p0 = scmp.lt.s32.totalorder %s5954_s12, %s5948_s14 }
 0xc88   : > { %v3175_v19 = vmul.f32 %v7390_v2, %v3153_v12  ;;  %v3196_v44 = vadd.f32 %v7398_v39, %v3174_v33  ;;  %v7976_v2 = vsub.s32 1, %v7973_v9 }
 0xc89   : > { %v7464_v38 = vrot.slane %v3238_v56, %v7974_v32  ;;  %v7468_v27 = vrot.slane %v3238_v56, %v7975_v57  ;;  %p5957_p2 = por %p5956_p0, %p5955_p13 }
 0xc8a   : > { %v3197_v43 = vadd.f32 %v7398_v39, %v3175_v19  ;;  %v7472_v63 = vrot.slane %v3238_v56, %v7976_v2  ;;  %v7977_v39 = vsub.s32 3, %v7973_v9 }
 0xc8b   : > { %p5958_p8 = pnand %p5957_p2, %p5951_p1 }
 0xc8c   : > { %v3205_v49 = vpack.c.bf16 %v3197_v43, %v3196_v44  ;;  %v7476_v35 = vrot.slane %v3238_v56, %v7977_v39 }
 0xc8e   : > { %3523 = vmatmul.mubr.bf16.gmra.mrb[124].mxu0 %v3205_v49  ;;  %3636 = vmatmul.mubr.bf16.gmra.mrb[124].mxu1 %v3205_v49 }
 0xcd1   : > { %v3454_v10 = vpop.f32.mrb[96].mxu0  ;;  %v3567_v24 = vpop.f32.mrb[96].mxu1 }
 0xcd2   : > { %v3455_v20 = vadd.f32 %v3454_v10, %v7464_v38  ;;  %v3568_v13 = vadd.f32 %v3567_v24, %v7468_v27  ;;  %v3456_v3 = vpop.f32.mrb[97].mxu0  ;;  %v3569_v11 = vpop.f32.mrb[97].mxu1 }
 0xcd3   : > { %v3457_v55 = vadd.f32 %v3456_v3, %v7472_v63  ;;  %v3570_v26 = vadd.f32 %v3569_v11, %v7476_v35  ;;  %v3458_v52 = vpop.f32.mrb[98].mxu0  ;;  %v3571_v50 = vpop.f32.mrb[98].mxu1 }
 0xcd4   : > { %v3710_v5 = vmul.f32 0.70710677, %v3455_v20  ;;  %v3712_v54 = vmul.f32 0.70710677, %v3568_v13  ;;  %v3459_v40 = vadd.f32 %v3458_v52, %v7464_v38  ;;  %v3572_v37 = vadd.f32 %v3571_v50, %v7468_v27  ;;  %v3460_v23 = vpop.f32.mrb[99].mxu0  ;;  %v3573_v25 = vpop.f32.mrb[99].mxu1 }
 0xcd5   : > { %v3711_v36 = vmul.f32 0.70710677, %v3457_v55  ;;  %v3713_v61 = vmul.f32 0.70710677, %v3570_v26  ;;  %v3461_v30 = vadd.f32 %v3460_v23, %v7472_v63  ;;  %v3574_v7 = vadd.f32 %v3573_v25, %v7476_v35 }
 0xcd6   : > { %5650 = verf.f32 %v3710_v5  ;;  %v3714_v29 = vmul.f32 0.70710677, %v3459_v40  ;;  %v3716_v15 = vmul.f32 0.70710677, %v3572_v37  ;;  %v3646_v56 = vmul.f32 0.5, %v3455_v20 }
 0xcd7   : > { %5652 = verf.f32 %v3712_v54  ;;  %v3715_v17 = vmul.f32 0.70710677, %v3461_v30  ;;  %v3717_v53 = vmul.f32 0.70710677, %v3574_v7  ;;  %v3648_v24 = vmul.f32 0.5, %v3568_v13 }
 0xcd8   : > { %5654 = verf.f32 %v3711_v36  ;;  %v7493_v3 = vmul.f32 0.5, %v3457_v55  ;;  %v7495_v11 = vmul.f32 0.5, %v3570_v26  ;;  %v3650_v20 = vmul.f32 0.5, %v3459_v40 }
 0xcd9   : > { %5656 = verf.f32 %v3713_v61  ;;  %v3464_v47 = vpop.f32.mrb[100].mxu0  ;;  %v3577_v0 = vpop.f32.mrb[100].mxu1  ;;  %v3652_v23 = vmul.f32 0.5, %v3572_v37  ;;  %v7497_v25 = vmul.f32 0.5, %v3461_v30 }
 0xcda   : > { %5658 = verf.f32 %v3714_v29  ;;  %v3465_v42 = vadd.f32 %v3464_v47, %v7464_v38  ;;  %v3466_v21 = vpop.f32.mrb[101].mxu0  ;;  %v3578_v46 = vadd.f32 %v3577_v0, %v7468_v27  ;;  %v3579_v1 = vpop.f32.mrb[101].mxu1 }
 0xcdb   : > { %5660 = verf.f32 %v3716_v15  ;;  %v3467_v22 = vadd.f32 %v3466_v21, %v7472_v63  ;;  %v3468_v14 = vpop.f32.mrb[102].mxu0  ;;  %v3580_v33 = vadd.f32 %v3579_v1, %v7476_v35  ;;  %v3581_v19 = vpop.f32.mrb[102].mxu1 }
 0xcdc   : > { %5662 = verf.f32 %v3715_v17  ;;  %v3718_v12 = vmul.f32 0.70710677, %v3465_v42  ;;  %v3470_v44 = vpop.f32.mrb[103].mxu0  ;;  %v3720_v43 = vmul.f32 0.70710677, %v3578_v46  ;;  %v3583_v49 = vpop.f32.mrb[103].mxu1  ;;  %v3469_v57 = vadd.f32 %v3468_v14, %v7464_v38 }
 0xcdd   : > { %5664 = verf.f32 %v3717_v53  ;;  %v3719_v9 = vmul.f32 0.70710677, %v3467_v22  ;;  %v3721_v32 = vmul.f32 0.70710677, %v3580_v33  ;;  %v3582_v2 = vadd.f32 %v3581_v19, %v7468_v27 }
 0xcde   : > { %5666 = verf.f32 %v3718_v12  ;;  %v3471_v39 = vadd.f32 %v3470_v44, %v7472_v63  ;;  %v3722_v5 = vmul.f32 0.70710677, %v3469_v57  ;;  %v3584_v15 = vadd.f32 %v3583_v49, %v7476_v35 }
 0xcdf   : > { %5668 = verf.f32 %v3720_v43  ;;  %v3724_v29 = vmul.f32 0.70710677, %v3582_v2  ;;  %v7500_v17 = vmul.f32 0.5, %v3574_v7  ;;  %v7502_v26 = vmul.f32 0.5, %v3465_v42 }
 0xce0   : > { %v5651_v10 = vpop.eup %5650  ;;  %5670 = verf.f32 %v3719_v9  ;;  %v3723_v47 = vmul.f32 0.70710677, %v3471_v39  ;;  %v7504_v1 = vmul.f32 0.5, %v3578_v46  ;;  %v7506_v14 = vmul.f32 0.5, %v3467_v22 }
 0xce1   : > { %v5653_v52 = vpop.eup %5652  ;;  %v3838_v50 = vadd.f32 1.0, %v5651_v10  ;;  %5672 = verf.f32 %v3721_v32  ;;  %v3474_v54 = vpop.f32.mrb[104].mxu0  ;;  %v7508_v37 = vmul.f32 0.5, %v3580_v33  ;;  %v3725_v46 = vmul.f32 0.70710677, %v3584_v15 }
 0xce2   : > { %v3587_v36 = vpop.f32.mrb[104].mxu1  ;;  %v5655_v61 = vpop.eup %5654  ;;  %v3840_v21 = vadd.f32 1.0, %v5653_v52  ;;  %5674 = verf.f32 %v3722_v5  ;;  %v3475_v22 = vadd.f32 %v3474_v54, %v7464_v38  ;;  %v7527_v54 = vmul.f32 0.5, %v3469_v57 }
 0xce3   : > { %v3476_v13 = vpop.f32.mrb[105].mxu0  ;;  %v5657_v55 = vpop.eup %5656  ;;  %v7512_v44 = vmul.f32 %v3838_v50, %v3646_v56  ;;  %v3839_v7 = vadd.f32 1.0, %v5655_v61  ;;  %5676 = verf.f32 %v3724_v29  ;;  %v3588_v52 = vadd.f32 %v3587_v36, %v7468_v27 }
 0xce4   : > { %v3589_v53 = vpop.f32.mrb[105].mxu1  ;;  %v3478_v40 = vpop.f32.mrb[106].mxu0  ;;  %v3841_v33 = vadd.f32 1.0, %v5657_v55  ;;  %5678 = verf.f32 %v3723_v47  ;;  %v7520_v50 = vmul.f32 %v3840_v21, %v3648_v24  ;;  %v3726_v5 = vmul.f32 0.70710677, %v3475_v22 }
 0xce5   : > { %v5659_v0 = vpop.eup %5658  ;;  %v3591_v30 = vpop.f32.mrb[106].mxu1  ;;  %v7529_v55 = vmul.f32 0.5, %v3582_v2  ;;  %v7535_v21 = vmul.f32 0.5, %v3584_v15  ;;  %5680 = verf.f32 %v3725_v46  ;;  %v7538_v57 = vmul.f32 %v3839_v7, %v7493_v3 }
 0xce6   : > { %v7510_v12 = vpop.f32.mrb[107].mxu0  ;;  %v5661_v19 = vpop.eup %5660  ;;  %v3842_v42 = vadd.f32 1.0, %v5659_v0  ;;  %v3477_v0 = vadd.f32 %v3476_v13, %v7472_v63  ;;  %v7541_v2 = vmul.f32 %v3841_v33, %v7495_v11  ;;  %5682 = verf.f32 %v3726_v5 }
 0xce7   : > { %v7514_v43 = vpop.f32.mrb[107].mxu1  ;;  %v5663_v49 = vpop.eup %5662  ;;  %v3844_v9 = vadd.f32 1.0, %v5661_v19  ;;  %v3590_v46 = vadd.f32 %v3589_v53, %v7476_v35  ;;  %v3479_v11 = vadd.f32 %v3478_v40, %v7464_v38  ;;  %v3592_v7 = vadd.f32 %v3591_v30, %v7468_v27 }
 0xce8   : > { %v5665_v32 = vpop.eup %5664  ;;  %v7517_v10 = vmul.f32 %v3842_v42, %v3650_v20  ;;  %v7531_v20 = vmul.f32 0.5, %v3471_v39  ;;  %v3728_v39 = vmul.f32 0.70710677, %v3588_v52  ;;  %v3727_v15 = vmul.f32 0.70710677, %v3477_v0 }
 0xce9   : > { %v5667_v56 = vpop.eup %5666  ;;  %v7522_v61 = vmul.f32 %v3844_v9, %v3652_v23  ;;  %v3484_v47 = vpop.f32.mrb[108].mxu0  ;;  %v3843_v23 = vadd.f32 1.0, %v5663_v49  ;;  %v3845_v24 = vadd.f32 1.0, %v5665_v32  ;;  %v7555_v51 = vmul.f32 0.5, %v3475_v22 }
 0xcea   : > { %v5669_v19 = vpop.eup %5668  ;;  %v3597_v36 = vpop.f32.mrb[108].mxu1  ;;  %v3846_v49 = vadd.f32 1.0, %v5667_v56  ;;  %5684 = verf.f32 %v3728_v39  ;;  %v7557_v56 = vmul.f32 0.5, %v3588_v52  ;;  %v3729_v53 = vmul.f32 0.70710677, %v3590_v46 }
 0xceb   : > { %v5671_v42 = vpop.eup %5670  ;;  %v3486_v13 = vpop.f32.mrb[109].mxu0  ;;  %v3848_v3 = vadd.f32 1.0, %v5669_v19  ;;  %v3907_v33 = vmul.f32 %v3843_v23, %v7497_v25  ;;  %5686 = verf.f32 %v3727_v15  ;;  %v3730_v31 = vmul.f32 0.70710677, %v3479_v11 }
 0xcec   : > { %v3599_v9 = vpop.f32.mrb[109].mxu1  ;;  %v5673_v34 = vpop.eup %5672  ;;  %v3847_v5 = vadd.f32 1.0, %v5671_v42  ;;  %v3909_v19 = vmul.f32 %v3845_v24, %v7500_v17  ;;  %v7561_v39 = vmul.f32 %v3846_v49, %v7502_v26  ;;  %v7563_v40 = vmul.f32 0.5, %v3477_v0 }
 0xced   : > { %v7543_v29 = vpop.f32.mrb[110].mxu0  ;;  %v7545_v16 = vpop.f32.mrb[110].mxu1  ;;  %v3849_v4 = vadd.f32 1.0, %v5673_v34  ;;  %v3732_v30 = vmul.f32 0.70710677, %v3592_v7  ;;  %v7566_v34 = vmul.f32 %v3848_v3, %v7504_v1  ;;  %5688 = verf.f32 %v3729_v53 }
 0xcee   : > { %v7548_v45 = vpop.f32.mrb[111].mxu0  ;;  %v7550_v8 = vpop.f32.mrb[111].mxu1  ;;  %v3481_v22 = vadd.f32 %v7510_v12, %v7472_v63  ;;  %v3594_v52 = vadd.f32 %v7514_v43, %v7476_v35  ;;  %v7573_v42 = vmul.f32 %v3847_v5, %v7506_v14  ;;  %5690 = verf.f32 %v3730_v31 }
 0xcef   : > { %v5675_v32 = vpop.eup %5674  ;;  %v7576_v17 = vmul.f32 %v3849_v4, %v7508_v37  ;;  %v7579_v26 = vadd.f32 %v3484_v47, %v7464_v38  ;;  %v7581_v1 = vmul.f32 0.5, %v3590_v46  ;;  %5692 = verf.f32 %v3732_v30 }
 0xcf0   : > { %v5677_v41 = vpop.eup %5676  ;;  %v3850_v0 = vadd.f32 1.0, %v5675_v32  ;;  %v3731_v24 = vmul.f32 0.70710677, %v3481_v22  ;;  %v3666_v15 = vmul.f32 0.5, %v3479_v11  ;;  %v3733_v43 = vmul.f32 0.70710677, %v3594_v52 }
 0xcf1   : > { %v5679_v25 = vpop.eup %5678  ;;  %v3852_v12 = vadd.f32 1.0, %v5677_v41  ;;  %v3734_v14 = vmul.f32 0.70710677, %v7579_v26  ;;  %v7585_v4 = vadd.f32 %v3597_v36, %v7468_v27  ;;  %v7588_v31 = vadd.f32 %v3486_v13, %v7472_v63 }
 0xcf2   : > { %v5681_v23 = vpop.eup %5680  ;;  %v3851_v49 = vadd.f32 1.0, %v5679_v25  ;;  %5694 = verf.f32 %v3731_v24  ;;  %v7591_v37 = vadd.f32 %v3599_v9, %v7476_v35  ;;  %v3967_v47 = vpack.c.bf16 %v3907_v33, %v7538_v57 }
 0xcf3   : > { %v5683_v3 = vpop.eup %5682  ;;  %5696 = verf.f32 %v3733_v43  ;;  %v3969_v41 = vpack.c.bf16 %v3909_v19, %v7541_v2  ;;  %v3914_v11 = vmul.f32 %v3850_v0, %v7527_v54  ;;  %v3853_v5 = vadd.f32 1.0, %v5681_v23 }
 0xcf4   : > { %v5685_v46 = vpop.eup %5684  ;;  %v3668_v32 = vmul.f32 0.5, %v3592_v7  ;;  %v3736_v53 = vmul.f32 0.70710677, %v7585_v4  ;;  %v3916_v36 = vmul.f32 %v3852_v12, %v7529_v55  ;;  %v3915_v13 = vmul.f32 %v3851_v49, %v7531_v20  ;;  %4293 = vmatprep.mubr.bf16.mxu0 %v3967_v47 }
 0xcf5   : > { %v3854_v30 = vadd.f32 1.0, %v5683_v3  ;;  %v3735_v25 = vmul.f32 0.70710677, %v7588_v31  ;;  %4390 = vmatprep.mubr.bf16.mxu1 %v3969_v41  ;;  %v5687_v9 = vpop.eup %5686  ;;  %v3667_v57 = vmul.f32 0.5, %v3481_v22  ;;  %5698 = verf.f32 %v3734_v14 }
 0xcf6   : > { %v3737_v2 = vmul.f32 0.70710677, %v7591_v37  ;;  %v7603_v54 = vadd.f32 %v7543_v29, %v7464_v38  ;;  %v7978_v7 = vpack.c.bf16 %v7517_v10, %v7512_v44  ;;  %v7979_v55 = vpack.c.bf16 %v7522_v61, %v7520_v50 }
 0xcf7   : > { %v3856_v20 = vadd.f32 1.0, %v5685_v46  ;;  %5700 = verf.f32 %v3736_v53  ;;  %v3602_v33 = vadd.f32 %v7545_v16, %v7468_v27  ;;  %v7615_v19 = vadd.f32 %v7548_v45, %v7472_v63  ;;  %v5689_v22 = vpop.eup %5688 }
 0xcf8   : > { %4294 = vmatmul.mubr.bf16.vlgmr.msra.gmra.mrb[128].mxu0 %v7978_v7  ;;  %4391 = vmatmul.mubr.bf16.vlgmr.msra.gmra.mrb[128].mxu1 %v7979_v55  ;;  %v3917_v29 = vmul.f32 %v3853_v5, %v7535_v21  ;;  %v3669_v0 = vmul.f32 0.5, %v3594_v52  ;;  %5702 = verf.f32 %v3735_v25  ;;  %v3738_v44 = vmul.f32 0.70710677, %v7603_v54  ;;  %v5691_v10 = vpop.eup %5690 }
 0xcf9   : > { %v3918_v50 = vmul.f32 %v3854_v30, %v7555_v51  ;;  %v3855_v61 = vadd.f32 1.0, %v5687_v9  ;;  %5704 = verf.f32 %v3737_v2  ;;  %v3740_v24 = vmul.f32 0.70710677, %v3602_v33  ;;  %v5693_v23 = vpop.eup %5692 }
 0xcfa   : > { %v3858_v12 = vadd.f32 1.0, %v5691_v10  ;;  %5706 = verf.f32 %v3738_v44  ;;  %v3739_v16 = vmul.f32 0.70710677, %v7615_v19  ;;  %v3604_v45 = vadd.f32 %v7550_v8, %v7476_v35 }
 0xcfb   : > { %v3920_v21 = vmul.f32 %v3856_v20, %v7557_v56  ;;  %v3860_v52 = vadd.f32 1.0, %v5693_v23  ;;  %5708 = verf.f32 %v3740_v24  ;;  %v3971_v49 = vpack.c.bf16 %v3915_v13, %v7573_v42 }
 0xcfc   : > { %v5695_v43 = vpop.eup %5694  ;;  %v3857_v3 = vadd.f32 1.0, %v5689_v22  ;;  %v3922_v51 = vmul.f32 %v3858_v12, %v3666_v15  ;;  %5710 = verf.f32 %v3739_v16  ;;  %v3741_v14 = vmul.f32 0.70710677, %v3604_v45 }
 0xcfd   : > { %v5697_v47 = vpop.eup %5696  ;;  %v3924_v41 = vmul.f32 %v3860_v52, %v3668_v32  ;;  %v3859_v46 = vadd.f32 1.0, %v5695_v43  ;;  %4301 = vmatprep.mubr.bf16.mxu0 %v3971_v49  ;;  %v3973_v5 = vpack.c.bf16 %v3917_v29, %v7576_v17  ;;  %v3970_v53 = vpack.c.bf16 %v3914_v11, %v7561_v39 }
 0xcfe   : > { %v3861_v8 = vadd.f32 1.0, %v5697_v47  ;;  %5712 = verf.f32 %v3741_v14  ;;  %v3972_v56 = vpack.c.bf16 %v3916_v36, %v7566_v34  ;;  %v3974_v30 = vpack.c.bf16 %v3922_v51, %v3918_v50 }
 0xcff   : > { %v3919_v42 = vmul.f32 %v3855_v61, %v7563_v40  ;;  %v3923_v13 = vmul.f32 %v3859_v46, %v3667_v57  ;;  %4398 = vmatprep.mubr.bf16.mxu1 %v3973_v5  ;;  %v3976_v15 = vpack.c.bf16 %v3924_v41, %v3920_v21  ;;  %v5699_v25 = vpop.eup %5698  ;;  %v3921_v32 = vmul.f32 %v3857_v3, %v7581_v1 }
 0xd00   : > { %4302 = vmatmul.mubr.bf16.gmra.mrb[132].mxu0 %v3970_v53  ;;  %v3925_v9 = vmul.f32 %v3861_v8, %v3669_v0  ;;  %4399 = vmatmul.mubr.bf16.gmra.mrb[132].mxu1 %v3972_v56  ;;  %v3862_v55 = vadd.f32 1.0, %v5699_v25  ;;  %v3670_v36 = vmul.f32 0.5, %v7579_v26  ;;  %v3672_v20 = vmul.f32 0.5, %v7585_v4 }
 0xd01   : > { %v5701_v2 = vpop.eup %5700  ;;  %v3975_v17 = vpack.c.bf16 %v3923_v13, %v3919_v42  ;;  %v3674_v1 = vmul.f32 0.5, %v7603_v54  ;;  %v3671_v44 = vmul.f32 0.5, %v7588_v31  ;;  %v3676_v10 = vmul.f32 0.5, %v3602_v33 }
 0xd02   : > { %v5703_v7 = vpop.eup %5702  ;;  %v3977_v39 = vpack.c.bf16 %v3925_v9, %v3921_v32  ;;  %v3864_v40 = vadd.f32 1.0, %v5701_v2  ;;  %v3675_v61 = vmul.f32 0.5, %v7615_v19  ;;  %v3926_v24 = vmul.f32 %v3862_v55, %v3670_v36 }
 0xd03   : > { %v5705_v11 = vpop.eup %5704  ;;  %4309 = vmatprep.mubr.bf16.mxu0 %v3975_v17  ;;  %v3863_v22 = vadd.f32 1.0, %v5703_v7  ;;  %v3673_v4 = vmul.f32 0.5, %v7591_v37  ;;  %v3677_v49 = vmul.f32 0.5, %v3604_v45 }
 0xd04   : > { %v5707_v34 = vpop.eup %5706  ;;  %4406 = vmatprep.mubr.bf16.mxu1 %v3977_v39  ;;  %v3865_v23 = vadd.f32 1.0, %v5705_v11  ;;  %v3928_v21 = vmul.f32 %v3864_v40, %v3672_v20 }
 0xd05   : > { %v5709_v57 = vpop.eup %5708  ;;  %v3866_v29 = vadd.f32 1.0, %v5707_v34  ;;  %v3927_v54 = vmul.f32 %v3863_v22, %v3671_v44 }
 0xd06   : > { %v5711_v0 = vpop.eup %5710  ;;  %v3868_v50 = vadd.f32 1.0, %v5709_v57  ;;  %v3929_v51 = vmul.f32 %v3865_v23, %v3673_v4 }
 0xd07   : > { %v3930_v12 = vmul.f32 %v3866_v29, %v3674_v1  ;;  %v3867_v26 = vadd.f32 1.0, %v5711_v0 }
 0xd08   : > { %4310 = vmatmul.mubr.bf16.gmra.mrb[136].mxu0 %v3974_v30  ;;  %v5713_v16 = vpop.eup %5712  ;;  %v3932_v52 = vmul.f32 %v3868_v50, %v3676_v10  ;;  %4407 = vmatmul.mubr.bf16.gmra.mrb[136].mxu1 %v3976_v15 }
 0xd09   : > { %v3931_v43 = vmul.f32 %v3867_v26, %v3675_v61  ;;  %v3869_v3 = vadd.f32 1.0, %v5713_v16  ;;  %v3978_v31 = vpack.c.bf16 %v3930_v12, %v3926_v24 }
 0xd0a   : > { %v3980_v33 = vpack.c.bf16 %v3932_v52, %v3928_v21 }
 0xd0b   : > { %v3933_v14 = vmul.f32 %v3869_v3, %v3677_v49  ;;  %v3979_v19 = vpack.c.bf16 %v3931_v43, %v3927_v54 }
 0xd0d   : > { %4317 = vmatprep.mubr.bf16.mxu0 %v3979_v19  ;;  %v3981_v47 = vpack.c.bf16 %v3933_v14, %v3929_v51 }
 0xd0f   : > { %4414 = vmatprep.mubr.bf16.mxu1 %v3981_v47 }
 0xd10   : > { %4318 = vmatmul.mubr.bf16.gmra.mrb[140].mxu0 %v3978_v31  ;;  %4415 = vmatmul.mubr.bf16.gmra.mrb[140].mxu1 %v3980_v33 }
 0xd49   : > { %v3494_v41 = vpop.f32.mrb[112].mxu0  ;;  %v3607_v46 = vpop.f32.mrb[112].mxu1 }
 0xd4a   : > { %v3495_v37 = vadd.f32 %v3494_v41, %v7464_v38  ;;  %v3608_v45 = vadd.f32 %v3607_v46, %v7468_v27  ;;  %v3496_v5 = vpop.f32.mrb[113].mxu0  ;;  %v3609_v53 = vpop.f32.mrb[113].mxu1 }
 0xd4b   : > { %v3497_v8 = vadd.f32 %v3496_v5, %v7472_v63  ;;  %v3610_v56 = vadd.f32 %v3609_v53, %v7476_v35  ;;  %v3498_v30 = vpop.f32.mrb[114].mxu0  ;;  %v3611_v42 = vpop.f32.mrb[114].mxu1 }
 0xd4c   : > { %v3742_v13 = vmul.f32 0.70710677, %v3495_v37  ;;  %v3744_v15 = vmul.f32 0.70710677, %v3608_v45  ;;  %v3499_v9 = vadd.f32 %v3498_v30, %v7464_v38  ;;  %v3612_v2 = vadd.f32 %v3611_v42, %v7468_v27  ;;  %v3500_v17 = vpop.f32.mrb[115].mxu0  ;;  %v3613_v7 = vpop.f32.mrb[115].mxu1 }
 0xd4d   : > { %v3743_v25 = vmul.f32 0.70710677, %v3497_v8  ;;  %v3745_v32 = vmul.f32 0.70710677, %v3610_v56  ;;  %v3501_v39 = vadd.f32 %v3500_v17, %v7472_v63  ;;  %v3614_v11 = vadd.f32 %v3613_v7, %v7476_v35 }
 0xd4e   : > { %5714 = verf.f32 %v3742_v13  ;;  %v3746_v55 = vmul.f32 0.70710677, %v3499_v9  ;;  %v3748_v34 = vmul.f32 0.70710677, %v3612_v2  ;;  %v3678_v16 = vmul.f32 0.5, %v3495_v37 }
 0xd4f   : > { %5716 = verf.f32 %v3744_v15  ;;  %v3747_v36 = vmul.f32 0.70710677, %v3501_v39  ;;  %v3749_v57 = vmul.f32 0.70710677, %v3614_v11  ;;  %v3680_v3 = vmul.f32 0.5, %v3608_v45 }
 0xd50   : > { %5718 = verf.f32 %v3743_v25  ;;  %v3679_v31 = vmul.f32 0.5, %v3497_v8  ;;  %v3681_v33 = vmul.f32 0.5, %v3610_v56  ;;  %v3682_v14 = vmul.f32 0.5, %v3499_v9 }
 0xd51   : > { %5720 = verf.f32 %v3745_v32  ;;  %v3504_v40 = vpop.f32.mrb[116].mxu0  ;;  %v3617_v22 = vpop.f32.mrb[116].mxu1  ;;  %v7651_v19 = vmul.f32 0.5, %v3612_v2  ;;  %v7654_v53 = vmul.f32 0.5, %v3501_v39  ;;  %v7656_v30 = vmul.f32 0.5, %v3614_v11 }
 0xd52   : > { %5722 = verf.f32 %v3746_v55  ;;  %v3505_v20 = vadd.f32 %v3504_v40, %v7464_v38  ;;  %v3506_v1 = vpop.f32.mrb[117].mxu0  ;;  %v3618_v29 = vadd.f32 %v3617_v22, %v7468_v27  ;;  %v3619_v44 = vpop.f32.mrb[117].mxu1 }
 0xd53   : > { %5724 = verf.f32 %v3748_v34  ;;  %v3507_v0 = vadd.f32 %v3506_v1, %v7472_v63  ;;  %v3508_v10 = vpop.f32.mrb[118].mxu0  ;;  %v3620_v61 = vadd.f32 %v3619_v44, %v7476_v35  ;;  %v3621_v24 = vpop.f32.mrb[118].mxu1 }
 0xd54   : > { %5726 = verf.f32 %v3747_v36  ;;  %v3750_v50 = vmul.f32 0.70710677, %v3505_v20  ;;  %v3510_v23 = vpop.f32.mrb[119].mxu0  ;;  %v3752_v12 = vmul.f32 0.70710677, %v3618_v29  ;;  %v3623_v26 = vpop.f32.mrb[119].mxu1  ;;  %v3509_v52 = vadd.f32 %v3508_v10, %v7464_v38 }
 0xd55   : > { %5728 = verf.f32 %v3749_v57  ;;  %v3751_v21 = vmul.f32 0.70710677, %v3507_v0  ;;  %v3753_v4 = vmul.f32 0.70710677, %v3620_v61  ;;  %v3622_v49 = vadd.f32 %v3621_v24, %v7468_v27 }
 0xd56   : > { %5730 = verf.f32 %v3750_v50  ;;  %v3511_v54 = vadd.f32 %v3510_v23, %v7472_v63  ;;  %v3754_v47 = vmul.f32 0.70710677, %v3509_v52  ;;  %v3624_v41 = vadd.f32 %v3623_v26, %v7476_v35 }
 0xd57   : > { %5732 = verf.f32 %v3752_v12  ;;  %v3756_v42 = vmul.f32 0.70710677, %v3622_v49  ;;  %v7658_v56 = vmul.f32 0.5, %v3505_v20  ;;  %v7660_v13 = vmul.f32 0.5, %v3618_v29 }
 0xd58   : > { %v5715_v43 = vpop.eup %5714  ;;  %5734 = verf.f32 %v3751_v21  ;;  %v3755_v15 = vmul.f32 0.70710677, %v3511_v54  ;;  %v7662_v17 = vmul.f32 0.5, %v3507_v0  ;;  %v7664_v7 = vmul.f32 0.5, %v3620_v61 }
 0xd59   : > { %v5717_v51 = vpop.eup %5716  ;;  %v3514_v46 = vpop.f32.mrb[120].mxu0  ;;  %5736 = verf.f32 %v3753_v4  ;;  %v3870_v2 = vadd.f32 1.0, %v5715_v43  ;;  %v3757_v40 = vmul.f32 0.70710677, %v3624_v41  ;;  %v7670_v10 = vmul.f32 0.5, %v3509_v52 }
 0xd5a   : > { %v3627_v37 = vpop.f32.mrb[120].mxu1  ;;  %v5719_v5 = vpop.eup %5718  ;;  %5738 = verf.f32 %v3754_v47  ;;  %v3872_v34 = vadd.f32 1.0, %v5717_v51  ;;  %v3515_v29 = vadd.f32 %v3514_v46, %v7464_v38  ;;  %v7672_v50 = vmul.f32 0.5, %v3622_v49 }
 0xd5b   : > { %v3516_v45 = vpop.f32.mrb[121].mxu0  ;;  %v5721_v8 = vpop.eup %5720  ;;  %5740 = verf.f32 %v3756_v42  ;;  %v3871_v36 = vadd.f32 1.0, %v5719_v5  ;;  %v3628_v0 = vadd.f32 %v3627_v37, %v7468_v27  ;;  %v7675_v23 = vmul.f32 %v3870_v2, %v3678_v16 }
 0xd5c   : > { %v3629_v25 = vpop.f32.mrb[121].mxu1  ;;  %v3518_v32 = vpop.f32.mrb[122].mxu0  ;;  %5742 = verf.f32 %v3755_v15  ;;  %v3873_v22 = vadd.f32 1.0, %v5721_v8  ;;  %v3517_v61 = vadd.f32 %v3516_v45, %v7472_v63  ;;  %v7677_v26 = vmul.f32 0.5, %v3511_v54 }
 0xd5d   : > { %v5723_v9 = vpop.eup %5722  ;;  %v3631_v39 = vpop.f32.mrb[122].mxu1  ;;  %5744 = verf.f32 %v3757_v40  ;;  %v3758_v21 = vmul.f32 0.70710677, %v3515_v29  ;;  %v7679_v43 = vmul.f32 %v3872_v34, %v3680_v3  ;;  %v7681_v51 = vmul.f32 %v3871_v36, %v3679_v31 }
 0xd5e   : > { %v3520_v11 = vpop.f32.mrb[123].mxu0  ;;  %v5725_v55 = vpop.eup %5724  ;;  %v3874_v1 = vadd.f32 1.0, %v5723_v9  ;;  %v7683_v47 = vmul.f32 0.5, %v3624_v41  ;;  %v3760_v52 = vmul.f32 0.70710677, %v3628_v0  ;;  %v7685_v5 = vmul.f32 %v3873_v22, %v3681_v33 }
 0xd5f   : > { %v7666_v57 = vpop.f32.mrb[123].mxu1  ;;  %v5727_v20 = vpop.eup %5726  ;;  %v3876_v12 = vadd.f32 1.0, %v5725_v55  ;;  %5746 = verf.f32 %v3758_v21  ;;  %v3759_v3 = vmul.f32 0.70710677, %v3517_v61  ;;  %v3519_v55 = vadd.f32 %v3518_v32, %v7464_v38 }
 0xd60   : > { %v5729_v44 = vpop.eup %5728  ;;  %v7687_v42 = vmul.f32 %v3874_v1, %v3682_v14  ;;  %v3875_v16 = vadd.f32 1.0, %v5727_v20  ;;  %5748 = verf.f32 %v3760_v52  ;;  %v3630_v14 = vadd.f32 %v3629_v25, %v7476_v35 }
 0xd61   : > { %v5731_v24 = vpop.eup %5730  ;;  %v3524_v49 = vpop.f32.mrb[124].mxu0  ;;  %v3877_v8 = vadd.f32 1.0, %v5729_v44  ;;  %v7694_v2 = vmul.f32 %v3876_v12, %v7651_v19  ;;  %5750 = verf.f32 %v3759_v3  ;;  %v3632_v22 = vadd.f32 %v3631_v39, %v7468_v27 }
 0xd62   : > { %v5733_v4 = vpop.eup %5732  ;;  %v3637_v46 = vpop.f32.mrb[124].mxu1  ;;  %v3878_v15 = vadd.f32 1.0, %v5731_v24  ;;  %v3521_v1 = vadd.f32 %v3520_v11, %v7472_v63  ;;  %v3939_v19 = vmul.f32 %v3875_v16, %v7654_v53  ;;  %v3694_v24 = vmul.f32 0.5, %v3515_v29 }
 0xd63   : > { %v5735_v37 = vpop.eup %5734  ;;  %v3526_v54 = vpop.f32.mrb[125].mxu0  ;;  %v3880_v33 = vadd.f32 1.0, %v5733_v4  ;;  %v7705_v12 = vmul.f32 0.5, %v3628_v0  ;;  %v3761_v25 = vmul.f32 0.70710677, %v3630_v14  ;;  %v3941_v32 = vmul.f32 %v3877_v8, %v7656_v30 }
 0xd64   : > { %v3639_v45 = vpop.f32.mrb[125].mxu1  ;;  %v7689_v31 = vpop.f32.mrb[126].mxu0  ;;  %v3879_v20 = vadd.f32 1.0, %v5735_v37  ;;  %v7709_v4 = vmul.f32 %v3878_v15, %v7658_v56  ;;  %v7711_v52 = vmul.f32 0.5, %v3517_v61  ;;  %v3762_v37 = vmul.f32 0.70710677, %v3519_v55 }
 0xd65   : > { %v7691_v41 = vpop.f32.mrb[126].mxu1  ;;  %v5737_v9 = vpop.eup %5736  ;;  %v7714_v39 = vmul.f32 %v3880_v33, %v7660_v13  ;;  %5752 = verf.f32 %v3761_v25  ;;  %v3764_v3 = vmul.f32 0.70710677, %v3632_v22  ;;  %v3763_v16 = vmul.f32 0.70710677, %v3521_v1 }
 0xd66   : > { %v7698_v34 = vpop.f32.mrb[127].mxu0  ;;  %v7700_v36 = vpop.f32.mrb[127].mxu1  ;;  %v3881_v11 = vadd.f32 1.0, %v5737_v9  ;;  %v7717_v29 = vmul.f32 %v3879_v20, %v7662_v17  ;;  %5754 = verf.f32 %v3762_v37  ;;  %v3634_v56 = vadd.f32 %v7666_v57, %v7476_v35 }
 0xd67   : > { %v5739_v40 = vpop.eup %5738  ;;  %5756 = verf.f32 %v3764_v3  ;;  %v7722_v13 = vadd.f32 %v3524_v49, %v7464_v38  ;;  %v7725_v61 = vadd.f32 %v3637_v46, %v7468_v27  ;;  %v7728_v15 = vadd.f32 %v3526_v54, %v7472_v63 }
 0xd68   : > { %v5741_v44 = vpop.eup %5740  ;;  %v3882_v0 = vadd.f32 1.0, %v5739_v40  ;;  %5758 = verf.f32 %v3763_v16  ;;  %v7731_v9 = vmul.f32 %v3881_v11, %v7664_v7  ;;  %v3765_v40 = vmul.f32 0.70710677, %v3634_v56 }
 0xd69   : > { %v5743_v21 = vpop.eup %5742  ;;  %v3884_v30 = vadd.f32 1.0, %v5741_v44  ;;  %v7734_v20 = vadd.f32 %v3639_v45, %v7476_v35  ;;  %v7736_v44 = vmul.f32 0.5, %v3630_v14  ;;  %v3698_v49 = vmul.f32 0.5, %v3519_v55 }
 0xd6a   : > { %v5745_v53 = vpop.eup %5744  ;;  %v3883_v8 = vadd.f32 1.0, %v5743_v21  ;;  %v3700_v25 = vmul.f32 0.5, %v3632_v22  ;;  %v3766_v46 = vmul.f32 0.70710677, %v7722_v13  ;;  %v7740_v21 = vmul.f32 %v3882_v0, %v7670_v10 }
 0xd6b   : > { %v5747_v17 = vpop.eup %5746  ;;  %v3885_v33 = vadd.f32 1.0, %v5745_v53  ;;  %v7743_v54 = vmul.f32 %v3884_v30, %v7672_v50  ;;  %5760 = verf.f32 %v3765_v40  ;;  %v3768_v7 = vmul.f32 0.70710677, %v7725_v61 }
 0xd6c   : > { %v5749_v57 = vpop.eup %5748  ;;  %v3947_v45 = vmul.f32 %v3883_v8, %v7677_v26  ;;  %v3886_v11 = vadd.f32 1.0, %v5747_v17  ;;  %v3699_v3 = vmul.f32 0.5, %v3521_v1  ;;  %v3767_v14 = vmul.f32 0.70710677, %v7728_v15 }
 0xd6d   : > { %v5751_v37 = vpop.eup %5750  ;;  %v3949_v55 = vmul.f32 %v3885_v33, %v7683_v47  ;;  %v3888_v22 = vadd.f32 1.0, %v5749_v57  ;;  %v3701_v53 = vmul.f32 0.5, %v3634_v56  ;;  %v3769_v10 = vmul.f32 0.70710677, %v7734_v20 }
 0xd6e   : > { %5762 = verf.f32 %v3766_v46  ;;  %v3983_v50 = vpack.c.bf16 %v3939_v19, %v7681_v51  ;;  %v3985_v0 = vpack.c.bf16 %v3941_v32, %v7685_v5  ;;  %v3529_v16 = vadd.f32 %v7689_v31, %v7464_v38 }
 0xd6f   : > { %v5753_v30 = vpop.eup %5752  ;;  %v3887_v26 = vadd.f32 1.0, %v5751_v37  ;;  %5764 = verf.f32 %v3768_v7  ;;  %v3642_v1 = vadd.f32 %v7691_v41, %v7468_v27  ;;  %v3982_v47 = vpack.c.bf16 %v7687_v42, %v7675_v23 }
 0xd70   : > { %v5755_v8 = vpop.eup %5754  ;;  %v7758_v56 = vmul.f32 %v3886_v11, %v3694_v24  ;;  %5766 = verf.f32 %v3767_v14  ;;  %4325 = vmatprep.mubr.bf16.mxu0 %v3983_v50  ;;  %4422 = vmatprep.mubr.bf16.mxu1 %v3985_v0  ;;  %v3770_v51 = vmul.f32 0.70710677, %v3529_v16  ;;  %v3984_v5 = vpack.c.bf16 %v7694_v2, %v7679_v43 }
 0xd71   : > { %v5757_v38 = vpop.eup %5756  ;;  %v3890_v31 = vadd.f32 1.0, %v5755_v8  ;;  %5768 = verf.f32 %v3769_v10  ;;  %v3772_v19 = vmul.f32 0.70710677, %v3642_v1  ;;  %4326 = vmatmul.mubr.bf16.gmra.mrb[144].mxu0 %v3982_v47  ;;  %v3531_v27 = vadd.f32 %v7698_v34, %v7472_v63 }
 0xd72   : > { %v5759_v41 = vpop.eup %5758  ;;  %v7765_v23 = vmul.f32 %v3888_v22, %v7705_v12  ;;  %v3892_v42 = vadd.f32 1.0, %v5757_v38  ;;  %5770 = verf.f32 %v3770_v51  ;;  %4423 = vmatmul.mubr.bf16.gmra.mrb[144].mxu1 %v3984_v5  ;;  %v3644_v24 = vadd.f32 %v7700_v36, %v7476_v35 }
 0xd73   : > { %v3951_v43 = vmul.f32 %v3887_v26, %v7711_v52  ;;  %v3954_v2 = vmul.f32 %v3890_v31, %v3698_v49  ;;  %v3891_v32 = vadd.f32 1.0, %v5759_v41  ;;  %5772 = verf.f32 %v3772_v19 }
 0xd74   : > { %v3889_v17 = vadd.f32 1.0, %v5753_v30  ;;  %v3956_v33 = vmul.f32 %v3892_v42, %v3700_v25  ;;  %v3771_v40 = vmul.f32 0.70710677, %v3531_v27  ;;  %v3773_v57 = vmul.f32 0.70710677, %v3644_v24 }
 0xd75   : > { %v5761_v63 = vpop.eup %5760  ;;  %v3955_v34 = vmul.f32 %v3891_v32, %v3699_v3  ;;  %v3987_v12 = vpack.c.bf16 %v3947_v45, %v7717_v29  ;;  %v3989_v46 = vpack.c.bf16 %v3949_v55, %v7731_v9  ;;  %v3986_v7 = vpack.c.bf16 %v7740_v21, %v7709_v4 }
 0xd76   : > { %v3893_v37 = vadd.f32 1.0, %v5761_v63  ;;  %5774 = verf.f32 %v3771_v40  ;;  %v3988_v35 = vpack.c.bf16 %v7743_v54, %v7714_v39  ;;  %v3990_v36 = vpack.c.bf16 %v3954_v2, %v7758_v56 }
 0xd77   : > { %5776 = verf.f32 %v3773_v57  ;;  %4333 = vmatprep.mubr.bf16.mxu0 %v3987_v12  ;;  %4430 = vmatprep.mubr.bf16.mxu1 %v3989_v46  ;;  %v3991_v52 = vpack.c.bf16 %v3955_v34, %v3951_v43  ;;  %v3992_v49 = vpack.c.bf16 %v3956_v33, %v7765_v23  ;;  %v3953_v29 = vmul.f32 %v3889_v17, %v7736_v44 }
 0xd78   : > { %v5763_v25 = vpop.eup %5762  ;;  %v3957_v9 = vmul.f32 %v3893_v37, %v3701_v53  ;;  %v3702_v55 = vmul.f32 0.5, %v7722_v13  ;;  %v3706_v22 = vmul.f32 0.5, %v3529_v16  ;;  %v3704_v50 = vmul.f32 0.5, %v7725_v61 }
 0xd79   : > { %v5765_v45 = vpop.eup %5764  ;;  %4334 = vmatmul.mubr.bf16.gmra.mrb[148].mxu0 %v3986_v7  ;;  %v3894_v39 = vadd.f32 1.0, %v5763_v25  ;;  %v3708_v44 = vmul.f32 0.5, %v3642_v1  ;;  %v3703_v38 = vmul.f32 0.5, %v7728_v15  ;;  %v3707_v31 = vmul.f32 0.5, %v3531_v27 }
 0xd7a   : > { %v5767_v4 = vpop.eup %5766  ;;  %4431 = vmatmul.mubr.bf16.gmra.mrb[148].mxu1 %v3988_v35  ;;  %4341 = vmatprep.mubr.bf16.mxu0 %v3991_v52  ;;  %v3993_v21 = vpack.c.bf16 %v3957_v9, %v3953_v29  ;;  %v3896_v3 = vadd.f32 1.0, %v5765_v45  ;;  %v3705_v16 = vmul.f32 0.5, %v7734_v20  ;;  %v3709_v41 = vmul.f32 0.5, %v3644_v24  ;;  %v7786_v20 = vld [vmem:[%s7980_s18] ss:$0 sm:$0xff] }
 0xd7b   : > { %v5769_v11 = vpop.eup %5768  ;;  %v3958_v0 = vmul.f32 %v3894_v39, %v3702_v55  ;;  %v3895_v30 = vadd.f32 1.0, %v5767_v4 }
 0xd7c   : > { %v5771_v54 = vpop.eup %5770  ;;  %4438 = vmatprep.mubr.bf16.mxu1 %v3993_v21  ;;  %v3960_v8 = vmul.f32 %v3896_v3, %v3704_v50  ;;  %v3897_v56 = vadd.f32 1.0, %v5769_v11 }
 0xd7d   : > { %v5773_v14 = vpop.eup %5772  ;;  %v3898_v10 = vadd.f32 1.0, %v5771_v54  ;;  %v3959_v23 = vmul.f32 %v3895_v30, %v3703_v38 }
 0xd7e   : > { %v3900_v53 = vadd.f32 1.0, %v5773_v14  ;;  %v3961_v43 = vmul.f32 %v3897_v56, %v3705_v16 }
 0xd7f   : > { %v3962_v26 = vmul.f32 %v3898_v10, %v3706_v22 }
 0xd80   : > { %v5775_v47 = vpop.eup %5774  ;;  %v3964_v51 = vmul.f32 %v3900_v53, %v3708_v44 }
 0xd81   : > { %v5777_v5 = vpop.eup %5776  ;;  %v3899_v19 = vadd.f32 1.0, %v5775_v47  ;;  %4342 = vmatmul.mubr.bf16.gmra.mrb[152].mxu0 %v3990_v36  ;;  %v3994_v13 = vpack.c.bf16 %v3962_v26, %v3958_v0 }
 0xd82   : > { %v3901_v61 = vadd.f32 1.0, %v5777_v5  ;;  %4439 = vmatmul.mubr.bf16.gmra.mrb[152].mxu1 %v3992_v49  ;;  %v3996_v1 = vpack.c.bf16 %v3964_v51, %v3960_v8 }
 0xd83   : > { %v3963_v42 = vmul.f32 %v3899_v19, %v3707_v31 }
 0xd84   : > { %v3965_v2 = vmul.f32 %v3901_v61, %v3709_v41 }
 0xd85   : > { %v3995_v32 = vpack.c.bf16 %v3963_v42, %v3959_v23 }
 0xd86   : > { %v3997_v17 = vpack.c.bf16 %v3965_v2, %v3961_v43 }
 0xd87   : > { %4349 = vmatprep.mubr.bf16.mxu0 %v3995_v32 }
 0xd88   : > { %4446 = vmatprep.mubr.bf16.mxu1 %v3997_v17 }
 0xd89   : > { %4350 = vmatmul.mubr.bf16.gmra.mrb[156].mxu0 %v3994_v13 }
 0xd8a   : > { %4447 = vmatmul.mubr.bf16.gmra.mrb[156].mxu1 %v3996_v1 }
 0xdcb   : > { %v4942_v15 = vpop.f32.mrb[128].mxu0  ;;  %v5006_v27 = vpop.f32.mrb[128].mxu1 }
 0xdcc   : > { %v4943_v24 = vpop.f32.mrb[129].mxu0  ;;  %v5007_v33 = vpop.f32.mrb[129].mxu1 }
 0xdcd   : > { %v4944_v40 = vadd.f32 %v4943_v24, %v4942_v15  ;;  %v5008_v57 = vadd.f32 %v5007_v33, %v5006_v27  ;;  %v4945_v63 = vpop.f32.mrb[130].mxu0  ;;  %v5009_v34 = vpop.f32.mrb[130].mxu1 }
 0xdce   : > { %v4946_v12 = vpop.f32.mrb[131].mxu0  ;;  %v5010_v46 = vpop.f32.mrb[131].mxu1 }
 0xdcf   : > { %v4296_v7 = vadd.f32 %v4944_v40, %v7786_v20  ;;  %v4947_v37 = vadd.f32 %v4946_v12, %v4945_v63  ;;  %v5011_v35 = vadd.f32 %v5010_v46, %v5009_v34 }
 0xdd1   : > { %v4393_v36 = vadd.f32 %v5008_v57, %v4296_v7  ;;  %v4299_v52 = vadd.f32 %v4947_v37, %v7786_v20 }
 0xdd3   : > { %v4455_v49 = vadd.f32 %v4393_v36, %v7230_v58  ;;  %v4396_v25 = vadd.f32 %v5011_v35, %v4299_v52  ;;  %v4948_v29 = vpop.f32.mrb[132].mxu0  ;;  %v5012_v45 = vpop.f32.mrb[132].mxu1 }
 0xdd4   : > { %v4949_v4 = vpop.f32.mrb[133].mxu0  ;;  %v5013_v11 = vpop.f32.mrb[133].mxu1 }
 0xdd5   : > { %4471 = vst [vmem:[%s7793_s2] sm:$0xff] %v4455_v49  ;;  %v4456_v9 = vadd.f32 %v4396_v25, %v7234_v6  ;;  %v4950_v21 = vadd.f32 %v4949_v4, %v4948_v29  ;;  %v4951_v39 = vpop.f32.mrb[134].mxu0  ;;  %v5014_v54 = vadd.f32 %v5013_v11, %v5012_v45  ;;  %v5015_v3 = vpop.f32.mrb[134].mxu1 }
 0xdd6   : > { %v4952_v58 = vpop.f32.mrb[135].mxu0  ;;  %v5016_v22 = vpop.f32.mrb[135].mxu1 }
 0xdd7   : > { %4472 = vst [vmem:[%s7793_s2 + $0x8] sm:$0xff] %v4456_v9  ;;  %v4304_v14 = vadd.f32 %v4950_v21, %v7786_v20  ;;  %v4953_v55 = vadd.f32 %v4952_v58, %v4951_v39  ;;  %v5017_v10 = vadd.f32 %v5016_v22, %v5015_v3 }
 0xdd9   : > { %v4401_v50 = vadd.f32 %v5014_v54, %v4304_v14  ;;  %v4307_v44 = vadd.f32 %v4953_v55, %v7786_v20  ;;  %v7981_v54 = vld [vmem:[#allocation22_spill] sm:$0xff] }
 0xddb   : > { %v4457_v6 = vadd.f32 %v4401_v50, %v7240_v59  ;;  %v4404_v53 = vadd.f32 %v5017_v10, %v4307_v44  ;;  %v4954_v0 = vpop.f32.mrb[136].mxu0  ;;  %v5018_v30 = vpop.f32.mrb[136].mxu1  ;;  %v7982_v10 = vld [vmem:[#allocation23_spill] sm:$0xff] }
 0xddc   : > { %v4955_v26 = vpop.f32.mrb[137].mxu0  ;;  %v5019_v56 = vpop.f32.mrb[137].mxu1 }
 0xddd   : > { %4473 = vst [vmem:[%s7793_s2 + $0x10] sm:$0xff] %v4457_v6  ;;  %v4458_v47 = vadd.f32 %v4404_v53, %v7244_v60  ;;  %v4956_v8 = vadd.f32 %v4955_v26, %v4954_v0  ;;  %v4957_v51 = vpop.f32.mrb[138].mxu0  ;;  %v5020_v5 = vadd.f32 %v5019_v56, %v5018_v30  ;;  %v5021_v38 = vpop.f32.mrb[138].mxu1 }
 0xdde   : > { %v4958_v31 = vpop.f32.mrb[139].mxu0  ;;  %v5022_v16 = vpop.f32.mrb[139].mxu1 }
 0xddf   : > { %4474 = vst [vmem:[%s7793_s2 + $0x18] sm:$0xff] %v4458_v47  ;;  %v4312_v19 = vadd.f32 %v4956_v8, %v7786_v20  ;;  %v4959_v13 = vadd.f32 %v4958_v31, %v4957_v51  ;;  %v5023_v59 = vadd.f32 %v5022_v16, %v5021_v38  ;;  %v7983_v31 = vld [vmem:[#allocation24_spill] sm:$0xff] }
 0xde1   : > { %v4409_v41 = vadd.f32 %v5020_v5, %v4312_v19  ;;  %v4315_v61 = vadd.f32 %v4959_v13, %v7786_v20 }
 0xde3   : > { %v4459_v1 = vadd.f32 %v4409_v41, %v7250_v28  ;;  %v4412_v60 = vadd.f32 %v5023_v59, %v4315_v61  ;;  %v4960_v23 = vpop.f32.mrb[140].mxu0  ;;  %v5024_v42 = vpop.f32.mrb[140].mxu1  ;;  %v7984_v61 = vld [vmem:[#allocation25_spill] sm:$0xff] }
 0xde4   : > { %v4961_v43 = vpop.f32.mrb[141].mxu0  ;;  %v5025_v17 = vpop.f32.mrb[141].mxu1 }
 0xde5   : > { %4475 = vst [vmem:[%s7793_s2 + $0x20] sm:$0xff] %v4459_v1  ;;  %v4460_v2 = vadd.f32 %v4412_v60, %v7254_v62  ;;  %v4962_v32 = vadd.f32 %v4961_v43, %v4960_v23  ;;  %v4963_v15 = vpop.f32.mrb[142].mxu0  ;;  %v5026_v27 = vadd.f32 %v5025_v17, %v5024_v42  ;;  %v5027_v24 = vpop.f32.mrb[142].mxu1 }
 0xde6   : > { %v4964_v33 = vpop.f32.mrb[143].mxu0  ;;  %v5028_v28 = vpop.f32.mrb[143].mxu1 }
 0xde7   : > { %4476 = vst [vmem:[%s7793_s2 + $0x28] sm:$0xff] %v4460_v2  ;;  %v4320_v40 = vadd.f32 %v4962_v32, %v7786_v20  ;;  %v4965_v57 = vadd.f32 %v4964_v33, %v4963_v15  ;;  %v5029_v63 = vadd.f32 %v5028_v28, %v5027_v24 }
 0xde9   : > { %v4417_v34 = vadd.f32 %v5026_v27, %v4320_v40  ;;  %v4323_v12 = vadd.f32 %v4965_v57, %v7786_v20  ;;  %v7985_v57 = vld [vmem:[#allocation26_spill] sm:$0xff] }
 0xdeb   : > { %v4461_v46 = vadd.f32 %v4417_v34, %v7260_v18  ;;  %v4420_v62 = vadd.f32 %v5029_v63, %v4323_v12 }
 0xded   : > { %4477 = vst [vmem:[%s7793_s2 + $0x30] sm:$0xff] %v4461_v46  ;;  %v4462_v7 = vadd.f32 %v4420_v62, %v7264_v48  ;;  %v7986_v62 = vld [vmem:[#allocation27_spill] sm:$0xff] }
 0xdef   : > { %4478 = vst [vmem:[%s7793_s2 + $0x38] sm:$0xff] %v4462_v7 }
 0xe44   : > { %v4966_v37 = vpop.f32.mrb[144].mxu0 }
 0xe45   : > { %v5030_v35 = vpop.f32.mrb[144].mxu1  ;;  %v4967_v36 = vpop.f32.mrb[145].mxu0 }
 0xe46   : > { %v4968_v52 = vadd.f32 %v4967_v36, %v4966_v37  ;;  %v5031_v49 = vpop.f32.mrb[145].mxu1  ;;  %v4969_v25 = vpop.f32.mrb[146].mxu0 }
 0xe47   : > { %v5032_v29 = vadd.f32 %v5031_v49, %v5030_v35  ;;  %v5033_v9 = vpop.f32.mrb[146].mxu1  ;;  %v4970_v45 = vpop.f32.mrb[147].mxu0 }
 0xe48   : > { %v4328_v4 = vadd.f32 %v4968_v52, %v7786_v20  ;;  %v4971_v21 = vadd.f32 %v4970_v45, %v4969_v25  ;;  %v5034_v11 = vpop.f32.mrb[147].mxu1 }
 0xe49   : > { %v5035_v18 = vadd.f32 %v5034_v11, %v5033_v9 }
 0xe4a   : > { %v4425_v39 = vadd.f32 %v5032_v29, %v4328_v4  ;;  %v4331_v48 = vadd.f32 %v4971_v21, %v7786_v20 }
 0xe4c   : > { %v4463_v3 = vadd.f32 %v4425_v39, %v7981_v54  ;;  %v4428_v58 = vadd.f32 %v5035_v18, %v4331_v48  ;;  %v4972_v14 = vpop.f32.mrb[148].mxu0  ;;  %v7987_v18 = vld [vmem:[#allocation28_spill] sm:$0xff]  ;;  %v7989_v54 = vld [vmem:[#allocation29_spill] sm:$0xff] }
 0xe4d   : > { %v5036_v55 = vpop.f32.mrb[148].mxu1  ;;  %v4973_v22 = vpop.f32.mrb[149].mxu0 }
 0xe4e   : > { %4479 = vst [vmem:[%s7793_s2 + $0x40] sm:$0xff] %v4463_v3  ;;  %v4464_v50 = vadd.f32 %v4428_v58, %v7982_v10  ;;  %v4974_v44 = vadd.f32 %v4973_v22, %v4972_v14  ;;  %v5037_v6 = vpop.f32.mrb[149].mxu1  ;;  %v4975_v53 = vpop.f32.mrb[150].mxu0 }
 0xe4f   : > { %v5038_v0 = vadd.f32 %v5037_v6, %v5036_v55  ;;  %v5039_v30 = vpop.f32.mrb[150].mxu1  ;;  %v4976_v26 = vpop.f32.mrb[151].mxu0 }
 0xe50   : > { %4480 = vst [vmem:[%s7793_s2 + $0x48] sm:$0xff] %v4464_v50  ;;  %v4336_v47 = vadd.f32 %v4974_v44, %v7786_v20  ;;  %v4977_v8 = vadd.f32 %v4976_v26, %v4975_v53  ;;  %v5040_v56 = vpop.f32.mrb[151].mxu1 }
 0xe51   : > { %v5041_v51 = vadd.f32 %v5040_v56, %v5039_v30 }
 0xe52   : > { %v4433_v5 = vadd.f32 %v5038_v0, %v4336_v47  ;;  %v4339_v38 = vadd.f32 %v4977_v8, %v7786_v20 }
 0xe54   : > { %v4465_v19 = vadd.f32 %v4433_v5, %v7983_v31  ;;  %v4436_v13 = vadd.f32 %v5041_v51, %v4339_v38  ;;  %v4978_v16 = vpop.f32.mrb[152].mxu0 }
 0xe55   : > { %v5042_v59 = vpop.f32.mrb[152].mxu1  ;;  %v4979_v41 = vpop.f32.mrb[153].mxu0 }
 0xe56   : > { %4481 = vst [vmem:[%s7793_s2 + $0x50] sm:$0xff] %v4465_v19  ;;  %v4466_v1 = vadd.f32 %v4436_v13, %v7984_v61  ;;  %v4980_v60 = vadd.f32 %v4979_v41, %v4978_v16  ;;  %v5043_v23 = vpop.f32.mrb[153].mxu1  ;;  %v4981_v42 = vpop.f32.mrb[154].mxu0 }
 0xe57   : > { %v5044_v43 = vadd.f32 %v5043_v23, %v5042_v59  ;;  %v5045_v2 = vpop.f32.mrb[154].mxu1  ;;  %v4982_v32 = vpop.f32.mrb[155].mxu0 }
 0xe58   : > { %4482 = vst [vmem:[%s7793_s2 + $0x58] sm:$0xff] %v4466_v1  ;;  %v4344_v17 = vadd.f32 %v4980_v60, %v7786_v20  ;;  %v4983_v15 = vadd.f32 %v4982_v32, %v4981_v42  ;;  %v5046_v27 = vpop.f32.mrb[155].mxu1 }
 0xe59   : > { %v5047_v24 = vadd.f32 %v5046_v27, %v5045_v2 }
 0xe5a   : > { %v4441_v33 = vadd.f32 %v5044_v43, %v4344_v17  ;;  %v4347_v40 = vadd.f32 %v4983_v15, %v7786_v20 }
 0xe5c   : > { %v4467_v28 = vadd.f32 %v4441_v33, %v7985_v57  ;;  %v4444_v63 = vadd.f32 %v5047_v24, %v4347_v40  ;;  %v4984_v34 = vpop.f32.mrb[156].mxu0 }
 0xe5d   : > { %v5048_v12 = vpop.f32.mrb[156].mxu1  ;;  %v4985_v46 = vpop.f32.mrb[157].mxu0 }
 0xe5e   : > { %4483 = vst [vmem:[%s7793_s2 + $0x60] sm:$0xff] %v4467_v28  ;;  %v4468_v7 = vadd.f32 %v4444_v63, %v7986_v62  ;;  %v4986_v37 = vadd.f32 %v4985_v46, %v4984_v34  ;;  %v5049_v35 = vpop.f32.mrb[157].mxu1  ;;  %v4987_v36 = vpop.f32.mrb[158].mxu0 }
 0xe5f   : > { %v5050_v52 = vadd.f32 %v5049_v35, %v5048_v12  ;;  %v5051_v49 = vpop.f32.mrb[158].mxu1  ;;  %v4988_v25 = vpop.f32.mrb[159].mxu0 }
 0xe60   : > { %4484 = vst [vmem:[%s7793_s2 + $0x68] sm:$0xff] %v4468_v7  ;;  %v4352_v29 = vadd.f32 %v4986_v37, %v7786_v20  ;;  %v4989_v9 = vadd.f32 %v4988_v25, %v4987_v36  ;;  %v5052_v45 = vpop.f32.mrb[159].mxu1 }
 0xe61   : > { %v5053_v4 = vadd.f32 %v5052_v45, %v5051_v49 }
 0xe62   : > { %v4449_v21 = vadd.f32 %v5050_v52, %v4352_v29  ;;  %v4355_v11 = vadd.f32 %v4989_v9, %v7786_v20 }
 0xe64   : > { %v4469_v39 = vadd.f32 %v4449_v21, %v7987_v18  ;;  %v4452_v48 = vadd.f32 %v5053_v4, %v4355_v11 }
 0xe66   : > { %4485 = vst [vmem:[%s7793_s2 + $0x70] sm:$0xff] %v4469_v39  ;;  %v4470_v3 = vadd.f32 %v4452_v48, %v7989_v54 }
 0xe68   : > { %4486 = vst [vmem:[%s7793_s2 + $0x78] sm:$0xff] %v4470_v3 }
 0xe69   : > { %5961 = shalt.err (!%p5958_p8)
}
 0xe6a   : > { %s5962_s18 = scalar_lea.hbm %s7842_s20, 2048  ;;  %s5966_s24 = scalar_lea.hbm %s7988_s17, 4096 }
 0xe6b   : > { %p5963_p6 = scmp.ne.s32.totalorder %s7842_s20, %s5962_s18  ;;  %p5967_p3 = scmp.lt.u32.totalorder %s7842_s20, %s7988_s17 }
 0xe6c   : > { %p5968_p5 = scmp.lt.u32.totalorder %s5966_s24, %s5962_s18  ;;  %p5970_p7 = scmp.lt.u32.totalorder %s5962_s18, %s7842_s20 }
 0xe6d   : > { %p5964_p11 = pnand %p5963_p6, %p7990_p10 }
 0xe6e   : > { %p5969_p9 = por %p5968_p5, %p5967_p3 }
 0xe6f   : > { %p5965_p12 = pneg %p5964_p11 }
 0xe70   : > { %p5971_p4 = por %p5970_p7, %p5969_p9 }
 0xe72   : > { %p5972_p1 = pnand %p5971_p4, %p5965_p12 }
 0xe74   : > { %5975 = shalt.err (!%p5972_p1)
}
 0xe75   : > { %s6044_s14 = smov 128   ;;  %s6045_s13 = smov 8  }
 0xe76   : > { %5204 = dma.vmem_to_hbm [thread:$0]  (%p7990_p10), %s7844_s10, 2048, %s7842_s20, %s4488_s15, %s6044_s14, %s6044_s14, %s6045_s13  }
 0xe77 PF: > { %s4516_s12 = sand.u32 1, %s6014_s25   ;;  %p7991_p13 = scmp.ne.s32.totalorder %s7943_s30, 0 }
 0xe78   : > { %p7992_p0 = scmp.ge.s32.totalorder %s6026_s28, 2  ;;  %s4517_s18 = scalar_lea.sflag [#allocation6], %s4516_s12 }
 0xe7a   : > { %p5227_p2 = pnand %p7992_p0, %p7991_p13 }
 0xe7c   : > { %6009 = dma.done.wait (!%p5227_p2), %s4517_s18, 2048  }
 0xe7d   : > { %6011 = vsyncadd (!%p5227_p2), %s4517_s18, 4294965248  ;;  %p29_p8 = scmp.ge.s32.totalorder %s6281_s16, 4   ;;  %s7993_s25 = smov %s6018_s26 }
 0xe7e   : > { %s7994_s26 = smov %s6022_s27  ;;  %s7995_s27 = smov %s6293_s29 }
 0xe7f   : > { %s7996_s28 = smov %s6281_s16  ;;  %31 = sbr.rel (!%p29_p8) target bundleno = 14 (0xe), region = 137 }
 0xe86   :  { %4522 = vsyncpa [#allocation5], 1 }
 0xe87   :  { %4524 = vsyncpa [#allocation5 + $0x1], 1 }
 0xe88   :  { %4525 = vsyncpa [#allocation8], 1 }
 0xe89   :  { %4526 = vsyncpa [#allocation11], 1 }
 0xe8a   :  { %4527 = vsyncpa [#allocation14], 1 }
 0xe8b   :  { %4528 = vsyncpa [#allocation6], 1 }
 0xe8c   :  { %4530 = vsyncpa [#allocation6 + $0x1], 1 }

</bundles_post_ra>
